<compile_context>
chip_gen: v7x
topology: tpu7x:2x2x1
jax: 0.10.0
libtpu: 0.0.40
codegen_flags: <defaults>
</compile_context>

<pallas_src>
import functools
import math

import jax
import jax.numpy as jnp
import numpy as np
from jax.experimental import pallas as pl
from jax.experimental.pallas import tpu as pltpu


# ------------------ fused QKV projection + rotary + attention layout ------------------

def _qkv_rope_kernel(x_ref, w_ref, cq_ref, sq_ref, ck_ref, sk_ref,
                     q_ref, k_ref, v_ref, *, heads, dim_head):
    # x_ref : (1, ts, dim)        w_ref : (3*inner, dim)   [nn.Linear layout]
    # c*/s* : (ts, d)             outputs: (1, H, ts, d)
    inner = heads * dim_head
    half = dim_head // 2

    qkv = jax.lax.dot_general(
        x_ref[0], w_ref[...],
        dimension_numbers=(((1,), (1,)), ((), ())),
        preferred_element_type=jnp.float32)                       # (ts, 3*inner) f32

    cq, sq = cq_ref[...], sq_ref[...]
    ck, sk = ck_ref[...], sk_ref[...]

    def rope(t, c, s):
        rot = jnp.concatenate([-t[:, half:], t[:, :half]], axis=-1)
        return t * c + rot * s

    for h in range(heads):                                        # static unroll (H small)
        qh = qkv[:, h * dim_head:(h + 1) * dim_head]
        kh = qkv[:, inner + h * dim_head: inner + (h + 1) * dim_head]
        vh = qkv[:, 2 * inner + h * dim_head: 2 * inner + (h + 1) * dim_head]
        q_ref[0, h, :, :] = rope(qh, cq, sq).astype(q_ref.dtype)  # scale folded into cq/sq
        k_ref[0, h, :, :] = rope(kh, ck, sk).astype(k_ref.dtype)
        v_ref[0, h, :, :] = vh.astype(v_ref.dtype)


def pallas_qkv_rope(x, w_qkv, cos_q, sin_q, cos_k, sin_k, *, heads, dim_head):
    """x: (B, n_padded, dim) -> q, k, v each (B, H, n_padded, d), rope + scale applied."""
    B, Np, D = x.shape
    d = dim_head
    ts = math.gcd(Np, 512)                                        # seq tile (multiple of 8)

    kernel = functools.partial(_qkv_rope_kernel, heads=heads, dim_head=dim_head)
    out_sd = jax.ShapeDtypeStruct((B, heads, Np, d), x.dtype)
    qkv_spec = pl.BlockSpec((1, heads, ts, d), lambda b, s: (b, 0, s, 0))
    tbl_spec = pl.BlockSpec((ts, d), lambda b, s: (s, 0))

    return pl.pallas_call(
        kernel,
        out_shape=(out_sd, out_sd, out_sd),
        grid=(B, Np // ts),
        in_specs=[
            pl.BlockSpec((1, ts, D), lambda b, s: (b, s, 0)),
            pl.BlockSpec((3 * heads * d, D), lambda b, s: (0, 0)),   # weight VMEM-resident
            tbl_spec, tbl_spec, tbl_spec, tbl_spec,
        ],
        out_specs=(qkv_spec, qkv_spec, qkv_spec),
        compiler_params=pltpu.CompilerParams(
            dimension_semantics=("parallel", "parallel")),
    )(x, w_qkv, cos_q, sin_q, cos_k, sin_k)


# --------------------------- local attention + fused out-proj -------------------------

def _local_attn_kernel(q_ref, kp_ref, kc_ref, kn_ref, vp_ref, vc_ref, vn_ref,
                       wo_ref, o_ref, acc_ref, *, hc):
    # q_ref / k* / v* : (1, hc, 1, w, d)     wo_ref: (1, dim, hc*d)
    # o_ref           : (1, w, dim)          acc_ref: (w, dim) f32 scratch
    win = pl.program_id(1)
    n_win = pl.num_programs(1)
    hci = pl.program_id(2)
    n_hc = pl.num_programs(2)

    w = q_ref.shape[3]
    d = q_ref.shape[4]
    neg = jnp.float32(-1e30)
    zero = jnp.float32(0.0)

    q = q_ref[...].reshape(hc, w, d)
    kp = kp_ref[...].reshape(hc, w, d)
    kc = kc_ref[...].reshape(hc, w, d)
    kn = kn_ref[...].reshape(hc, w, d)
    vp = vp_ref[...].reshape(hc, w, d)
    vc = vc_ref[...].reshape(hc, w, d)
    vn = vn_ref[...].reshape(hc, w, d)

    # exact_windowsize / look-around mask, regenerated in-kernel:
    #   prev window: attend keys j >= i; whole block masked for window 0 (front pad).
    #   cur  window: fully attended.
    #   next window: attend keys j <= i; whole block masked for the last window (back pad).
    qi = jax.lax.broadcasted_iota(jnp.int32, (w, w), 0)
    kj = jax.lax.broadcasted_iota(jnp.int32, (w, w), 1)
    bias_prev = jnp.where((kj < qi) | (win == 0), neg, zero)[None]
    bias_next = jnp.where((kj > qi) | (win == n_win - 1), neg, zero)[None]

    # Shift-based partial matmuls (no 3x look-around materialization).
    s_p = jnp.einsum('hqd,hkd->hqk', q, kp, preferred_element_type=jnp.float32) + bias_prev
    s_c = jnp.einsum('hqd,hkd->hqk', q, kc, preferred_element_type=jnp.float32)
    s_n = jnp.einsum('hqd,hkd->hqk', q, kn, preferred_element_type=jnp.float32) + bias_next

    m = jnp.maximum(jnp.maximum(s_p.max(-1, keepdims=True), s_c.max(-1, keepdims=True)),
                    s_n.max(-1, keepdims=True))
    p_p = jnp.exp(s_p - m)
    p_c = jnp.exp(s_c - m)
    p_n = jnp.exp(s_n - m)
    denom = (p_p.sum(-1, keepdims=True) + p_c.sum(-1, keepdims=True)
             + p_n.sum(-1, keepdims=True))
    inv = pl.reciprocal(denom, approx=True)

    out = (jnp.einsum('hqk,hkd->hqd', p_p.astype(vp.dtype), vp,
                      preferred_element_type=jnp.float32)
           + jnp.einsum('hqk,hkd->hqd', p_c.astype(vc.dtype), vc,
                        preferred_element_type=jnp.float32)
           + jnp.einsum('hqk,hkd->hqd', p_n.astype(vn.dtype), vn,
                        preferred_element_type=jnp.float32))
    out = out * inv                                               # (hc, w, d) f32

    # Fused output projection: sum_h out_h @ W_out[:, h*d:(h+1)*d]^T, accumulated over
    # head-chunks in a f32 scratch -> lane-dense (w, dim) store, no HBM transpose pass.
    wo = wo_ref[...].reshape(wo_ref.shape[1], wo_ref.shape[2])    # (dim, hc*d)
    proj = None
    for j in range(hc):                                           # static unroll (hc small)
        contrib = jax.lax.dot_general(
            out[j].astype(wo.dtype), wo[:, j * d:(j + 1) * d],
            dimension_numbers=(((1,), (1,)), ((), ())),
            preferred_element_type=jnp.float32)                   # (w, dim)
        proj = contrib if proj is None else proj + contrib

    @pl.when(hci == 0)
    def _():
        acc_ref[...] = jnp.zeros_like(acc_ref)

    acc_ref[...] += proj

    @pl.when(hci == n_hc - 1)
    def _():
        o_ref[0] = acc_ref[...].astype(o_ref.dtype)


def pallas_local_attention(q_b, k_b, v_b, wo_chunks, *, out_dtype):
    """q_b/k_b/v_b: (B, H, windows, w, d); wo_chunks: (H//hc, dim, hc*d) -> (B, n_padded, dim)."""
    B, H, windows, w, d = q_b.shape
    n_hc, dim, hcd = wo_chunks.shape
    hc = hcd // d
    assert n_hc * hc == H

    kv_block = (1, hc, 1, w, d)

    def cur_map(b, n, h):
        return (b, h, n, 0, 0)

    def prev_map(b, n, h):
        # window 0's "previous" block is fully masked in-kernel; clamp keeps the index valid.
        return (b, h, jnp.maximum(n - 1, 0), 0, 0)

    def next_map(b, n, h):
        # last window's "next" block is fully masked in-kernel; clamp keeps the index valid.
        return (b, h, jnp.minimum(n + 1, windows - 1), 0, 0)

    kernel = functools.partial(_local_attn_kernel, hc=hc)
    return pl.pallas_call(
        kernel,
        out_shape=jax.ShapeDtypeStruct((B, windows * w, dim), out_dtype),
        grid=(B, windows, n_hc),
        in_specs=[
            pl.BlockSpec(kv_block, cur_map),                       # q
            pl.BlockSpec(kv_block, prev_map),                      # k prev
            pl.BlockSpec(kv_block, cur_map),                       # k cur
            pl.BlockSpec(kv_block, next_map),                      # k next
            pl.BlockSpec(kv_block, prev_map),                      # v prev
            pl.BlockSpec(kv_block, cur_map),                       # v cur
            pl.BlockSpec(kv_block, next_map),                      # v next
            pl.BlockSpec((1, dim, hcd), lambda b, n, h: (h, 0, 0)),  # W_out head-chunk slab
        ],
        out_specs=pl.BlockSpec((1, w, dim), lambda b, n, h: (b, n, 0)),
        scratch_shapes=[pltpu.VMEM((w, dim), jnp.float32)],
        compiler_params=pltpu.CompilerParams(
            dimension_semantics=("parallel", "parallel", "arbitrary")),
    )(q_b, k_b, k_b, k_b, v_b, v_b, v_b, wo_chunks)


# ------------------------------- host-side glue ---------------------------------------

def _rope_tables(n, d, offset, scale=1.0):
    """cos/sin tables (n, d) for absolute positions arange(n)+offset (GPT-NeoX pairing)."""
    inv_freq = 1.0 / (10000.0 ** (jnp.arange(0, d, 2, dtype=jnp.float32) / d))
    pos = jnp.arange(n, dtype=jnp.float32) + offset
    freqs = pos[:, None] * inv_freq[None, :]
    freqs = jnp.concatenate([freqs, freqs], axis=-1)
    return jnp.cos(freqs) * scale, jnp.sin(freqs) * scale


def local_mha_forward(x, w_qkv, w_out, *, heads, dim_head, window_size, head_chunk=None):
    B, N, D = x.shape
    H, d, wsz = heads, dim_head, window_size
    hc = head_chunk or H
    assert H % hc == 0
    assert wsz % 8 == 0 and d % 2 == 0          # TPU sublane / rope constraints

    # autopad=True: zero-pad sequence to a multiple of window_size.
    n_padded = int(math.ceil(N / wsz) * wsz)
    pad = n_padded - N
    xp = jnp.pad(x, ((0, 0), (0, pad), (0, 0))) if pad else x
    windows = n_padded // wsz

    # Rotary hoisted to absolute-position tables: +2w offset for q (with 1/sqrt(d) scale
    # folded in) and +w for k reproduces exactly the per-window angle differences of the
    # reference (scores depend only on angle differences), so no rotate-half in the hot loop.
    cos_q, sin_q = _rope_tables(n_padded, d, offset=2 * wsz, scale=d ** -0.5)
    cos_k, sin_k = _rope_tables(n_padded, d, offset=wsz)

    q_f, k_f, v_f = pallas_qkv_rope(xp, w_qkv, cos_q, sin_q, cos_k, sin_k,
                                    heads=H, dim_head=d)
    bucket = lambda t: t.reshape(B, H, windows, wsz, d)           # free view
    q_b, k_b, v_b = bucket(q_f), bucket(k_f), bucket(v_f)

    # W_out (dim, H*d) -> (H//hc, dim, hc*d), one slab per head-chunk (fused out-proj).
    wo_chunks = (w_out.reshape(D, H, d).transpose(1, 0, 2)
                 .reshape(H // hc, hc, D, d).transpose(0, 2, 1, 3)
                 .reshape(H // hc, D, hc * d))

    out = pallas_local_attention(q_b, k_b, v_b, wo_chunks, out_dtype=x.dtype)
    return out[:, :N]                                             # drop autopad


# --------------------------- pure-JAX reference (validation) --------------------------

def _look_around(buckets, pad_value=-1.0):
    windows = buckets.shape[1]
    padded = jnp.pad(buckets, ((0, 0), (1, 1), (0, 0), (0, 0)),
                     constant_values=pad_value)
    segs = [padded[:, s:s + windows] for s in range(3)]
    return jnp.concatenate(segs, axis=2)


def reference_forward(x, w_qkv, w_out, *, heads, dim_head, window_size):
    B, N, D = x.shape
    inner = heads * dim_head
    wsz = window_size

    qkv = x.reshape(B * N, D) @ w_qkv.T
    qkv = qkv.reshape(B, N, 3, heads, dim_head)

    def split(i):
        return qkv[:, :, i].transpose(0, 2, 1, 3).reshape(B * heads, N, dim_head)

    q, k, v = split(0), split(1), split(2)

    n_padded = int(math.ceil(N / wsz) * wsz)
    pad = n_padded - N
    if pad:
        q, k, v = (jnp.pad(t, ((0, 0), (0, pad), (0, 0))) for t in (q, k, v))
    windows = n_padded // wsz

    bucket = lambda t: t.reshape(B * heads, windows, wsz, dim_head)
    bq, bk, bv = map(bucket, (q, k, v))
    bq = bq * (dim_head ** -0.5)
    bk = _look_around(bk)
    bv = _look_around(bv)

    inv_freq = 1.0 / (10000.0 ** (jnp.arange(0, dim_head, 2, dtype=jnp.float32) / dim_head))
    t_pos = jnp.arange(3 * wsz, dtype=jnp.float32)
    freqs = jnp.concatenate([t_pos[:, None] * inv_freq[None, :]] * 2, axis=-1)
    cos_k, sin_k = jnp.cos(freqs), jnp.sin(freqs)
    cos_q, sin_q = cos_k[-wsz:], sin_k[-wsz:]
    half = dim_head // 2
    rot = lambda t: jnp.concatenate([-t[..., half:], t[..., :half]], axis=-1)
    bq = bq * cos_q + rot(bq) * sin_q
    bk = bk * cos_k + rot(bk) * sin_k

    sim = jnp.einsum('bwid,bwjd->bwij', bq, bk)
    pq = jnp.arange(n_padded).reshape(windows, wsz)[:, :, None]
    pos = jnp.arange(n_padded, dtype=jnp.float32).reshape(1, windows, wsz, 1)
    pk = _look_around(pos)[0, :, :, 0].astype(jnp.int32)[:, None, :]
    pad_mask = pk == -1
    window_mask = ((pk - wsz) > pq) | (pq > (pk + wsz)) | pad_mask
    sim = jnp.where(window_mask[None], -jnp.finfo(jnp.float32).max, sim)
    attn = jax.nn.softmax(sim, axis=-1)
    out = jnp.einsum('bwij,bwjd->bwid', attn, bv)

    out = out.reshape(B, heads, n_padded, dim_head)[:, :, :N]
    out = out.transpose(0, 2, 1, 3).reshape(B * N, inner)
    return (out @ w_out.T).reshape(B, N, D)


# --------------------------------------- main -----------------------------------------

if __name__ == "__main__":
    B, N, DIM = 2, 64, 32
    HEADS, DIM_HEAD, WINDOW = 4, 16, 16
    INNER = HEADS * DIM_HEAD

    key = jax.random.PRNGKey(0)
    kx, kq, ko = jax.random.split(key, 3)
    x = jax.random.normal(kx, (B, N, DIM), dtype=jnp.float32)
    # nn.Linear(dim, inner*3, bias=False).weight : (3*inner, dim)
    w_qkv = jax.random.normal(kq, (3 * INNER, DIM), dtype=jnp.float32) * 0.05
    # nn.Linear(inner, dim, bias=False).weight   : (dim, inner)
    w_out = jax.random.normal(ko, (DIM, INNER), dtype=jnp.float32) * 0.05

    fwd = jax.jit(functools.partial(local_mha_forward, heads=HEADS, dim_head=DIM_HEAD,
                                    window_size=WINDOW, head_chunk=2))
    out = jax.block_until_ready(fwd(x, w_qkv, w_out))

    ref = reference_forward(x, w_qkv, w_out, heads=HEADS, dim_head=DIM_HEAD,
                            window_size=WINDOW)
    np.testing.assert_allclose(np.asarray(out), np.asarray(ref), rtol=5e-3, atol=5e-3)
    assert out.shape == (B, N, DIM) and out.dtype == jnp.float32

    print("KERNEL_OK")
</pallas_src>

<mosaic_0001>
module attributes {stable_mosaic.version = 11 : i64} {
  func.func @_qkv_rope_kernel(%arg0: i32, %arg1: i32, %arg2: memref<1x64x32xf32, #tpu.memory_space<vmem>>, %arg3: memref<192x32xf32, #tpu.memory_space<vmem>>, %arg4: memref<64x16xf32, #tpu.memory_space<vmem>>, %arg5: memref<64x16xf32, #tpu.memory_space<vmem>>, %arg6: memref<64x16xf32, #tpu.memory_space<vmem>>, %arg7: memref<64x16xf32, #tpu.memory_space<vmem>>, %arg8: memref<1x4x64x16xf32, #tpu.memory_space<vmem>>, %arg9: memref<1x4x64x16xf32, #tpu.memory_space<vmem>>, %arg10: memref<1x4x64x16xf32, #tpu.memory_space<vmem>>) attributes {dimension_semantics = [#tpu.dimension_semantics<parallel>, #tpu.dimension_semantics<parallel>], iteration_bounds = array<i64: 2, 1>, scalar_prefetch = 0 : i64, scratch_operands = 0 : i64, tpu.core_type = #tpu.core_type<tc>, window_params = [{transform_indices = @transform_0, window_bounds = array<i64: 1, 64, 32>}, {pipeline_mode = #tpu.pipeline_mode<synchronous>, transform_indices = @transform_1, window_bounds = array<i64: 192, 32>}, {transform_indices = @transform_2, window_bounds = array<i64: 64, 16>}, {transform_indices = @transform_3, window_bounds = array<i64: 64, 16>}, {transform_indices = @transform_4, window_bounds = array<i64: 64, 16>}, {transform_indices = @transform_5, window_bounds = array<i64: 64, 16>}, {transform_indices = @transform_6, window_bounds = array<i64: 1, 4, 64, 16>}, {transform_indices = @transform_7, window_bounds = array<i64: 1, 4, 64, 16>}, {transform_indices = @transform_8, window_bounds = array<i64: 1, 4, 64, 16>}]} {
    %c0 = arith.constant 0 : index
    %c0_0 = arith.constant 0 : index
    %c0_1 = arith.constant 0 : index
    %0 = vector.load %arg2[%c0, %c0_0, %c0_1] : memref<1x64x32xf32, #tpu.memory_space<vmem>>, vector<1x64x32xf32>
    %1 = vector.shape_cast %0 : vector<1x64x32xf32> to vector<64x32xf32>
    %c0_2 = arith.constant 0 : index
    %c0_3 = arith.constant 0 : index
    %2 = vector.load %arg3[%c0_2, %c0_3] : memref<192x32xf32, #tpu.memory_space<vmem>>, vector<192x32xf32>
    %cst = arith.constant dense<0.000000e+00> : vector<64x192xf32>
    %3 = tpu.matmul %1, %2, %cst {dimension_numbers = #tpu.dot_dimension_numbers<[1], [1], [0], [0], [0, 0, 1, 0], [], []>} : vector<64x32xf32>, vector<192x32xf32>, vector<64x192xf32> -> vector<64x192xf32>
    %c0_4 = arith.constant 0 : index
    %c0_5 = arith.constant 0 : index
    %4 = vector.load %arg4[%c0_4, %c0_5] : memref<64x16xf32, #tpu.memory_space<vmem>>, vector<64x16xf32>
    %c0_6 = arith.constant 0 : index
    %c0_7 = arith.constant 0 : index
    %5 = vector.load %arg5[%c0_6, %c0_7] : memref<64x16xf32, #tpu.memory_space<vmem>>, vector<64x16xf32>
    %c0_8 = arith.constant 0 : index
    %c0_9 = arith.constant 0 : index
    %6 = vector.load %arg6[%c0_8, %c0_9] : memref<64x16xf32, #tpu.memory_space<vmem>>, vector<64x16xf32>
    %c0_10 = arith.constant 0 : index
    %c0_11 = arith.constant 0 : index
    %7 = vector.load %arg7[%c0_10, %c0_11] : memref<64x16xf32, #tpu.memory_space<vmem>>, vector<64x16xf32>
    %8 = vector.extract_strided_slice %3 {offsets = [0, 0], sizes = [64, 16], strides = [1, 1]} : vector<64x192xf32> to vector<64x16xf32>
    %9 = vector.extract_strided_slice %3 {offsets = [0, 64], sizes = [64, 16], strides = [1, 1]} : vector<64x192xf32> to vector<64x16xf32>
    %10 = vector.extract_strided_slice %3 {offsets = [0, 128], sizes = [64, 16], strides = [1, 1]} : vector<64x192xf32> to vector<64x16xf32>
    %11 = vector.extract_strided_slice %8 {offsets = [0, 8], sizes = [64, 8], strides = [1, 1]} : vector<64x16xf32> to vector<64x8xf32>
    %cst_12 = arith.constant 0.000000e+00 : f32
    %12 = vector.broadcast %cst_12 : f32 to vector<64x8xf32>
    %13 = arith.subf %12, %11 : vector<64x8xf32>
    %14 = vector.extract_strided_slice %8 {offsets = [0, 0], sizes = [64, 8], strides = [1, 1]} : vector<64x16xf32> to vector<64x8xf32>
    %15 = tpu.concatenate %13, %14 in 1 : vector<64x8xf32>, vector<64x8xf32> -> vector<64x16xf32>
    %16 = arith.mulf %8, %4 : vector<64x16xf32>
    %17 = arith.mulf %15, %5 : vector<64x16xf32>
    %18 = arith.addf %16, %17 : vector<64x16xf32>
    %c0_13 = arith.constant 0 : index
    %c0_14 = arith.constant 0 : index
    %c0_15 = arith.constant 0 : index
    %c0_16 = arith.constant 0 : index
    %19 = vector.load %arg8[%c0_13, %c0_14, %c0_15, %c0_16] : memref<1x4x64x16xf32, #tpu.memory_space<vmem>>, vector<1x1x64x16xf32>
    %20 = vector.shape_cast %19 : vector<1x1x64x16xf32> to vector<64x16xf32>
    %21 = vector.shape_cast %18 : vector<64x16xf32> to vector<1x1x64x16xf32>
    tpu.vector_store %arg8[%c0_13, %c0_14, %c0_15, %c0_16], %21 {strides = array<i32>} : memref<1x4x64x16xf32, #tpu.memory_space<vmem>>, vector<1x1x64x16xf32>,
    %22 = vector.extract_strided_slice %9 {offsets = [0, 8], sizes = [64, 8], strides = [1, 1]} : vector<64x16xf32> to vector<64x8xf32>
    %cst_17 = arith.constant 0.000000e+00 : f32
    %23 = vector.broadcast %cst_17 : f32 to vector<64x8xf32>
    %24 = arith.subf %23, %22 : vector<64x8xf32>
    %25 = vector.extract_strided_slice %9 {offsets = [0, 0], sizes = [64, 8], strides = [1, 1]} : vector<64x16xf32> to vector<64x8xf32>
    %26 = tpu.concatenate %24, %25 in 1 : vector<64x8xf32>, vector<64x8xf32> -> vector<64x16xf32>
    %27 = arith.mulf %9, %6 : vector<64x16xf32>
    %28 = arith.mulf %26, %7 : vector<64x16xf32>
    %29 = arith.addf %27, %28 : vector<64x16xf32>
    %c0_18 = arith.constant 0 : index
    %c0_19 = arith.constant 0 : index
    %c0_20 = arith.constant 0 : index
    %c0_21 = arith.constant 0 : index
    %30 = vector.load %arg9[%c0_18, %c0_19, %c0_20, %c0_21] : memref<1x4x64x16xf32, #tpu.memory_space<vmem>>, vector<1x1x64x16xf32>
    %31 = vector.shape_cast %30 : vector<1x1x64x16xf32> to vector<64x16xf32>
    %32 = vector.shape_cast %29 : vector<64x16xf32> to vector<1x1x64x16xf32>
    tpu.vector_store %arg9[%c0_18, %c0_19, %c0_20, %c0_21], %32 {strides = array<i32>} : memref<1x4x64x16xf32, #tpu.memory_space<vmem>>, vector<1x1x64x16xf32>,
    %c0_22 = arith.constant 0 : index
    %c0_23 = arith.constant 0 : index
    %c0_24 = arith.constant 0 : index
    %c0_25 = arith.constant 0 : index
    %33 = vector.load %arg10[%c0_22, %c0_23, %c0_24, %c0_25] : memref<1x4x64x16xf32, #tpu.memory_space<vmem>>, vector<1x1x64x16xf32>
    %34 = vector.shape_cast %33 : vector<1x1x64x16xf32> to vector<64x16xf32>
    %35 = vector.shape_cast %10 : vector<64x16xf32> to vector<1x1x64x16xf32>
    tpu.vector_store %arg10[%c0_22, %c0_23, %c0_24, %c0_25], %35 {strides = array<i32>} : memref<1x4x64x16xf32, #tpu.memory_space<vmem>>, vector<1x1x64x16xf32>,
    %36 = vector.extract_strided_slice %3 {offsets = [0, 16], sizes = [64, 16], strides = [1, 1]} : vector<64x192xf32> to vector<64x16xf32>
    %37 = vector.extract_strided_slice %3 {offsets = [0, 80], sizes = [64, 16], strides = [1, 1]} : vector<64x192xf32> to vector<64x16xf32>
    %38 = vector.extract_strided_slice %3 {offsets = [0, 144], sizes = [64, 16], strides = [1, 1]} : vector<64x192xf32> to vector<64x16xf32>
    %39 = vector.extract_strided_slice %36 {offsets = [0, 8], sizes = [64, 8], strides = [1, 1]} : vector<64x16xf32> to vector<64x8xf32>
    %cst_26 = arith.constant 0.000000e+00 : f32
    %40 = vector.broadcast %cst_26 : f32 to vector<64x8xf32>
    %41 = arith.subf %40, %39 : vector<64x8xf32>
    %42 = vector.extract_strided_slice %36 {offsets = [0, 0], sizes = [64, 8], strides = [1, 1]} : vector<64x16xf32> to vector<64x8xf32>
    %43 = tpu.concatenate %41, %42 in 1 : vector<64x8xf32>, vector<64x8xf32> -> vector<64x16xf32>
    %44 = arith.mulf %36, %4 : vector<64x16xf32>
    %45 = arith.mulf %43, %5 : vector<64x16xf32>
    %46 = arith.addf %44, %45 : vector<64x16xf32>
    %c0_27 = arith.constant 0 : index
    %c1 = arith.constant 1 : index
    %c0_28 = arith.constant 0 : index
    %c0_29 = arith.constant 0 : index
    %47 = vector.load %arg8[%c0_27, %c1, %c0_28, %c0_29] : memref<1x4x64x16xf32, #tpu.memory_space<vmem>>, vector<1x1x64x16xf32>
    %48 = vector.shape_cast %47 : vector<1x1x64x16xf32> to vector<64x16xf32>
    %49 = vector.shape_cast %46 : vector<64x16xf32> to vector<1x1x64x16xf32>
    tpu.vector_store %arg8[%c0_27, %c1, %c0_28, %c0_29], %49 {strides = array<i32>} : memref<1x4x64x16xf32, #tpu.memory_space<vmem>>, vector<1x1x64x16xf32>,
    %50 = vector.extract_strided_slice %37 {offsets = [0, 8], sizes = [64, 8], strides = [1, 1]} : vector<64x16xf32> to vector<64x8xf32>
    %cst_30 = arith.constant 0.000000e+00 : f32
    %51 = vector.broadcast %cst_30 : f32 to vector<64x8xf32>
    %52 = arith.subf %51, %50 : vector<64x8xf32>
    %53 = vector.extract_strided_slice %37 {offsets = [0, 0], sizes = [64, 8], strides = [1, 1]} : vector<64x16xf32> to vector<64x8xf32>
    %54 = tpu.concatenate %52, %53 in 1 : vector<64x8xf32>, vector<64x8xf32> -> vector<64x16xf32>
    %55 = arith.mulf %37, %6 : vector<64x16xf32>
    %56 = arith.mulf %54, %7 : vector<64x16xf32>
    %57 = arith.addf %55, %56 : vector<64x16xf32>
    %c0_31 = arith.constant 0 : index
    %c1_32 = arith.constant 1 : index
    %c0_33 = arith.constant 0 : index
    %c0_34 = arith.constant 0 : index
    %58 = vector.load %arg9[%c0_31, %c1_32, %c0_33, %c0_34] : memref<1x4x64x16xf32, #tpu.memory_space<vmem>>, vector<1x1x64x16xf32>
    %59 = vector.shape_cast %58 : vector<1x1x64x16xf32> to vector<64x16xf32>
    %60 = vector.shape_cast %57 : vector<64x16xf32> to vector<1x1x64x16xf32>
    tpu.vector_store %arg9[%c0_31, %c1_32, %c0_33, %c0_34], %60 {strides = array<i32>} : memref<1x4x64x16xf32, #tpu.memory_space<vmem>>, vector<1x1x64x16xf32>,
    %c0_35 = arith.constant 0 : index
    %c1_36 = arith.constant 1 : index
    %c0_37 = arith.constant 0 : index
    %c0_38 = arith.constant 0 : index
    %61 = vector.load %arg10[%c0_35, %c1_36, %c0_37, %c0_38] : memref<1x4x64x16xf32, #tpu.memory_space<vmem>>, vector<1x1x64x16xf32>
    %62 = vector.shape_cast %61 : vector<1x1x64x16xf32> to vector<64x16xf32>
    %63 = vector.shape_cast %38 : vector<64x16xf32> to vector<1x1x64x16xf32>
    tpu.vector_store %arg10[%c0_35, %c1_36, %c0_37, %c0_38], %63 {strides = array<i32>} : memref<1x4x64x16xf32, #tpu.memory_space<vmem>>, vector<1x1x64x16xf32>,
    %64 = vector.extract_strided_slice %3 {offsets = [0, 32], sizes = [64, 16], strides = [1, 1]} : vector<64x192xf32> to vector<64x16xf32>
    %65 = vector.extract_strided_slice %3 {offsets = [0, 96], sizes = [64, 16], strides = [1, 1]} : vector<64x192xf32> to vector<64x16xf32>
    %66 = vector.extract_strided_slice %3 {offsets = [0, 160], sizes = [64, 16], strides = [1, 1]} : vector<64x192xf32> to vector<64x16xf32>
    %67 = vector.extract_strided_slice %64 {offsets = [0, 8], sizes = [64, 8], strides = [1, 1]} : vector<64x16xf32> to vector<64x8xf32>
    %cst_39 = arith.constant 0.000000e+00 : f32
    %68 = vector.broadcast %cst_39 : f32 to vector<64x8xf32>
    %69 = arith.subf %68, %67 : vector<64x8xf32>
    %70 = vector.extract_strided_slice %64 {offsets = [0, 0], sizes = [64, 8], strides = [1, 1]} : vector<64x16xf32> to vector<64x8xf32>
    %71 = tpu.concatenate %69, %70 in 1 : vector<64x8xf32>, vector<64x8xf32> -> vector<64x16xf32>
    %72 = arith.mulf %64, %4 : vector<64x16xf32>
    %73 = arith.mulf %71, %5 : vector<64x16xf32>
    %74 = arith.addf %72, %73 : vector<64x16xf32>
    %c0_40 = arith.constant 0 : index
    %c2 = arith.constant 2 : index
    %c0_41 = arith.constant 0 : index
    %c0_42 = arith.constant 0 : index
    %75 = vector.load %arg8[%c0_40, %c2, %c0_41, %c0_42] : memref<1x4x64x16xf32, #tpu.memory_space<vmem>>, vector<1x1x64x16xf32>
    %76 = vector.shape_cast %75 : vector<1x1x64x16xf32> to vector<64x16xf32>
    %77 = vector.shape_cast %74 : vector<64x16xf32> to vector<1x1x64x16xf32>
    tpu.vector_store %arg8[%c0_40, %c2, %c0_41, %c0_42], %77 {strides = array<i32>} : memref<1x4x64x16xf32, #tpu.memory_space<vmem>>, vector<1x1x64x16xf32>,
    %78 = vector.extract_strided_slice %65 {offsets = [0, 8], sizes = [64, 8], strides = [1, 1]} : vector<64x16xf32> to vector<64x8xf32>
    %cst_43 = arith.constant 0.000000e+00 : f32
    %79 = vector.broadcast %cst_43 : f32 to vector<64x8xf32>
    %80 = arith.subf %79, %78 : vector<64x8xf32>
    %81 = vector.extract_strided_slice %65 {offsets = [0, 0], sizes = [64, 8], strides = [1, 1]} : vector<64x16xf32> to vector<64x8xf32>
    %82 = tpu.concatenate %80, %81 in 1 : vector<64x8xf32>, vector<64x8xf32> -> vector<64x16xf32>
    %83 = arith.mulf %65, %6 : vector<64x16xf32>
    %84 = arith.mulf %82, %7 : vector<64x16xf32>
    %85 = arith.addf %83, %84 : vector<64x16xf32>
    %c0_44 = arith.constant 0 : index
    %c2_45 = arith.constant 2 : index
    %c0_46 = arith.constant 0 : index
    %c0_47 = arith.constant 0 : index
    %86 = vector.load %arg9[%c0_44, %c2_45, %c0_46, %c0_47] : memref<1x4x64x16xf32, #tpu.memory_space<vmem>>, vector<1x1x64x16xf32>
    %87 = vector.shape_cast %86 : vector<1x1x64x16xf32> to vector<64x16xf32>
    %88 = vector.shape_cast %85 : vector<64x16xf32> to vector<1x1x64x16xf32>
    tpu.vector_store %arg9[%c0_44, %c2_45, %c0_46, %c0_47], %88 {strides = array<i32>} : memref<1x4x64x16xf32, #tpu.memory_space<vmem>>, vector<1x1x64x16xf32>,
    %c0_48 = arith.constant 0 : index
    %c2_49 = arith.constant 2 : index
    %c0_50 = arith.constant 0 : index
    %c0_51 = arith.constant 0 : index
    %89 = vector.load %arg10[%c0_48, %c2_49, %c0_50, %c0_51] : memref<1x4x64x16xf32, #tpu.memory_space<vmem>>, vector<1x1x64x16xf32>
    %90 = vector.shape_cast %89 : vector<1x1x64x16xf32> to vector<64x16xf32>
    %91 = vector.shape_cast %66 : vector<64x16xf32> to vector<1x1x64x16xf32>
    tpu.vector_store %arg10[%c0_48, %c2_49, %c0_50, %c0_51], %91 {strides = array<i32>} : memref<1x4x64x16xf32, #tpu.memory_space<vmem>>, vector<1x1x64x16xf32>,
    %92 = vector.extract_strided_slice %3 {offsets = [0, 48], sizes = [64, 16], strides = [1, 1]} : vector<64x192xf32> to vector<64x16xf32>
    %93 = vector.extract_strided_slice %3 {offsets = [0, 112], sizes = [64, 16], strides = [1, 1]} : vector<64x192xf32> to vector<64x16xf32>
    %94 = vector.extract_strided_slice %3 {offsets = [0, 176], sizes = [64, 16], strides = [1, 1]} : vector<64x192xf32> to vector<64x16xf32>
    %95 = vector.extract_strided_slice %92 {offsets = [0, 8], sizes = [64, 8], strides = [1, 1]} : vector<64x16xf32> to vector<64x8xf32>
    %cst_52 = arith.constant 0.000000e+00 : f32
    %96 = vector.broadcast %cst_52 : f32 to vector<64x8xf32>
    %97 = arith.subf %96, %95 : vector<64x8xf32>
    %98 = vector.extract_strided_slice %92 {offsets = [0, 0], sizes = [64, 8], strides = [1, 1]} : vector<64x16xf32> to vector<64x8xf32>
    %99 = tpu.concatenate %97, %98 in 1 : vector<64x8xf32>, vector<64x8xf32> -> vector<64x16xf32>
    %100 = arith.mulf %92, %4 : vector<64x16xf32>
    %101 = arith.mulf %99, %5 : vector<64x16xf32>
    %102 = arith.addf %100, %101 : vector<64x16xf32>
    %c0_53 = arith.constant 0 : index
    %c3 = arith.constant 3 : index
    %c0_54 = arith.constant 0 : index
    %c0_55 = arith.constant 0 : index
    %103 = vector.load %arg8[%c0_53, %c3, %c0_54, %c0_55] : memref<1x4x64x16xf32, #tpu.memory_space<vmem>>, vector<1x1x64x16xf32>
    %104 = vector.shape_cast %103 : vector<1x1x64x16xf32> to vector<64x16xf32>
    %105 = vector.shape_cast %102 : vector<64x16xf32> to vector<1x1x64x16xf32>
    tpu.vector_store %arg8[%c0_53, %c3, %c0_54, %c0_55], %105 {strides = array<i32>} : memref<1x4x64x16xf32, #tpu.memory_space<vmem>>, vector<1x1x64x16xf32>,
    %106 = vector.extract_strided_slice %93 {offsets = [0, 8], sizes = [64, 8], strides = [1, 1]} : vector<64x16xf32> to vector<64x8xf32>
    %cst_56 = arith.constant 0.000000e+00 : f32
    %107 = vector.broadcast %cst_56 : f32 to vector<64x8xf32>
    %108 = arith.subf %107, %106 : vector<64x8xf32>
    %109 = vector.extract_strided_slice %93 {offsets = [0, 0], sizes = [64, 8], strides = [1, 1]} : vector<64x16xf32> to vector<64x8xf32>
    %110 = tpu.concatenate %108, %109 in 1 : vector<64x8xf32>, vector<64x8xf32> -> vector<64x16xf32>
    %111 = arith.mulf %93, %6 : vector<64x16xf32>
    %112 = arith.mulf %110, %7 : vector<64x16xf32>
    %113 = arith.addf %111, %112 : vector<64x16xf32>
    %c0_57 = arith.constant 0 : index
    %c3_58 = arith.constant 3 : index
    %c0_59 = arith.constant 0 : index
    %c0_60 = arith.constant 0 : index
    %114 = vector.load %arg9[%c0_57, %c3_58, %c0_59, %c0_60] : memref<1x4x64x16xf32, #tpu.memory_space<vmem>>, vector<1x1x64x16xf32>
    %115 = vector.shape_cast %114 : vector<1x1x64x16xf32> to vector<64x16xf32>
    %116 = vector.shape_cast %113 : vector<64x16xf32> to vector<1x1x64x16xf32>
    tpu.vector_store %arg9[%c0_57, %c3_58, %c0_59, %c0_60], %116 {strides = array<i32>} : memref<1x4x64x16xf32, #tpu.memory_space<vmem>>, vector<1x1x64x16xf32>,
    %c0_61 = arith.constant 0 : index
    %c3_62 = arith.constant 3 : index
    %c0_63 = arith.constant 0 : index
    %c0_64 = arith.constant 0 : index
    %117 = vector.load %arg10[%c0_61, %c3_62, %c0_63, %c0_64] : memref<1x4x64x16xf32, #tpu.memory_space<vmem>>, vector<1x1x64x16xf32>
    %118 = vector.shape_cast %117 : vector<1x1x64x16xf32> to vector<64x16xf32>
    %119 = vector.shape_cast %94 : vector<64x16xf32> to vector<1x1x64x16xf32>
    tpu.vector_store %arg10[%c0_61, %c3_62, %c0_63, %c0_64], %119 {strides = array<i32>} : memref<1x4x64x16xf32, #tpu.memory_space<vmem>>, vector<1x1x64x16xf32>,
    return
  }
  func.func @transform_0(%arg0: i32, %arg1: i32) -> (i32, i32, i32) {
    %c0_i32 = arith.constant 0 : i32
    %c0_i32_0 = arith.constant 0 : i32
    return %arg0, %arg1, %c0_i32 : i32, i32, i32
  }
  func.func @transform_1(%arg0: i32, %arg1: i32) -> (i32, i32) {
    %c0_i32 = arith.constant 0 : i32
    %c0_i32_0 = arith.constant 0 : i32
    %c0_i32_1 = arith.constant 0 : i32
    return %c0_i32, %c0_i32_0 : i32, i32
  }
  func.func @transform_2(%arg0: i32, %arg1: i32) -> (i32, i32) {
    %c0_i32 = arith.constant 0 : i32
    %c0_i32_0 = arith.constant 0 : i32
    return %arg1, %c0_i32 : i32, i32
  }
  func.func @transform_3(%arg0: i32, %arg1: i32) -> (i32, i32) {
    %c0_i32 = arith.constant 0 : i32
    %c0_i32_0 = arith.constant 0 : i32
    return %arg1, %c0_i32 : i32, i32
  }
  func.func @transform_4(%arg0: i32, %arg1: i32) -> (i32, i32) {
    %c0_i32 = arith.constant 0 : i32
    %c0_i32_0 = arith.constant 0 : i32
    return %arg1, %c0_i32 : i32, i32
  }
  func.func @transform_5(%arg0: i32, %arg1: i32) -> (i32, i32) {
    %c0_i32 = arith.constant 0 : i32
    %c0_i32_0 = arith.constant 0 : i32
    return %arg1, %c0_i32 : i32, i32
  }
  func.func @transform_6(%arg0: i32, %arg1: i32) -> (i32, i32, i32, i32) {
    %c0_i32 = arith.constant 0 : i32
    %c0_i32_0 = arith.constant 0 : i32
    %c0_i32_1 = arith.constant 0 : i32
    return %arg0, %c0_i32, %arg1, %c0_i32_0 : i32, i32, i32, i32
  }
  func.func @transform_7(%arg0: i32, %arg1: i32) -> (i32, i32, i32, i32) {
    %c0_i32 = arith.constant 0 : i32
    %c0_i32_0 = arith.constant 0 : i32
    %c0_i32_1 = arith.constant 0 : i32
    return %arg0, %c0_i32, %arg1, %c0_i32_0 : i32, i32, i32, i32
  }
  func.func @transform_8(%arg0: i32, %arg1: i32) -> (i32, i32, i32, i32) {
    %c0_i32 = arith.constant 0 : i32
    %c0_i32_0 = arith.constant 0 : i32
    %c0_i32_1 = arith.constant 0 : i32
    return %arg0, %c0_i32, %arg1, %c0_i32_0 : i32, i32, i32, i32
  }
}

module attributes {stable_mosaic.version = 11 : i64} {
  func.func @_local_attn_kernel(%arg0: i32, %arg1: i32, %arg2: i32, %arg3: memref<1x2x1x16x16xf32, #tpu.memory_space<vmem>>, %arg4: memref<1x2x1x16x16xf32, #tpu.memory_space<vmem>>, %arg5: memref<1x2x1x16x16xf32, #tpu.memory_space<vmem>>, %arg6: memref<1x2x1x16x16xf32, #tpu.memory_space<vmem>>, %arg7: memref<1x2x1x16x16xf32, #tpu.memory_space<vmem>>, %arg8: memref<1x2x1x16x16xf32, #tpu.memory_space<vmem>>, %arg9: memref<1x2x1x16x16xf32, #tpu.memory_space<vmem>>, %arg10: memref<1x32x32xf32, #tpu.memory_space<vmem>>, %arg11: memref<1x16x32xf32, #tpu.memory_space<vmem>>, %arg12: memref<16x32xf32, #tpu.memory_space<vmem>>) attributes {dimension_semantics = [#tpu.dimension_semantics<parallel>, #tpu.dimension_semantics<parallel>, #tpu.dimension_semantics<arbitrary>], iteration_bounds = array<i64: 2, 4, 2>, scalar_prefetch = 0 : i64, scratch_operands = 1 : i64, tpu.core_type = #tpu.core_type<tc>, window_params = [{transform_indices = @transform_0, window_bounds = array<i64: 1, 2, 1, 16, 16>}, {transform_indices = @transform_1, window_bounds = array<i64: 1, 2, 1, 16, 16>}, {transform_indices = @transform_2, window_bounds = array<i64: 1, 2, 1, 16, 16>}, {transform_indices = @transform_3, window_bounds = array<i64: 1, 2, 1, 16, 16>}, {transform_indices = @transform_4, window_bounds = array<i64: 1, 2, 1, 16, 16>}, {transform_indices = @transform_5, window_bounds = array<i64: 1, 2, 1, 16, 16>}, {transform_indices = @transform_6, window_bounds = array<i64: 1, 2, 1, 16, 16>}, {transform_indices = @transform_7, window_bounds = array<i64: 1, 32, 32>}, {transform_indices = @transform_8, window_bounds = array<i64: 1, 16, 32>}]} {
    %c0 = arith.constant 0 : index
    %c0_0 = arith.constant 0 : index
    %c0_1 = arith.constant 0 : index
    %c0_2 = arith.constant 0 : index
    %c0_3 = arith.constant 0 : index
    %0 = vector.load %arg3[%c0, %c0_0, %c0_1, %c0_2, %c0_3] : memref<1x2x1x16x16xf32, #tpu.memory_space<vmem>>, vector<1x2x1x16x16xf32>
    %1 = vector.shape_cast %0 : vector<1x2x1x16x16xf32> to vector<2x16x16xf32>
    %c0_4 = arith.constant 0 : index
    %c0_5 = arith.constant 0 : index
    %c0_6 = arith.constant 0 : index
    %c0_7 = arith.constant 0 : index
    %c0_8 = arith.constant 0 : index
    %2 = vector.load %arg4[%c0_4, %c0_5, %c0_6, %c0_7, %c0_8] : memref<1x2x1x16x16xf32, #tpu.memory_space<vmem>>, vector<1x2x1x16x16xf32>
    %3 = vector.shape_cast %2 : vector<1x2x1x16x16xf32> to vector<2x16x16xf32>
    %c0_9 = arith.constant 0 : index
    %c0_10 = arith.constant 0 : index
    %c0_11 = arith.constant 0 : index
    %c0_12 = arith.constant 0 : index
    %c0_13 = arith.constant 0 : index
    %4 = vector.load %arg5[%c0_9, %c0_10, %c0_11, %c0_12, %c0_13] : memref<1x2x1x16x16xf32, #tpu.memory_space<vmem>>, vector<1x2x1x16x16xf32>
    %5 = vector.shape_cast %4 : vector<1x2x1x16x16xf32> to vector<2x16x16xf32>
    %c0_14 = arith.constant 0 : index
    %c0_15 = arith.constant 0 : index
    %c0_16 = arith.constant 0 : index
    %c0_17 = arith.constant 0 : index
    %c0_18 = arith.constant 0 : index
    %6 = vector.load %arg6[%c0_14, %c0_15, %c0_16, %c0_17, %c0_18] : memref<1x2x1x16x16xf32, #tpu.memory_space<vmem>>, vector<1x2x1x16x16xf32>
    %7 = vector.shape_cast %6 : vector<1x2x1x16x16xf32> to vector<2x16x16xf32>
    %c0_19 = arith.constant 0 : index
    %c0_20 = arith.constant 0 : index
    %c0_21 = arith.constant 0 : index
    %c0_22 = arith.constant 0 : index
    %c0_23 = arith.constant 0 : index
    %8 = vector.load %arg7[%c0_19, %c0_20, %c0_21, %c0_22, %c0_23] : memref<1x2x1x16x16xf32, #tpu.memory_space<vmem>>, vector<1x2x1x16x16xf32>
    %9 = vector.shape_cast %8 : vector<1x2x1x16x16xf32> to vector<2x16x16xf32>
    %c0_24 = arith.constant 0 : index
    %c0_25 = arith.constant 0 : index
    %c0_26 = arith.constant 0 : index
    %c0_27 = arith.constant 0 : index
    %c0_28 = arith.constant 0 : index
    %10 = vector.load %arg8[%c0_24, %c0_25, %c0_26, %c0_27, %c0_28] : memref<1x2x1x16x16xf32, #tpu.memory_space<vmem>>, vector<1x2x1x16x16xf32>
    %11 = vector.shape_cast %10 : vector<1x2x1x16x16xf32> to vector<2x16x16xf32>
    %c0_29 = arith.constant 0 : index
    %c0_30 = arith.constant 0 : index
    %c0_31 = arith.constant 0 : index
    %c0_32 = arith.constant 0 : index
    %c0_33 = arith.constant 0 : index
    %12 = vector.load %arg9[%c0_29, %c0_30, %c0_31, %c0_32, %c0_33] : memref<1x2x1x16x16xf32, #tpu.memory_space<vmem>>, vector<1x2x1x16x16xf32>
    %13 = vector.shape_cast %12 : vector<1x2x1x16x16xf32> to vector<2x16x16xf32>
    %14 = tpu.iota {dimensions = array<i32: 0>} : vector<16x16xi32>
    %15 = tpu.iota {dimensions = array<i32: 1>} : vector<16x16xi32>
    %16 = arith.cmpi slt, %15, %14 : vector<16x16xi32>
    %c0_i32 = arith.constant 0 : i32
    %17 = arith.cmpi eq, %arg1, %c0_i32 : i32
    %18 = vector.broadcast %17 : i1 to vector<16x16xi1>
    %19 = arith.ori %16, %18 : vector<16x16xi1>
    %cst = arith.constant -1.000000e+30 : f32
    %cst_34 = arith.constant 0.000000e+00 : f32
    %20 = vector.broadcast %cst : f32 to vector<16x16xf32>
    %21 = vector.broadcast %cst_34 : f32 to vector<16x16xf32>
    %22 = arith.select %19, %20, %21 : vector<16x16xi1>, vector<16x16xf32>
    %23 = vector.shape_cast %22 : vector<16x16xf32> to vector<1x16x16xf32>
    %24 = arith.cmpi sgt, %15, %14 : vector<16x16xi32>
    %c3_i32 = arith.constant 3 : i32
    %25 = arith.cmpi eq, %arg1, %c3_i32 : i32
    %26 = vector.broadcast %25 : i1 to vector<16x16xi1>
    %27 = arith.ori %24, %26 : vector<16x16xi1>
    %cst_35 = arith.constant -1.000000e+30 : f32
    %cst_36 = arith.constant 0.000000e+00 : f32
    %28 = vector.broadcast %cst_35 : f32 to vector<16x16xf32>
    %29 = vector.broadcast %cst_36 : f32 to vector<16x16xf32>
    %30 = arith.select %27, %28, %29 : vector<16x16xi1>, vector<16x16xf32>
    %31 = vector.shape_cast %30 : vector<16x16xf32> to vector<1x16x16xf32>
    "tpu.trace_start"() <{level = 10 : i32, message = "hqd,hkd->hqk"}> : () -> ()
    %cst_37 = arith.constant dense<0.000000e+00> : vector<2x16x16xf32>
    %32 = tpu.matmul %1, %3, %cst_37 {dimension_numbers = #tpu.dot_dimension_numbers<[2], [2], [1], [1], [0, 0, 0, 1, 1, 1], [0], [0]>} : vector<2x16x16xf32>, vector<2x16x16xf32>, vector<2x16x16xf32> -> vector<2x16x16xf32>
    "tpu.trace_stop"() : () -> ()
    %33 = vector.broadcast %23 : vector<1x16x16xf32> to vector<2x16x16xf32>
    %34 = arith.addf %32, %33 : vector<2x16x16xf32>
    "tpu.trace_start"() <{level = 10 : i32, message = "hqd,hkd->hqk"}> : () -> ()
    %cst_38 = arith.constant dense<0.000000e+00> : vector<2x16x16xf32>
    %35 = tpu.matmul %1, %5, %cst_38 {dimension_numbers = #tpu.dot_dimension_numbers<[2], [2], [1], [1], [0, 0, 0, 1, 1, 1], [0], [0]>} : vector<2x16x16xf32>, vector<2x16x16xf32>, vector<2x16x16xf32> -> vector<2x16x16xf32>
    %cst_39 = arith.constant dense<0.000000e+00> : vector<2x16x16xf32>
    %36 = tpu.matmul %1, %7, %cst_39 {dimension_numbers = #tpu.dot_dimension_numbers<[2], [2], [1], [1], [0, 0, 0, 1, 1, 1], [0], [0]>} : vector<2x16x16xf32>, vector<2x16x16xf32>, vector<2x16x16xf32> -> vector<2x16x16xf32>
    "tpu.trace_stop"() : () -> ()
    %37 = vector.broadcast %31 : vector<1x16x16xf32> to vector<2x16x16xf32>
    %38 = arith.addf %36, %37 : vector<2x16x16xf32>
    %cst_40 = arith.constant dense<0xFF800000> : vector<2x16xf32>
    %39 = vector.multi_reduction <maximumf>, %34, %cst_40 [2] : vector<2x16x16xf32> to vector<2x16xf32>
    %40 = vector.shape_cast %39 : vector<2x16xf32> to vector<2x16x1xf32>
    %cst_41 = arith.constant dense<0xFF800000> : vector<2x16xf32>
    %41 = vector.multi_reduction <maximumf>, %35, %cst_41 [2] : vector<2x16x16xf32> to vector<2x16xf32>
    %42 = vector.shape_cast %41 : vector<2x16xf32> to vector<2x16x1xf32>
    %43 = arith.maximumf %40, %42 : vector<2x16x1xf32>
    %cst_42 = arith.constant dense<0xFF800000> : vector<2x16xf32>
    %44 = vector.multi_reduction <maximumf>, %38, %cst_42 [2] : vector<2x16x16xf32> to vector<2x16xf32>
    %45 = vector.shape_cast %44 : vector<2x16xf32> to vector<2x16x1xf32>
    %46 = arith.maximumf %43, %45 : vector<2x16x1xf32>
    %47 = vector.broadcast %46 : vector<2x16x1xf32> to vector<2x16x16xf32>
    %48 = arith.subf %34, %47 : vector<2x16x16xf32>
    %49 = math.exp %48 : vector<2x16x16xf32>
    %50 = vector.broadcast %46 : vector<2x16x1xf32> to vector<2x16x16xf32>
    %51 = arith.subf %35, %50 : vector<2x16x16xf32>
    %52 = math.exp %51 : vector<2x16x16xf32>
    %53 = vector.broadcast %46 : vector<2x16x1xf32> to vector<2x16x16xf32>
    %54 = arith.subf %38, %53 : vector<2x16x16xf32>
    %55 = math.exp %54 : vector<2x16x16xf32>
    %cst_43 = arith.constant dense<0.000000e+00> : vector<2x16xf32>
    %56 = vector.multi_reduction <add>, %49, %cst_43 [2] : vector<2x16x16xf32> to vector<2x16xf32>
    %57 = vector.shape_cast %56 : vector<2x16xf32> to vector<2x16x1xf32>
    %cst_44 = arith.constant dense<0.000000e+00> : vector<2x16xf32>
    %58 = vector.multi_reduction <add>, %52, %cst_44 [2] : vector<2x16x16xf32> to vector<2x16xf32>
    %59 = vector.shape_cast %58 : vector<2x16xf32> to vector<2x16x1xf32>
    %60 = arith.addf %57, %59 : vector<2x16x1xf32>
    %cst_45 = arith.constant dense<0.000000e+00> : vector<2x16xf32>
    %61 = vector.multi_reduction <add>, %55, %cst_45 [2] : vector<2x16x16xf32> to vector<2x16xf32>
    %62 = vector.shape_cast %61 : vector<2x16xf32> to vector<2x16x1xf32>
    %63 = arith.addf %60, %62 : vector<2x16x1xf32>
    %64 = tpu.reciprocal %63 {approx = true} : vector<2x16x1xf32> -> vector<2x16x1xf32>
    "tpu.trace_start"() <{level = 10 : i32, message = "hqk,hkd->hqd"}> : () -> ()
    %cst_46 = arith.constant dense<0.000000e+00> : vector<2x16x16xf32>
    %65 = tpu.matmul %49, %9, %cst_46 {dimension_numbers = #tpu.dot_dimension_numbers<[2], [1], [1], [2], [0, 0, 0, 1, 1, 2], [0], [0]>} : vector<2x16x16xf32>, vector<2x16x16xf32>, vector<2x16x16xf32> -> vector<2x16x16xf32>
    %cst_47 = arith.constant dense<0.000000e+00> : vector<2x16x16xf32>
    %66 = tpu.matmul %52, %11, %cst_47 {dimension_numbers = #tpu.dot_dimension_numbers<[2], [1], [1], [2], [0, 0, 0, 1, 1, 2], [0], [0]>} : vector<2x16x16xf32>, vector<2x16x16xf32>, vector<2x16x16xf32> -> vector<2x16x16xf32>
    "tpu.trace_stop"() : () -> ()
    %67 = arith.addf %65, %66 : vector<2x16x16xf32>
    "tpu.trace_start"() <{level = 10 : i32, message = "hqk,hkd->hqd"}> : () -> ()
    %cst_48 = arith.constant dense<0.000000e+00> : vector<2x16x16xf32>
    %68 = tpu.matmul %55, %13, %cst_48 {dimension_numbers = #tpu.dot_dimension_numbers<[2], [1], [1], [2], [0, 0, 0, 1, 1, 2], [0], [0]>} : vector<2x16x16xf32>, vector<2x16x16xf32>, vector<2x16x16xf32> -> vector<2x16x16xf32>
    "tpu.trace_stop"() : () -> ()
    %69 = arith.addf %67, %68 : vector<2x16x16xf32>
    %70 = vector.broadcast %64 : vector<2x16x1xf32> to vector<2x16x16xf32>
    %71 = arith.mulf %69, %70 : vector<2x16x16xf32>
    %c0_49 = arith.constant 0 : index
    %c0_50 = arith.constant 0 : index
    %c0_51 = arith.constant 0 : index
    %72 = vector.load %arg10[%c0_49, %c0_50, %c0_51] : memref<1x32x32xf32, #tpu.memory_space<vmem>>, vector<1x32x32xf32>
    %73 = vector.shape_cast %72 : vector<1x32x32xf32> to vector<32x32xf32>
    %74 = vector.extract_strided_slice %71 {offsets = [0, 0, 0], sizes = [1, 16, 16], strides = [1, 1, 1]} : vector<2x16x16xf32> to vector<1x16x16xf32>
    %75 = vector.shape_cast %74 : vector<1x16x16xf32> to vector<16x16xf32>
    %76 = vector.extract_strided_slice %73 {offsets = [0, 0], sizes = [32, 16], strides = [1, 1]} : vector<32x32xf32> to vector<32x16xf32>
    %cst_52 = arith.constant dense<0.000000e+00> : vector<16x32xf32>
    %77 = tpu.matmul %75, %76, %cst_52 {dimension_numbers = #tpu.dot_dimension_numbers<[1], [1], [0], [0], [0, 0, 1, 0], [], []>} : vector<16x16xf32>, vector<32x16xf32>, vector<16x32xf32> -> vector<16x32xf32>
    %78 = vector.extract_strided_slice %71 {offsets = [1, 0, 0], sizes = [1, 16, 16], strides = [1, 1, 1]} : vector<2x16x16xf32> to vector<1x16x16xf32>
    %79 = vector.shape_cast %78 : vector<1x16x16xf32> to vector<16x16xf32>
    %80 = vector.extract_strided_slice %73 {offsets = [0, 16], sizes = [32, 16], strides = [1, 1]} : vector<32x32xf32> to vector<32x16xf32>
    %cst_53 = arith.constant dense<0.000000e+00> : vector<16x32xf32>
    %81 = tpu.matmul %79, %80, %cst_53 {dimension_numbers = #tpu.dot_dimension_numbers<[1], [1], [0], [0], [0, 0, 1, 0], [], []>} : vector<16x16xf32>, vector<32x16xf32>, vector<16x32xf32> -> vector<16x32xf32>
    %82 = arith.addf %77, %81 : vector<16x32xf32>
    %c0_i32_54 = arith.constant 0 : i32
    %83 = arith.cmpi eq, %arg2, %c0_i32_54 : i32
    %84 = arith.extui %83 : i1 to i32
    %c0_i32_55 = arith.constant 0 : i32
    %85 = arith.cmpi ne, %84, %c0_i32_55 : i32
    scf.if %85 {
      %cst_61 = arith.constant 0.000000e+00 : f32
      %92 = vector.broadcast %cst_61 : f32 to vector<16x32xf32>
      %c0_62 = arith.constant 0 : index
      %c0_63 = arith.constant 0 : index
      %93 = vector.load %arg12[%c0_62, %c0_63] : memref<16x32xf32, #tpu.memory_space<vmem>>, vector<16x32xf32>
      tpu.vector_store %arg12[%c0_62, %c0_63], %92 {strides = array<i32>} : memref<16x32xf32, #tpu.memory_space<vmem>>, vector<16x32xf32>,
    } else {
    }
    %c0_56 = arith.constant 0 : index
    %c0_57 = arith.constant 0 : index
    %86 = vector.load %arg12[%c0_56, %c0_57] : memref<16x32xf32, #tpu.memory_space<vmem>>, vector<16x32xf32>
    %87 = arith.addf %86, %82 : vector<16x32xf32>
    %c0_58 = arith.constant 0 : index
    %c0_59 = arith.constant 0 : index
    %88 = vector.load %arg12[%c0_58, %c0_59] : memref<16x32xf32, #tpu.memory_space<vmem>>, vector<16x32xf32>
    tpu.vector_store %arg12[%c0_58, %c0_59], %87 {strides = array<i32>} : memref<16x32xf32, #tpu.memory_space<vmem>>, vector<16x32xf32>,
    %c1_i32 = arith.constant 1 : i32
    %89 = arith.cmpi eq, %arg2, %c1_i32 : i32
    %90 = arith.extui %89 : i1 to i32
    %c0_i32_60 = arith.constant 0 : i32
    %91 = arith.cmpi ne, %90, %c0_i32_60 : i32
    scf.if %91 {
      %c0_61 = arith.constant 0 : index
      %c0_62 = arith.constant 0 : index
      %92 = vector.load %arg12[%c0_61, %c0_62] : memref<16x32xf32, #tpu.memory_space<vmem>>, vector<16x32xf32>
      %c0_63 = arith.constant 0 : index
      %c0_64 = arith.constant 0 : index
      %c0_65 = arith.constant 0 : index
      %93 = vector.load %arg11[%c0_63, %c0_64, %c0_65] : memref<1x16x32xf32, #tpu.memory_space<vmem>>, vector<1x16x32xf32>
      %94 = vector.shape_cast %93 : vector<1x16x32xf32> to vector<16x32xf32>
      %95 = vector.shape_cast %92 : vector<16x32xf32> to vector<1x16x32xf32>
      tpu.vector_store %arg11[%c0_63, %c0_64, %c0_65], %95 {strides = array<i32>} : memref<1x16x32xf32, #tpu.memory_space<vmem>>, vector<1x16x32xf32>,
    } else {
    }
    return
  }
  func.func @transform_0(%arg0: i32, %arg1: i32, %arg2: i32) -> (i32, i32, i32, i32, i32) {
    %c0_i32 = arith.constant 0 : i32
    %c0_i32_0 = arith.constant 0 : i32
    %c0_i32_1 = arith.constant 0 : i32
    return %arg0, %arg2, %arg1, %c0_i32, %c0_i32_0 : i32, i32, i32, i32, i32
  }
  func.func @transform_1(%arg0: i32, %arg1: i32, %arg2: i32) -> (i32, i32, i32, i32, i32) {
    %c1_i32 = arith.constant 1 : i32
    %0 = arith.subi %arg1, %c1_i32 : i32
    %c0_i32 = arith.constant 0 : i32
    %1 = arith.maxsi %0, %c0_i32 : i32
    %c0_i32_0 = arith.constant 0 : i32
    %c0_i32_1 = arith.constant 0 : i32
    %c0_i32_2 = arith.constant 0 : i32
    return %arg0, %arg2, %1, %c0_i32_0, %c0_i32_1 : i32, i32, i32, i32, i32
  }
  func.func @transform_2(%arg0: i32, %arg1: i32, %arg2: i32) -> (i32, i32, i32, i32, i32) {
    %c0_i32 = arith.constant 0 : i32
    %c0_i32_0 = arith.constant 0 : i32
    %c0_i32_1 = arith.constant 0 : i32
    return %arg0, %arg2, %arg1, %c0_i32, %c0_i32_0 : i32, i32, i32, i32, i32
  }
  func.func @transform_3(%arg0: i32, %arg1: i32, %arg2: i32) -> (i32, i32, i32, i32, i32) {
    %c1_i32 = arith.constant 1 : i32
    %0 = arith.addi %arg1, %c1_i32 : i32
    %c3_i32 = arith.constant 3 : i32
    %1 = arith.minsi %0, %c3_i32 : i32
    %c0_i32 = arith.constant 0 : i32
    %c0_i32_0 = arith.constant 0 : i32
    %c0_i32_1 = arith.constant 0 : i32
    return %arg0, %arg2, %1, %c0_i32, %c0_i32_0 : i32, i32, i32, i32, i32
  }
  func.func @transform_4(%arg0: i32, %arg1: i32, %arg2: i32) -> (i32, i32, i32, i32, i32) {
    %c1_i32 = arith.constant 1 : i32
    %0 = arith.subi %arg1, %c1_i32 : i32
    %c0_i32 = arith.constant 0 : i32
    %1 = arith.maxsi %0, %c0_i32 : i32
    %c0_i32_0 = arith.constant 0 : i32
    %c0_i32_1 = arith.constant 0 : i32
    %c0_i32_2 = arith.constant 0 : i32
    return %arg0, %arg2, %1, %c0_i32_0, %c0_i32_1 : i32, i32, i32, i32, i32
  }
  func.func @transform_5(%arg0: i32, %arg1: i32, %arg2: i32) -> (i32, i32, i32, i32, i32) {
    %c0_i32 = arith.constant 0 : i32
    %c0_i32_0 = arith.constant 0 : i32
    %c0_i32_1 = arith.constant 0 : i32
    return %arg0, %arg2, %arg1, %c0_i32, %c0_i32_0 : i32, i32, i32, i32, i32
  }
  func.func @transform_6(%arg0: i32, %arg1: i32, %arg2: i32) -> (i32, i32, i32, i32, i32) {
    %c1_i32 = arith.constant 1 : i32
    %0 = arith.addi %arg1, %c1_i32 : i32
    %c3_i32 = arith.constant 3 : i32
    %1 = arith.minsi %0, %c3_i32 : i32
    %c0_i32 = arith.constant 0 : i32
    %c0_i32_0 = arith.constant 0 : i32
    %c0_i32_1 = arith.constant 0 : i32
    return %arg0, %arg2, %1, %c0_i32, %c0_i32_0 : i32, i32, i32, i32, i32
  }
  func.func @transform_7(%arg0: i32, %arg1: i32, %arg2: i32) -> (i32, i32, i32) {
    %c0_i32 = arith.constant 0 : i32
    %c0_i32_0 = arith.constant 0 : i32
    %c0_i32_1 = arith.constant 0 : i32
    return %arg2, %c0_i32, %c0_i32_0 : i32, i32, i32
  }
  func.func @transform_8(%arg0: i32, %arg1: i32, %arg2: i32) -> (i32, i32, i32) {
    %c0_i32 = arith.constant 0 : i32
    %c0_i32_0 = arith.constant 0 : i32
    return %arg0, %arg1, %c0_i32 : i32, i32, i32
  }
}

</mosaic_0001>

<bundles_post_ra>
// kernel: local_mha_forward.3
= control target key start
LH: loop header
LB: loop body
LE: loop exit
PB: predicated region body
PF: predicated region fallthrough
CT: control target
= control target key end

     0   :  { %s3699_s0 = inlined_call_operand.vmem [shape: f32[2,4,4,16,16], index: 0, kind: input, shape index: {}]   ;;  %s3700_s1 = inlined_call_operand.vmem [shape: f32[2,4,4,16,16], index: 1, kind: input, shape index: {}, may-alias: {1,2,3}]   ;;  %s3701_s2 = inlined_call_operand.vmem [shape: f32[2,4,4,16,16], index: 2, kind: input, shape index: {}, may-alias: {1,2,3}]   ;;  %s3702_s3 = inlined_call_operand.vmem [shape: f32[2,4,4,16,16], index: 3, kind: input, shape index: {}, may-alias: {1,2,3}]   ;;  %s3703_s4 = inlined_call_operand.vmem [shape: f32[2,4,4,16,16], index: 4, kind: input, shape index: {}, may-alias: {4,5,6}]   ;;  %s3704_s5 = inlined_call_operand.vmem [shape: f32[2,4,4,16,16], index: 5, kind: input, shape index: {}, may-alias: {4,5,6}]   ;;  %s3705_s6 = inlined_call_operand.vmem [shape: f32[2,4,4,16,16], index: 6, kind: input, shape index: {}, may-alias: {4,5,6}]   ;;  %s3706_s7 = inlined_call_operand.vmem [shape: f32[2,32,32], index: 7, kind: input, shape index: {}]   ;;  %s3707_s8 = inlined_call_operand.vmem [shape: f32[2,64,32], index: 8, kind: output, shape index: {}]  }
   0x1   :  { %3715 = sst [smem:[#allocation20_spill]] %s3704_s5 }
   0x2   :  { %3716 = sst [smem:[#allocation21_spill]] %s3705_s6 }
   0x3   :  { %3717 = sst [smem:[#allocation22_spill]] %s3706_s7 }
   0x4   :  { %3718 = sst [smem:[#allocation23_spill]] %s3707_s8 }
   0x5   :  { %s3250_s27 = smov 0   ;;  %s3252_s28 = smov 0  }
   0x6   :  { %s3254_s29 = smov 0   ;;  %s3256_s30 = smov 0  }
   0x7   :  { %s3258_s9 = smov 0   ;;  %s3260_s10 = smov 0  }
   0x8   :  { %s3262_s11 = smov 0   ;;  %s3264_s12 = smov 0  }
   0x9   :  { %s3266_s13 = smov 0   ;;  %s3268_s14 = smov 0  }
   0xa   :  { %s3270_s15 = smov 0   ;;  %s3272_s16 = smov 0  }
   0xb   :  { %s3274_s17 = smov 0  }
   0xc LB: > { %3719 = sst [smem:[#allocation10_spill]] %s3168_s9  ;;  %s30_s18 = sadd.s32 1, %s3188_s14  ;;  %s3200_s17 = sphi %s3274_s17, %s18_s17   ;;  %s3196_s16 = sphi %s3272_s16, %s3763_s16   ;;  %s3192_s15 = sphi %s3270_s15, %s3762_s15   ;;  %s3188_s14 = sphi %s3268_s14, %s3761_s14   ;;  %s3184_s13 = sphi %s3266_s13, %s3760_s13   ;;  %s3180_s12 = sphi %s3264_s12, %s3759_s12   ;;  %s3176_s11 = sphi %s3262_s11, %s3758_s11   ;;  %s3172_s10 = sphi %s3260_s10, %s3757_s10   ;;  %s3168_s9 = sphi %s3258_s9, %s3756_s9   ;;  %s3164_s30 = sphi %s3256_s30, %s3755_s30   ;;  %s3160_s29 = sphi %s3254_s29, %s3754_s29   ;;  %s3156_s28 = sphi %s3252_s28, %s3753_s28   ;;  %s3152_s27 = sphi %s3250_s27, %s3752_s27  }
   0xd   : > { %3720 = sst [smem:[#allocation11_spill]] %s3176_s11  ;;  %s3317_s19 = sadd.s32 1, %s3192_s15 }
   0xe   : > { %3721 = sst [smem:[#allocation12_spill]] %s3180_s12  ;;  %p31_p0 = scmp.ge.s32.totalorder %s30_s18, 2 }
   0xf   : > { %3722 = sst [smem:[#allocation13_spill]] %s3184_s13  ;;  %s37_s20 = sadd.s32 1, %s3196_s16 }
  0x10   : > { %p55_p1 = scmp.ne.s32.totalorder %s3172_s10, %s3168_s9  ;;  %s3765_s18 = smov (%p31_p0, %s30_s18), 0 }
  0x11   : > { %3723 = sst [smem:[#allocation14_spill]] %s3765_s18  ;;  %s42_s23 = ssub.s32 %s3188_s14, %s3765_s18 }
  0x12   : > { %s34_s22 = scalar_select %p31_p0, %s3317_s19, %s3192_s15 }
  0x13   : > { %p56_p2 = scmp.eq.s32.totalorder %s3200_s17, 0  ;;  %s2566_s24 = sadd.s32 4294967295, %s3192_s15 }
  0x14   : > { %p35_p3 = scmp.ge.s32.totalorder %s34_s22, 4  ;;  %p72_p5 = scmp.gt.s32.totalorder %s2566_s24, 0 }
  0x15   : > { %p3333_p4 = por %p56_p2, %p55_p1  ;;  %s84_s7 = sadd.s32 1, %s3164_s30 }
  0x16   : > { %s3767_s22 = smov (%p35_p3, %s34_s22), 0  ;;  %s3769_s20 = smov (!%p35_p3, %s37_s20), %s3196_s16 }
  0x17   : > { %3725 = sst [smem:[#allocation15_spill]] %s3767_s22  ;;  %s44_s26 = ssub.s32 %s3192_s15, %s3767_s22 }
  0x18   : > { %s2567_s21 = sadd.s32 4294967295, %s3767_s22  ;;  %p39_p6 = scmp.ge.s32.totalorder %s3769_s20, 2 }
  0x19   : > { %p75_p7 = scmp.gt.s32.totalorder %s2567_s21, 0  ;;  %s3771_s24 = smov (!%p72_p5, %s2566_s24), 0 }
  0x1a   : > { %s3773_s20 = smov (%p39_p6, %s3769_s20), 0  ;;  %p91_p10 = scmp.ne.s32.totalorder %s3164_s30, %s3160_s29 }
  0x1b   : > { %3726 = sst [smem:[#allocation16_spill]] %s3773_s20  ;;  %s3775_s21 = smov (!%p75_p7, %s2567_s21), 0 }
  0x1c   : > { %s41_s18 = ssub.s32 %s3196_s16, %s3773_s20  ;;  %s80_s8 = ssub.s32 %s3771_s24, %s3775_s21 }
  0x1d   : > { %s43_s11 = sor.u32 %s42_s23, %s41_s18  ;;  %p138_p11 = scmp.lt.s32.totalorder %s3317_s19, 3 }
  0x1e   : > { %s45_s9 = sor.u32 %s44_s26, %s43_s11  ;;  %s81_s13 = sor.u32 %s80_s8, %s43_s11 }
  0x1f   : > { %p46_p8 = scmp.eq.s32.totalorder %s45_s9, 0  ;;  %p82_p9 = scmp.eq.s32.totalorder %s81_s13, 0 }
  0x20   : > { %s3727_s12 = sadd.s32 1, %s3172_s10  ;;  %p3364_p12 = por %p91_p10, %p56_p2 }
  0x21   : > { %s3357_s6 = scalar_select %p46_p8, %s3172_s10, %s3727_s12  }
  0x22   : > { %s3360_s5 = scalar_select %p82_p9, %s3164_s30, %s84_s7  }
  0x23   : > { %3728 = sst [smem:[#allocation17_spill]] %s3357_s6  ;;  %s140_s18 = sadd.s32 1, %s3767_s22 }
  0x24   : > { %3729 = sst [smem:[#allocation18_spill]] %s3360_s5  ;;  %s3777_s19 = smov (!%p138_p11, %s3317_s19), 3 }
  0x25   : > { %p141_p13 = scmp.lt.s32.totalorder %s140_s18, 3  ;;  %p157_p0 = scmp.ne.s32.totalorder %s3156_s28, %s3152_s27 }
  0x26   : > { %s150_s12 = sadd.s32 1, %s3156_s28  ;;  %p2571_p5 = scmp.ge.s32.totalorder %s3200_s17, 16 }
  0x27   : > { %s3779_s18 = smov (!%p141_p13, %s140_s18), 3  ;;  %p3376_p1 = por %p157_p0, %p56_p2 }
  0x28   : > { %s146_s9 = ssub.s32 %s3777_s19, %s3779_s18  ;;  %339 = sbr.rel (%p2571_p5) target bundleno = 123 (0x7b), region = 16 }
  0x29   : > { %s147_s7 = sor.u32 %s146_s9, %s43_s11 }
  0x2a   : > { %p148_p3 = scmp.eq.s32.totalorder %s147_s7, 0 }
  0x2c   : > { %s3383_s13 = scalar_select %p148_p3, %s3156_s28, %s150_s12  }
  0x2e   : > { %3732 = sst [smem:[#allocation19_spill]] %s3383_s13 }
  0x2f   : > { %342 = sbr.rel (!%p3333_p4) target bundleno = 57 (0x39), region = 20  ;;  %s344_s21 = sand.u32 (%p3333_p4), 1, %s3172_s10  }
  0x30   : > { %s2574_s23 = sshll.u32 (%p3333_p4), %s3192_s15, 1  ;;  %s2681_s26 = sshll.u32 (%p3333_p4), %s3188_s14, 4 }
  0x31   : > { %s2572_s22 = sshll.u32 (%p3333_p4), %s344_s21, 5  ;;  %s350_s18 = sadd.s32 (%p3333_p4), %s2681_s26, %s2574_s23 }
  0x32   : > { %s2576_s11 = sshll.u32 (%p3333_p4), %s3196_s16, 5  ;;  %s346_s13 = scalar_lea.vmem (%p3333_p4), [#allocation3], %s2572_s22 }
  0x33   : > { %s352_s9 = sadd.s32 (%p3333_p4), %s2576_s11, %s350_s18 }
  0x34   : > { %s2577_s7 = sshll.u32 (%p3333_p4), %s352_s9, 3 }
  0x35   : > { %s354_s5 = scalar_lea.vmem (%p3333_p4), %s3699_s0, %s2577_s7 }
  0x36   : > { %v388_v0 = vld [vmem:[%s354_s5] sm:$0xff]  ;;  %v390_v1 = vld [vmem:[%s354_s5 + $0x8] sm:$0xff] }
  0x37   : > { %v392_v2 = vld [vmem:[%s354_s5 + $0x40] sm:$0xff]  ;;  %389 = vst [vmem:[%s346_s13] sm:$0xff] %v388_v0  ;;  %391 = vst [vmem:[%s346_s13 + $0x8] sm:$0xff] %v390_v1  ;;  %v394_v3 = vld [vmem:[%s354_s5 + $0x48] sm:$0xff] }
  0x38   : > { %393 = vst [vmem:[%s346_s13 + $0x10] sm:$0xff] %v392_v2  ;;  %395 = vst [vmem:[%s346_s13 + $0x18] sm:$0xff] %v394_v3 }
  0x39 PF: > { %401 = sbr.rel (!%p3364_p12) target bundleno = 67 (0x43), region = 58  ;;  %s403_s21 = sand.u32 (%p3364_p12), 1, %s3164_s30  }
  0x3a   : > { %s2581_s6 = sshll.u32 (%p3364_p12), %s3771_s24, 1  ;;  %s2682_s23 = sshll.u32 (%p3364_p12), %s3188_s14, 4 }
  0x3b   : > { %s2578_s26 = sshll.u32 (%p3364_p12), %s403_s21, 5  ;;  %s412_s18 = sadd.s32 (%p3364_p12), %s2682_s23, %s2581_s6 }
  0x3c   : > { %s2583_s11 = sshll.u32 (%p3364_p12), %s3196_s16, 5  ;;  %s405_s13 = scalar_lea.vmem (%p3364_p12), [#allocation4], %s2578_s26 }
  0x3d   : > { %s414_s22 = sadd.s32 (%p3364_p12), %s2583_s11, %s412_s18 }
  0x3e   : > { %s2584_s9 = sshll.u32 (%p3364_p12), %s414_s22, 3 }
  0x3f   : > { %s416_s5 = scalar_lea.vmem (%p3364_p12), %s3700_s1, %s2584_s9 }
  0x40   : > { %v450_v4 = vld [vmem:[%s416_s5] sm:$0xff]  ;;  %v452_v5 = vld [vmem:[%s416_s5 + $0x8] sm:$0xff] }
  0x41   : > { %v454_v6 = vld [vmem:[%s416_s5 + $0x40] sm:$0xff]  ;;  %451 = vst [vmem:[%s405_s13] sm:$0xff] %v450_v4  ;;  %453 = vst [vmem:[%s405_s13 + $0x8] sm:$0xff] %v452_v5  ;;  %v456_v7 = vld [vmem:[%s416_s5 + $0x48] sm:$0xff] }
  0x42   : > { %455 = vst [vmem:[%s405_s13 + $0x10] sm:$0xff] %v454_v6  ;;  %457 = vst [vmem:[%s405_s13 + $0x18] sm:$0xff] %v456_v7 }
  0x43 PF: > { %463 = sbr.rel (!%p3333_p4) target bundleno = 77 (0x4d), region = 96  ;;  %s465_s21 = sand.u32 (%p3333_p4), 1, %s3172_s10  }
  0x44   : > { %s2587_s6 = sshll.u32 (%p3333_p4), %s3192_s15, 1  ;;  %s2683_s23 = sshll.u32 (%p3333_p4), %s3188_s14, 4 }
  0x45   : > { %s2585_s18 = sshll.u32 (%p3333_p4), %s465_s21, 5  ;;  %s471_s11 = sadd.s32 (%p3333_p4), %s2683_s23, %s2587_s6 }
  0x46   : > { %s2589_s22 = sshll.u32 (%p3333_p4), %s3196_s16, 5  ;;  %s467_s13 = scalar_lea.vmem (%p3333_p4), [#allocation5], %s2585_s18 }
  0x47   : > { %s473_s26 = sadd.s32 (%p3333_p4), %s2589_s22, %s471_s11 }
  0x48   : > { %s2590_s9 = sshll.u32 (%p3333_p4), %s473_s26, 3 }
  0x49   : > { %s475_s5 = scalar_lea.vmem (%p3333_p4), %s3701_s2, %s2590_s9 }
  0x4a   : > { %v509_v8 = vld [vmem:[%s475_s5] sm:$0xff]  ;;  %v511_v9 = vld [vmem:[%s475_s5 + $0x8] sm:$0xff] }
  0x4b   : > { %v513_v10 = vld [vmem:[%s475_s5 + $0x40] sm:$0xff]  ;;  %510 = vst [vmem:[%s467_s13] sm:$0xff] %v509_v8  ;;  %512 = vst [vmem:[%s467_s13 + $0x8] sm:$0xff] %v511_v9  ;;  %v515_v11 = vld [vmem:[%s475_s5 + $0x48] sm:$0xff] }
  0x4c   : > { %514 = vst [vmem:[%s467_s13 + $0x10] sm:$0xff] %v513_v10  ;;  %516 = vst [vmem:[%s467_s13 + $0x18] sm:$0xff] %v515_v11 }
  0x4d PF: > { %522 = sbr.rel (!%p3376_p1) target bundleno = 87 (0x57), region = 134  ;;  %s524_s21 = sand.u32 (%p3376_p1), 1, %s3156_s28  }
  0x4e   : > { %s2593_s6 = sshll.u32 (%p3376_p1), %s3777_s19, 1  ;;  %s2684_s23 = sshll.u32 (%p3376_p1), %s3188_s14, 4 }
  0x4f   : > { %s2591_s11 = sshll.u32 (%p3376_p1), %s524_s21, 5  ;;  %s533_s22 = sadd.s32 (%p3376_p1), %s2684_s23, %s2593_s6 }
  0x50   : > { %s2595_s26 = sshll.u32 (%p3376_p1), %s3196_s16, 5  ;;  %s526_s13 = scalar_lea.vmem (%p3376_p1), [#allocation6], %s2591_s11 }
  0x51   : > { %s535_s18 = sadd.s32 (%p3376_p1), %s2595_s26, %s533_s22 }
  0x52   : > { %s2596_s9 = sshll.u32 (%p3376_p1), %s535_s18, 3 }
  0x53   : > { %s537_s5 = scalar_lea.vmem (%p3376_p1), %s3702_s3, %s2596_s9 }
  0x54   : > { %v571_v12 = vld [vmem:[%s537_s5] sm:$0xff]  ;;  %v573_v13 = vld [vmem:[%s537_s5 + $0x8] sm:$0xff] }
  0x55   : > { %v575_v14 = vld [vmem:[%s537_s5 + $0x40] sm:$0xff]  ;;  %572 = vst [vmem:[%s526_s13] sm:$0xff] %v571_v12  ;;  %574 = vst [vmem:[%s526_s13 + $0x8] sm:$0xff] %v573_v13  ;;  %v577_v15 = vld [vmem:[%s537_s5 + $0x48] sm:$0xff] }
  0x56   : > { %576 = vst [vmem:[%s526_s13 + $0x10] sm:$0xff] %v575_v14  ;;  %578 = vst [vmem:[%s526_s13 + $0x18] sm:$0xff] %v577_v15 }
  0x57 PF: > { %584 = sbr.rel (!%p3364_p12) target bundleno = 97 (0x61), region = 172  ;;  %s586_s21 = sand.u32 (%p3364_p12), 1, %s3164_s30  }
  0x58   : > { %s2600_s6 = sshll.u32 (%p3364_p12), %s3771_s24, 1  ;;  %s2685_s23 = sshll.u32 (%p3364_p12), %s3188_s14, 4 }
  0x59   : > { %s2597_s22 = sshll.u32 (%p3364_p12), %s586_s21, 5  ;;  %s595_s26 = sadd.s32 (%p3364_p12), %s2685_s23, %s2600_s6 }
  0x5a   : > { %s2602_s18 = sshll.u32 (%p3364_p12), %s3196_s16, 5  ;;  %s588_s20 = scalar_lea.vmem (%p3364_p12), [#allocation7], %s2597_s22 }
  0x5b   : > { %s597_s11 = sadd.s32 (%p3364_p12), %s2602_s18, %s595_s26 }
  0x5c   : > { %s2603_s9 = sshll.u32 (%p3364_p12), %s597_s11, 3 }
  0x5d   : > { %s599_s5 = scalar_lea.vmem (%p3364_p12), %s3703_s4, %s2603_s9 }
  0x5e   : > { %v633_v16 = vld [vmem:[%s599_s5] sm:$0xff]  ;;  %v635_v17 = vld [vmem:[%s599_s5 + $0x8] sm:$0xff] }
  0x5f   : > { %v637_v18 = vld [vmem:[%s599_s5 + $0x40] sm:$0xff]  ;;  %634 = vst [vmem:[%s588_s20] sm:$0xff] %v633_v16  ;;  %636 = vst [vmem:[%s588_s20 + $0x8] sm:$0xff] %v635_v17  ;;  %v639_v19 = vld [vmem:[%s599_s5 + $0x48] sm:$0xff] }
  0x60   : > { %638 = vst [vmem:[%s588_s20 + $0x10] sm:$0xff] %v637_v18  ;;  %640 = vst [vmem:[%s588_s20 + $0x18] sm:$0xff] %v639_v19 }
  0x61 PF: > { %646 = sbr.rel (!%p3333_p4) target bundleno = 110 (0x6e), region = 210  ;;  %s648_s24 = sand.u32 (%p3333_p4), 1, %s3172_s10  }
  0x62   : > { %s2606_s13 = sshll.u32 (%p3333_p4), %s3192_s15, 1  ;;  %s2686_s21 = sshll.u32 (%p3333_p4), %s3188_s14, 4 }
  0x63   : > { %s2604_s6 = sshll.u32 (%p3333_p4), %s648_s24, 5  ;;  %s654_s23 = sadd.s32 (%p3333_p4), %s2686_s21, %s2606_s13 }
  0x64   : > { %s2608_s26 = sshll.u32 (%p3333_p4), %s3196_s16, 5  ;;  %s3733_s7 = sld [smem:[#allocation20_spill]] (%p3333_p4) }
  0x65   : > { %s656_s22 = sadd.s32 (%p3333_p4), %s2608_s26, %s654_s23  ;;  %s650_s25 = scalar_lea.vmem (%p3333_p4), [#allocation8], %s2604_s6 }
  0x66   : > { %s2609_s18 = sshll.u32 (%p3333_p4), %s656_s22, 3 }
  0x6a   : > { %s658_s12 = scalar_lea.vmem %s3733_s7, %s2609_s18 }
  0x6b   : > { %v692_v20 = vld [vmem:[%s658_s12] sm:$0xff]  ;;  %v694_v21 = vld [vmem:[%s658_s12 + $0x8] sm:$0xff] }
  0x6c   : > { %v696_v22 = vld [vmem:[%s658_s12 + $0x40] sm:$0xff]  ;;  %693 = vst [vmem:[%s650_s25] sm:$0xff] %v692_v20  ;;  %695 = vst [vmem:[%s650_s25 + $0x8] sm:$0xff] %v694_v21  ;;  %v698_v23 = vld [vmem:[%s658_s12 + $0x48] sm:$0xff] }
  0x6d   : > { %697 = vst [vmem:[%s650_s25 + $0x10] sm:$0xff] %v696_v22  ;;  %699 = vst [vmem:[%s650_s25 + $0x18] sm:$0xff] %v698_v23 }
  0x6e PF: > { %705 = sbr.rel (!%p3376_p1) target bundleno = 123 (0x7b), region = 248  ;;  %s707_s5 = sand.u32 (%p3376_p1), 1, %s3156_s28  }
  0x6f   : > { %s2612_s20 = sshll.u32 (%p3376_p1), %s3777_s19, 1  ;;  %s2687_s24 = sshll.u32 (%p3376_p1), %s3188_s14, 4 }
  0x70   : > { %s2610_s13 = sshll.u32 (%p3376_p1), %s707_s5, 5  ;;  %s716_s21 = sadd.s32 (%p3376_p1), %s2687_s24, %s2612_s20 }
  0x71   : > { %s2614_s23 = sshll.u32 (%p3376_p1), %s3196_s16, 5  ;;  %s3734_s11 = sld [smem:[#allocation21_spill]] (%p3376_p1) }
  0x72   : > { %s718_s6 = sadd.s32 (%p3376_p1), %s2614_s23, %s716_s21  ;;  %s709_s8 = scalar_lea.vmem (%p3376_p1), [#allocation9], %s2610_s13 }
  0x73   : > { %s2615_s26 = sshll.u32 (%p3376_p1), %s718_s6, 3 }
  0x77   : > { %s720_s9 = scalar_lea.vmem %s3734_s11, %s2615_s26 }
  0x78   : > { %v754_v24 = vld [vmem:[%s720_s9] sm:$0xff]  ;;  %v756_v25 = vld [vmem:[%s720_s9 + $0x8] sm:$0xff] }
  0x79   : > { %v758_v26 = vld [vmem:[%s720_s9 + $0x40] sm:$0xff]  ;;  %755 = vst [vmem:[%s709_s8] sm:$0xff] %v754_v24  ;;  %757 = vst [vmem:[%s709_s8 + $0x8] sm:$0xff] %v756_v25  ;;  %v760_v27 = vld [vmem:[%s720_s9 + $0x48] sm:$0xff] }
  0x7a   : > { %759 = vst [vmem:[%s709_s8 + $0x10] sm:$0xff] %v758_v26  ;;  %761 = vst [vmem:[%s709_s8 + $0x18] sm:$0xff] %v760_v27 }
  0x7b PF: > { %p2616_p2 = scmp.ge.s32.totalorder %s3200_s17, 1  ;;  %p774_p4 = scmp.lt.s32.totalorder %s3200_s17, 17 }
  0x7d   : > { %p775_p6 = pnand %p2616_p2, %p774_p4 }
  0x7e   : > { %s3735_s19 = sld [smem:[#allocation12_spill]] (!%p775_p6)  ;;  %s3736_s7 = sld [smem:[#allocation13_spill]] (!%p775_p6)  ;;  %vm976_vm0 = vcmask (!%p775_p6), 130048   ;;  %v951_v51 = vlaneseq (!%p775_p6)  ;;  %v3202_v56 = vmov (!%p775_p6), 0.0  }
  0x7f   : > { %778 = sbr.rel (%p775_p6) target bundleno = 1002 (0x3ea), region = 290  ;;  %s3737_s12 = sld [smem:[#allocation10_spill]] (!%p775_p6)  ;;  %vm3458_vm1 = vmpackc.low (!%p775_p6), %vm976_vm0, %vm976_vm0 }
  0x80   : > { %s788_s25 = sand.u32 (!%p775_p6), 1, %s3160_s29   ;;  %s802_s26 = sand.u32 (!%p775_p6), 1, %s3152_s27   ;;  %v952_v52 = vshrl.u32 (!%p775_p6), %v951_v51, 7  ;;  %v955_v54 = vand.u32 (!%p775_p6), 127, %v951_v51 }
  0x81   : > { %s3453_s20 = sshll.u32 (!%p775_p6), %s788_s25, 5  ;;  %s3480_s11 = sshll.u32 (!%p775_p6), %s802_s26, 5 }
  0x82   : > { %s790_s24 = scalar_lea.vmem (!%p775_p6), [#allocation4], %s3453_s20  ;;  %s804_s27 = scalar_lea.vmem (!%p775_p6), [#allocation6], %s3480_s11  ;;  %v953_v53 = vadd.s32 (!%p775_p6), 8, %v952_v52  ;;  %vm956_vm4 = vcmp.lt.s32.totalorder (!%p775_p6), %v955_v54, %v952_v52  ;;  %vm966_vm8 = vcmp.gt.s32.totalorder (!%p775_p6), %v955_v54, %v952_v52 }
  0x83   : > { %v927_v29 = vld [vmem:[%s790_s24] sm:$0xff] (!%p775_p6)  ;;  %v928_v30 = vld [vmem:[%s790_s24 + $0x8] sm:$0xff] (!%p775_p6)  ;;  %v929_v31 = vld [vmem:[%s790_s24 + $0x10] sm:$0xff] (!%p775_p6)  ;;  %s3742_s26 = sld [smem:[#allocation22_spill]] (!%p775_p6) }
  0x84   : > { %s2626_s5 = sshll.u32 (!%p775_p6), %s3735_s19, 1  ;;  %p914_p7 = scmp.lt.s32.totalorder (!%p775_p6), %s3736_s7, 1  ;;  %v2855_v32 = vpack.c.bf16 (!%p775_p6), %v928_v30, %v927_v29  ;;  %v930_v33 = vld [vmem:[%s790_s24 + $0x18] sm:$0xff] (!%p775_p6)  ;;  %v935_v44 = vld [vmem:[%s804_s27] sm:$0xff] (!%p775_p6)  ;;  %v936_v45 = vld [vmem:[%s804_s27 + $0x8] sm:$0xff] (!%p775_p6)  ;;  %vm957_vm2 = vcmp.lt.s32.totalorder (!%p775_p6), %v955_v54, %v953_v53  ;;  %vm967_vm9 = vcmp.gt.s32.totalorder (!%p775_p6), %v955_v54, %v953_v53 }
  0x85   : > { %p916_p8 = scmp.lt.s32.totalorder (!%p775_p6), %s2626_s5, 7  ;;  %s781_s29 = sand.u32 (!%p775_p6), 1, %s3737_s12   ;;  %v2861_v34 = vpack.c.bf16 (!%p775_p6), %v930_v33, %v929_v31  ;;  %v937_v46 = vld [vmem:[%s804_s27 + $0x10] sm:$0xff] (!%p775_p6)  ;;  %v938_v48 = vld [vmem:[%s804_s27 + $0x18] sm:$0xff] (!%p775_p6)  ;;  %v2879_v49 = vpack.c.bf16 (!%p775_p6), %v936_v45, %v935_v44 }
  0x86   : > { %s3781_s7 = smov (!%p914_p7, %s3736_s7), 1  ;;  %s3465_s21 = sshll.u32 %s781_s29, 5  ;;  %2857 = vmatprep.subr.msk.bf16.mxu0 %vm3458_vm1, %v2855_v32  ;;  %v2885_v50 = vpack.c.bf16 %v938_v48, %v937_v46 }
  0x87   : > { %s2627_s13 = sshll.u32 %s3781_s7, 3  ;;  %s3783_s5 = smov (!%p916_p8, %s2626_s5), 7  ;;  %2863 = vmatprep.subr.msk.bf16.mxu1 %vm3458_vm1, %v2861_v34  ;;  %2860 = vmatpush3.bf16.xpose.msk.msra.mxu0 %vm3458_vm1, %v2855_v32 }
  0x88   : > { %s919_s23 = sadd.s32 %s2627_s13, %s3783_s5  ;;  %2866 = vmatpush3.bf16.xpose.msk.msra.mxu1 %vm3458_vm1, %v2861_v34  ;;  %s783_s6 = scalar_lea.vmem [#allocation3], %s3465_s21 }
  0x89   : > { %v923_v35 = vld [vmem:[%s783_s6] sm:$0xff]  ;;  %v925_v36 = vld [vmem:[%s783_s6 + $0x10] sm:$0xff]  ;;  %s2628_s22 = sshll.u32 %s919_s23, 3  ;;  %s797_s18 = scalar_lea.vmem [#allocation5], %s3465_s21  ;;  %v924_v39 = vld [vmem:[%s783_s6 + $0x8] sm:$0xff] }
  0x8a   : > { %2753 = vmatprep.mubr.msk.f32.mxu0 %vm976_vm0, %v923_v35  ;;  %2760 = vmatprep.mubr.msk.f32.mxu1 %vm976_vm0, %v925_v36  ;;  %v931_v37 = vld [vmem:[%s797_s18] sm:$0xff]  ;;  %v932_v38 = vld [vmem:[%s797_s18 + $0x8] sm:$0xff]  ;;  %s3740_s7 = sld [smem:[#allocation23_spill]]  ;;  %v933_v41 = vld [vmem:[%s797_s18 + $0x10] sm:$0xff]  ;;  %p958_p9 = scmp.eq.s32.totalorder %s3735_s19, 0 }
  0x8b   : > { %v2867_v40 = vpack.c.bf16 %v932_v38, %v931_v37  ;;  %v934_v42 = vld [vmem:[%s797_s18 + $0x18] sm:$0xff]  ;;  %p968_p10 = scmp.eq.s32.totalorder %s3735_s19, 3  ;;  %s818_s19 = scalar_lea.vmem [#allocation8], %s3465_s21 }
  0x8c   : > { %v2873_v43 = vpack.c.bf16 %v934_v42, %v933_v41  ;;  %v926_v47 = vld [vmem:[%s783_s6 + $0x18] sm:$0xff]  ;;  %s959_s25 = scalar_select %p958_p9, 1, 0  ;;  %v943_v31 = vld [vmem:[%s818_s19] sm:$0xff]  ;;  %v944_v32 = vld [vmem:[%s818_s19 + $0x8] sm:$0xff] }
  0x8d   : > { %2869 = vmatprep.subr.msk.bf16.mxu0 %vm3458_vm1, %v2867_v40  ;;  %s969_s5 = scalar_select %p968_p10, 1, 0  ;;  %v945_v33 = vld [vmem:[%s818_s19 + $0x10] sm:$0xff]  ;;  %v2891_v34 = vpack.c.bf16 %v944_v32, %v943_v31 }
  0x8e   : > { %2875 = vmatprep.subr.msk.bf16.mxu1 %vm3458_vm1, %v2873_v43  ;;  %2754 = vmatmul.mubr.msk.f32.vlgmr.msra.gmra.mrb[0].mxu0 %vm976_vm0, %v924_v39  ;;  %v960_v55 = vstv %s959_s25  ;;  %s811_s24 = scalar_lea.vmem [#allocation7], %s3453_s20  ;;  %s3741_s20 = sld [smem:[#allocation11_spill]] }
  0x8f   : > { %2761 = vmatmul.mubr.msk.f32.vlgmr.msra.gmra.mrb[0].mxu1 %vm976_vm0, %v926_v47  ;;  %2872 = vmatpush3.bf16.xpose.msk.msra.mxu0 %vm3458_vm1, %v2867_v40  ;;  %vm961_vm3 = vcmp.eq.s32.totalorder %v960_v55, 1  ;;  %v970_v4 = vstv %s969_s5  ;;  %v939_v37 = vld [vmem:[%s811_s24] sm:$0xff]  ;;  %v940_v38 = vld [vmem:[%s811_s24 + $0x8] sm:$0xff]  ;;  %v942_v41 = vld [vmem:[%s811_s24 + $0x18] sm:$0xff]  ;;  %s825_s29 = scalar_lea.vmem [#allocation9], %s3480_s11  ;;  %s3203_s18 = smov 112  }
  0x90   : > { %s3485_s12 = scalar_lea.vmem %s3740_s7, %s2628_s22  ;;  %2878 = vmatpush3.bf16.xpose.msk.msra.mxu1 %vm3458_vm1, %v2873_v43  ;;  %2774 = vmatprep.mubr.msk.f32.mxu1 %vm976_vm0, %v925_v36  ;;  %vm963_vm5 = vmor %vm957_vm2, %vm961_vm3  ;;  %vm971_vm7 = vcmp.eq.s32.totalorder %v970_v4, 1  ;;  %v3566_v40 = vpack.c.bf16 %v940_v38, %v939_v37  ;;  %v950_v31 = vld [vmem:[%s825_s29 + $0x18] sm:$0xff] }
  0x91   : > { %2767 = vmatprep.mubr.msk.f32.mxu0 %vm976_vm0, %v923_v35  ;;  %2881 = vmatprep.subr.msk.bf16.mxu0 %vm3458_vm1, %v2879_v49  ;;  %vm962_vm6 = vmor %vm956_vm4, %vm961_vm3  ;;  %v965_v57 = vsel %vm963_vm5, -1e+30, %v3202_v56 }
  0x92   : > { %2887 = vmatprep.subr.msk.bf16.mxu1 %vm3458_vm1, %v2885_v50  ;;  %v964_v59 = vsel %vm962_vm6, -1e+30, %v3202_v56  ;;  %vm972_vm10 = vmor %vm966_vm8, %vm971_vm7 }
  0x93   : > { %vm973_vm11 = vmor %vm967_vm9, %vm971_vm7  ;;  %v974_v15 = vsel %vm972_vm10, -1e+30, %v3202_v56 }
  0x94   : > { %v975_v17 = vsel %vm973_vm11, -1e+30, %v3202_v56  ;;  %p908_p11 = scmp.lt.s32.totalorder %s3741_s20, 1  ;;  %p2677_p12 = scmp.ne.s32.totalorder %s3741_s20, 0 }
  0x95   : > { %vm2295_vm12 = vcmask (!%p2677_p12), 261120  }
  0x96   : > { %2768 = vmatmul.mubr.msk.f32.vlgmr.msra.gmra.mrb[2].mxu0 %vm976_vm0, %v924_v39  ;;  %s909_s13 = scalar_select %p908_p11, %s3741_s20, 1 }
  0x97   : > { %2775 = vmatmul.mubr.msk.f32.vlgmr.msra.gmra.mrb[2].mxu1 %vm976_vm0, %v926_v47  ;;  %2884 = vmatpush3.bf16.xpose.msk.msra.mxu0 %vm3458_vm1, %v2879_v49 }
  0x98   : > { %2890 = vmatpush3.bf16.xpose.msk.msra.mxu1 %vm3458_vm1, %v2885_v50  ;;  %2781 = vmatprep.mubr.msk.f32.mxu0 %vm976_vm0, %v923_v35  ;;  %v946_v35 = vld [vmem:[%s818_s19 + $0x18] sm:$0xff]  ;;  %s2688_s21 = sshll.u32 %s909_s13, 5 }
  0x99   : > { %2788 = vmatprep.mubr.msk.f32.mxu1 %vm976_vm0, %v925_v36  ;;  %v2895_v36 = vpack.c.bf16 %v946_v35, %v945_v33  ;;  %2892 = vmatprep.subr.bf16.mxu0 %v2891_v34  ;;  %s3603_s22 = scalar_lea.vmem %s3742_s26, %s2688_s21 }
  0x9b   : > { %2896 = vmatprep.subr.bf16.mxu1 %v2895_v36 }
  0x9e   : > { %2782 = vmatmul.mubr.msk.f32.vlgmr.msra.gmra.mrb[4].mxu0 %vm976_vm0, %v924_v39  ;;  %v941_v39 = vld [vmem:[%s811_s24 + $0x10] sm:$0xff] }
  0x9f   : > { %2789 = vmatmul.mubr.msk.f32.vlgmr.msra.gmra.mrb[4].mxu1 %vm976_vm0, %v926_v47  ;;  %2894 = vmatpush3.bf16.msra.mxu0 %v2891_v34  ;;  %v3568_v42 = vpack.c.bf16 %v942_v41, %v941_v39  ;;  %v2097_v41 = vld [vmem:[%s3603_s22] sm:$0xff] }
  0xa0   : > { %2898 = vmatpush3.bf16.msra.mxu1 %v2895_v36  ;;  %2900 = vmatprep.subr.bf16.mxu0 %v3566_v40 }
  0xa1   : > { %2904 = vmatprep.subr.bf16.mxu1 %v3568_v42 }
 0x161   : > { %v2755_v58 = vpop.f32.mrb[0].mxu0 }
 0x162   : > { %v3516_v60 = vadd.f32 %v2755_v58, %v965_v57  ;;  %v2762_v61 = vpop.f32.mrb[0].mxu1  ;;  %v1055_v62 = vpop.f32.mrb[1].mxu0 }
 0x163   : > { %v3518_v63 = vadd.f32 %v2762_v61, %v965_v57  ;;  %v1142_v0 = vpop.f32.mrb[1].mxu1  ;;  %v3520_v1 = vadd.f32 %v1055_v62, %v964_v59 }
 0x164   : > { %v1478_v2 = vsel %vm976_vm0, %v3516_v60, -inf  ;;  %v3526_v5 = vadd.f32 %v1142_v0, %v964_v59 }
 0x165   : > { %1479 = vmax.xlane.f32.xlu0 %v1478_v2  ;;  %v1484_v3 = vsel %vm976_vm0, %v3518_v63, -inf  ;;  %v1475_v6 = vsel %vm976_vm0, %v3520_v1, -inf }
 0x166   : > { %1485 = vmax.xlane.f32.xlu1 %v1484_v3  ;;  %v1481_v12 = vsel %vm976_vm0, %v3526_v5, -inf }
 0x169   : > { %1476 = vmax.xlane.f32.xlu0 %v1475_v6  ;;  %v3530_v7 = vpop.f32.mrb[2].mxu0 }
 0x16a   : > { %v3532_v8 = vpop.f32.mrb[2].mxu1  ;;  %v3534_v9 = vpop.f32.mrb[3].mxu0  ;;  %v1490_v14 = vsel %vm976_vm0, %v3530_v7, -inf }
 0x16b   : > { %v3536_v10 = vpop.f32.mrb[3].mxu1  ;;  %v1496_v11 = vsel %vm976_vm0, %v3532_v8, -inf  ;;  %v1487_v13 = vsel %vm976_vm0, %v3534_v9, -inf }
 0x16c   : > { %1497 = vmax.xlane.f32.xlu1 %v1496_v11  ;;  %v1493_v22 = vsel %vm976_vm0, %v3536_v10, -inf }
 0x16d   : > { %1482 = vmax.xlane.f32.xlu0 %v1481_v12 }
 0x170   : > { %1488 = vmax.xlane.f32.xlu1 %v1487_v13 }
 0x171   : > { %v2783_v16 = vpop.f32.mrb[4].mxu0  ;;  %1491 = vmax.xlane.f32.xlu0 %v1490_v14 }
 0x172   : > { %v2790_v18 = vpop.f32.mrb[4].mxu1  ;;  %v1385_v19 = vpop.f32.mrb[5].mxu0  ;;  %v3552_v24 = vadd.f32 %v2783_v16, %v975_v17 }
 0x173   : > { %v3546_v20 = vadd.f32 %v1385_v19, %v974_v15  ;;  %v1466_v21 = vpop.f32.mrb[5].mxu1  ;;  %v3558_v27 = vadd.f32 %v2790_v18, %v975_v17 }
 0x174   : > { %v3550_v23 = vadd.f32 %v1466_v21, %v974_v15  ;;  %1494 = vmax.xlane.f32.xlu1 %v1493_v22  ;;  %v1506_v29 = vsel %vm976_vm0, %v3552_v24, -inf }
 0x175   : > { %v1503_v25 = vsel %vm976_vm0, %v3546_v20, -inf  ;;  %v1512_v30 = vsel %vm976_vm0, %v3558_v27, -inf }
 0x176   : > { %1504 = vmax.xlane.f32.xlu0 %v1503_v25  ;;  %v1509_v26 = vsel %vm976_vm0, %v3550_v23, -inf  ;;  %v947_v25 = vld [vmem:[%s825_s29] sm:$0xff] }
 0x178   : > { %1510 = vmax.xlane.f32.xlu1 %v1509_v26  ;;  %v948_v26 = vld [vmem:[%s825_s29 + $0x8] sm:$0xff] }
 0x17a   : > { %1507 = vmax.xlane.f32.xlu0 %v1506_v29 }
 0x17c   : > { %1513 = vmax.xlane.f32.xlu1 %v1512_v30  ;;  %v949_v30 = vld [vmem:[%s825_s29 + $0x10] sm:$0xff] }
 0x17d   : > { %v2911_v36 = vpack.c.bf16 %v950_v31, %v949_v30 }
 0x1f2   : > { %v1480_v43 = vpop.xlane.xlu0 %1479 }
 0x1f3   : > { %v1486_v44 = vpop.xlane.xlu1 %1485 }
 0x1f6   : > { %v1477_v45 = vpop.xlane.xlu0 %1476 }
 0x1f9   : > { %v1498_v46 = vpop.xlane.xlu1 %1497 }
 0x1fa   : > { %v1483_v47 = vpop.xlane.xlu0 %1482  ;;  %v1502_v61 = vmax.f32 %v1486_v44, %v1498_v46 }
 0x1fd   : > { %v1489_v48 = vpop.xlane.xlu1 %1488 }
 0x1fe   : > { %v1492_v49 = vpop.xlane.xlu0 %1491  ;;  %v1499_v51 = vmax.f32 %v1477_v45, %v1489_v48 }
 0x1ff   : > { %v1500_v58 = vmax.f32 %v1480_v43, %v1492_v49  ;;  %v2098_v43 = vld [vmem:[%s3603_s22 + $0x8] sm:$0xff] }
 0x200   : > { %v2927_v46 = vpack.c.bf16 %v2098_v43, %v2097_v41 }
 0x201   : > { %v1495_v50 = vpop.xlane.xlu1 %1494 }
 0x202   : > { %v1501_v53 = vmax.f32 %v1483_v47, %v1495_v50 }
 0x203   : > { %v1505_v52 = vpop.xlane.xlu0 %1504 }
 0x204   : > { %v1515_v54 = vmax.f32 %v1499_v51, %v1505_v52 }
 0x205   : > { %v1511_v55 = vpop.xlane.xlu1 %1510 }
 0x206   : > { %v1531_v56 = vsub.f32 %v3534_v9, %v1515_v54  ;;  %v1517_v57 = vmax.f32 %v1501_v53, %v1511_v55  ;;  %v1519_v4 = vsub.f32 %v3520_v1, %v1515_v54  ;;  %v2099_v53 = vld [vmem:[%s3603_s22 + $0x10] sm:$0xff] }
 0x207   : > { %v1508_v59 = vpop.xlane.xlu0 %1507 }
 0x208   : > { %v1535_v62 = vmul.f32 1.442695, %v1531_v56  ;;  %v1533_v0 = vsub.f32 %v3536_v10, %v1517_v57  ;;  %v1516_v2 = vmax.f32 %v1500_v58, %v1508_v59  ;;  %v1521_v14 = vsub.f32 %v3526_v5, %v1517_v57 }
 0x209   : > { %v1514_v3 = vpop.xlane.xlu1 %1513  ;;  %v1523_v10 = vmul.f32 1.442695, %v1519_v4  ;;  %v1545_v21 = vsub.f32 %v3550_v23, %v1517_v57  ;;  %v2907_v23 = vpack.c.bf16 %v948_v26, %v947_v25 }
 0x20a   : > { %v1518_v6 = vmax.f32 %v1502_v61, %v1514_v3  ;;  %3066 = vpow2.f32 %v1535_v62  ;;  %v1539_v11 = vmul.f32 1.442695, %v1533_v0  ;;  %v1520_v12 = vsub.f32 %v3516_v60, %v1516_v2 }
 0x20b   : > { %v1532_v13 = vsub.f32 %v3530_v7, %v1516_v2  ;;  %v1544_v1 = vsub.f32 %v3552_v24, %v1516_v2  ;;  %v1527_v60 = vmul.f32 1.442695, %v1521_v14  ;;  %v3056_v62 = vpack.i.bf16 %v2098_v43, %v2097_v41 }
 0x20c   : > { %v1522_v9 = vsub.f32 %v3518_v63, %v1518_v6  ;;  %v1525_v15 = vmul.f32 1.442695, %v1520_v12  ;;  %v1534_v16 = vsub.f32 %v3532_v8, %v1518_v6  ;;  %3068 = vpow2.f32 %v1539_v11 }
 0x20d   : > { %v1537_v17 = vmul.f32 1.442695, %v1532_v13  ;;  %v1546_v7 = vsub.f32 %v3558_v27, %v1518_v6  ;;  %v1543_v63 = vsub.f32 %v3546_v20, %v1515_v54  ;;  %v1549_v5 = vmul.f32 1.442695, %v1544_v1  ;;  %v2100_v54 = vld [vmem:[%s3603_s22 + $0x18] sm:$0xff] }
 0x20e   : > { %v1529_v18 = vmul.f32 1.442695, %v1522_v9  ;;  %3070 = vpow2.f32 %v1525_v15  ;;  %v1541_v19 = vmul.f32 1.442695, %v1534_v16  ;;  %v1551_v20 = vmul.f32 1.442695, %v1545_v21 }
 0x20f   : > { %3072 = vpow2.f32 %v1537_v17  ;;  %v1553_v22 = vmul.f32 1.442695, %v1546_v7  ;;  %v1547_v24 = vmul.f32 1.442695, %v1543_v63  ;;  %v2933_v55 = vpack.c.bf16 %v2100_v54, %v2099_v53 }
 0x210   : > { %3074 = vpow2.f32 %v1523_v10  ;;  %v3061_v61 = vpack.i.bf16 %v2100_v54, %v2099_v53 }
 0x211   : > { %3076 = vpow2.f32 %v1529_v18 }
 0x212   : > { %3078 = vpow2.f32 %v1541_v19 }
 0x213   : > { %3080 = vpow2.f32 %v1527_v60 }
 0x214   : > { %v3584_v8 = vpop.eup %3066  ;;  %3082 = vpow2.f32 %v1549_v5 }
 0x215   : > { %2795 = vmatprep.mubr.msk.f32.mxu0 %vm976_vm0, %v3584_v8  ;;  %3084 = vpow2.f32 %v1553_v22  ;;  %v1567_v56 = vsel %vm976_vm0, %v3584_v8, 0.0 }
 0x216   : > { %v3591_v27 = vpop.eup %3068  ;;  %3086 = vpow2.f32 %v1547_v24 }
 0x217   : > { %2802 = vmatprep.mubr.msk.f32.mxu1 %vm976_vm0, %v3591_v27  ;;  %3088 = vpow2.f32 %v1551_v20  ;;  %v1573_v57 = vsel %vm976_vm0, %v3591_v27, 0.0 }
 0x218   : > { %v3071_v29 = vpop.eup %3070 }
 0x219   : > { %v3073_v32 = vpop.eup %3072  ;;  %v1558_v33 = vsel %vm976_vm0, %v3071_v29, 0.0 }
 0x21a   : > { %v3075_v34 = vpop.eup %3074  ;;  %2796 = vmatmul.mubr.msk.f32.vlgmr.msra.gmra.mrb[6].mxu0 %vm976_vm0, %v3073_v32  ;;  %1559 = vadd.xlane.f32.xlu0 %v1558_v33 }
 0x21b   : > { %v3077_v35 = vpop.eup %3076  ;;  %2902 = vmatpush3.bf16.msra.mxu0 %v3566_v40  ;;  %2809 = vmatprep.mubr.msk.f32.mxu0 %vm976_vm0, %v3075_v34  ;;  %v1570_v40 = vsel %vm976_vm0, %v3073_v32, 0.0  ;;  %v1555_v51 = vsel %vm976_vm0, %v3075_v34, 0.0 }
 0x21c   : > { %v3079_v37 = vpop.eup %3078  ;;  %v1564_v38 = vsel %vm976_vm0, %v3077_v35, 0.0  ;;  %2908 = vmatprep.subr.bf16.mxu0 %v2907_v23 }
 0x21d   : > { %v3081_v39 = vpop.eup %3080  ;;  %2803 = vmatmul.mubr.msk.f32.vlgmr.msra.gmra.mrb[6].mxu1 %vm976_vm0, %v3079_v37  ;;  %1565 = vadd.xlane.f32.xlu1 %v1564_v38  ;;  %v1576_v45 = vsel %vm976_vm0, %v3079_v37, 0.0 }
 0x21e   : > { %2906 = vmatpush3.bf16.msra.mxu1 %v3568_v42  ;;  %2816 = vmatprep.mubr.msk.f32.mxu1 %vm976_vm0, %v3081_v39  ;;  %v3083_v44 = vpop.eup %3082  ;;  %v1561_v52 = vsel %vm976_vm0, %v3081_v39, 0.0 }
 0x21f   : > { %1571 = vadd.xlane.f32.xlu0 %v1570_v40  ;;  %2912 = vmatprep.subr.bf16.mxu1 %v2911_v36  ;;  %v3085_v47 = vpop.eup %3084  ;;  %v1586_v42 = vsel %vm976_vm0, %v3083_v44, 0.0 }
 0x220   : > { %v3087_v48 = vpop.eup %3086  ;;  %v1592_v49 = vsel %vm976_vm0, %v3085_v47, 0.0 }
 0x221   : > { %1577 = vadd.xlane.f32.xlu1 %v1576_v45  ;;  %v3089_v50 = vpop.eup %3088  ;;  %v1583_v58 = vsel %vm976_vm0, %v3087_v48, 0.0  ;;  %v3204_v45 = vmov (!%p2677_p12), 0.0  }
 0x222   : > { %2810 = vmatmul.mubr.msk.f32.vlgmr.msra.gmra.mrb[6].mxu0 %vm976_vm0, %v3071_v29  ;;  %v1589_v59 = vsel %vm976_vm0, %v3089_v50, 0.0  ;;  %2296 = vst.msk [vmem:[#allocation2] sm:$0xff] (!%p2677_p12), %vm2295_vm12, %v3204_v45  ;;  %2297 = vst.msk [vmem:[#allocation2 + $0x8] sm:$0xff] (!%p2677_p12), %vm2295_vm12, %v3204_v45 }
 0x223   : > { %2910 = vmatpush3.bf16.msra.mxu0 %v2907_v23  ;;  %2823 = vmatprep.mubr.msk.f32.mxu0 %vm976_vm0, %v3087_v48 }
 0x224   : > { %1587 = vadd.xlane.f32.xlu0 %v1586_v42  ;;  %2929 = vmatprep.subr.msk.bf16.mxu0 %vm3458_vm1, %v2927_v46 }
 0x225   : > { %2817 = vmatmul.mubr.msk.f32.vlgmr.msra.gmra.mrb[6].mxu1 %vm976_vm0, %v3077_v35  ;;  %1593 = vadd.xlane.f32.xlu1 %v1592_v49 }
 0x226   : > { %2914 = vmatpush3.bf16.msra.mxu1 %v2911_v36  ;;  %2830 = vmatprep.mubr.msk.f32.mxu1 %vm976_vm0, %v3089_v50 }
 0x228   : > { %1556 = vadd.xlane.f32.xlu0 %v1555_v51 }
 0x229   : > { %1562 = vadd.xlane.f32.xlu1 %v1561_v52 }
 0x22a   : > { %2824 = vmatmul.mubr.msk.f32.vlgmr.msra.gmra.mrb[6].mxu0 %vm976_vm0, %v3083_v44 }
 0x22c   : > { %1568 = vadd.xlane.f32.xlu0 %v1567_v56  ;;  %2932 = vmatpush3.bf16.xpose.msk.msra.mxu0 %vm3458_vm1, %v2927_v46 }
 0x22d   : > { %2831 = vmatmul.mubr.msk.f32.vlgmr.msra.gmra.mrb[6].mxu1 %vm976_vm0, %v3085_v47  ;;  %1574 = vadd.xlane.f32.xlu1 %v1573_v57 }
 0x22e   : > { %2935 = vmatprep.subr.msk.bf16.mxu0 %vm3458_vm1, %v2933_v55 }
 0x230   : > { %1584 = vadd.xlane.f32.xlu0 %v1583_v58 }
 0x231   : > { %1590 = vadd.xlane.f32.xlu1 %v1589_v59 }
 0x234   : > { %2938 = vmatpush3.bf16.xpose.msk.msra.mxu0 %vm3458_vm1, %v2933_v55 }
 0x242   : > { %3062 = vrot.lane.b32.xlu1 %v3061_v61, %s3203_s18 }
 0x246   : > { %3057 = vrot.lane.b32.xlu0 %v3056_v62, %s3203_s18 }
 0x2a7   : > { %v1560_v0 = vpop.xlane.xlu0 %1559 }
 0x2aa   : > { %v1566_v2 = vpop.xlane.xlu1 %1565 }
 0x2ac   : > { %v1572_v3 = vpop.xlane.xlu0 %1571 }
 0x2ad   : > { %v1580_v4 = vadd.f32 %v1572_v3, %v1560_v0 }
 0x2ae   : > { %v1578_v6 = vpop.xlane.xlu1 %1577 }
 0x2af   : > { %v1582_v11 = vadd.f32 %v1578_v6, %v1566_v2 }
 0x2b1   : > { %v1588_v12 = vpop.xlane.xlu0 %1587 }
 0x2b2   : > { %v1596_v13 = vadd.f32 %v1588_v12, %v1580_v4  ;;  %v1594_v9 = vpop.xlane.xlu1 %1593 }
 0x2b3   : > { %v1598_v14 = vadd.f32 %v1594_v9, %v1582_v11 }
 0x2b4   : > { %3090 = vrcp.f32 %v1596_v13 }
 0x2b5   : > { %v1557_v15 = vpop.xlane.xlu0 %1556 }
 0x2b6   : > { %v1563_v16 = vpop.xlane.xlu1 %1562 }
 0x2b9   : > { %v1569_v10 = vpop.xlane.xlu0 %1568 }
 0x2ba   : > { %v1575_v17 = vpop.xlane.xlu1 %1574  ;;  %v1579_v24 = vadd.f32 %v1569_v10, %v1557_v15 }
 0x2bb   : > { %v1581_v26 = vadd.f32 %v1575_v17, %v1563_v16 }
 0x2bd   : > { %v1585_v18 = vpop.xlane.xlu0 %1584 }
 0x2be   : > { %v1591_v1 = vpop.xlane.xlu1 %1590  ;;  %v1595_v25 = vadd.f32 %v1585_v18, %v1579_v24  ;;  %v3091_v20 = vpop.eup %3090 }
 0x2bf   : > { %v1597_v27 = vadd.f32 %v1591_v1, %v1581_v26 }
 0x2c0   : > { %3092 = vrcp.f32 %v1595_v25 }
 0x2c1   : > { %v3058_v19 = vpop.permute.xlu0 %3057  ;;  %3094 = vrcp.f32 %v1598_v14 }
 0x2c2   : > { %v3060_v60 = vunpack.i.h.bf16 %v3058_v19  ;;  %v3059_v7 = vunpack.i.l.bf16 %v3058_v19  ;;  %v3063_v63 = vpop.permute.xlu1 %3062  ;;  %3096 = vrcp.f32 %v1597_v27 }
 0x2c3   : > { %v3065_v5 = vunpack.i.h.bf16 %v3063_v63  ;;  %v3064_v8 = vunpack.i.l.bf16 %v3063_v63 }
 0x2c4   : > { %v2915_v21 = vpack.c.bf16 %v3060_v60, %v3059_v7 }
 0x2c5   : > { %v2921_v22 = vpack.c.bf16 %v3065_v5, %v3064_v8 }
 0x2c6   : > { %2917 = vmatprep.subr.msk.bf16.mxu1 %vm3458_vm1, %v2915_v21 }
 0x2c7   : > { %2920 = vmatpush3.bf16.xpose.msk.msra.mxu1 %vm3458_vm1, %v2915_v21 }
 0x2c8   : > { %2923 = vmatprep.subr.msk.bf16.mxu1 %vm3458_vm1, %v2921_v22 }
 0x2ca   : > { %v3093_v23 = vpop.eup %3092 }
 0x2cb   : > { %v3095_v33 = vpop.eup %3094 }
 0x2cc   : > { %v3097_v35 = vpop.eup %3096 }
 0x2cf   : > { %2926 = vmatpush3.bf16.xpose.msk.msra.mxu1 %vm3458_vm1, %v2921_v22 }
 0x2fd   : > { %v2825_v29 = vpop.f32.mrb[6].mxu0 }
 0x2fe   : > { %v2094_v30 = vmul.f32 %v3091_v20, %v2825_v29  ;;  %v1999_v31 = vpop.f32.mrb[7].mxu0 }
 0x2ff   : > { %v2093_v32 = vmul.f32 %v3093_v23, %v1999_v31 }
 0x300   : > { %v2832_v34 = vpop.f32.mrb[6].mxu1 }
 0x301   : > { %v2096_v36 = vmul.f32 %v3095_v33, %v2832_v34  ;;  %v2080_v28 = vpop.f32.mrb[7].mxu1  ;;  %2852 = vmatprep.mubr.msk.f32.mxu0 %vm976_vm0, %v2093_v32 }
 0x302   : > { %v2095_v37 = vmul.f32 %v3097_v35, %v2080_v28  ;;  %2853 = vmatmul.mubr.msk.f32.vlgmr.msra.gmra.mrb[8].mxu0 %vm976_vm0, %v2094_v30 }
 0x304   : > { %2841 = vmatprep.mubr.msk.f32.mxu1 %vm976_vm0, %v2095_v37 }
 0x305   : > { %2842 = vmatmul.mubr.msk.f32.vlgmr.msra.gmra.mrb[8].mxu1 %vm976_vm0, %v2096_v36 }
 0x3d4   : > { %2294 = sbr.rel (%p2677_p12) target bundleno = 987 (0x3db), region = 322 }
 0x3d5   : > { %v2854_v38 = vpop.f32.mrb[8].mxu0 }
 0x3d6   : > { %v2282_v39 = vpop.f32.mrb[9].mxu0 }
 0x3d8   : > { %v2843_v40 = vpop.f32.mrb[8].mxu1 }
 0x3d9   : > { %v2288_v41 = vadd.f32 %v2854_v38, %v2843_v40  ;;  %v2193_v43 = vpop.f32.mrb[9].mxu1 }
 0x3da   : > { %v2283_v44 = vadd.f32 %v2282_v39, %v2193_v43 }
 0x3db PF: > { %v2298_v46 = vld [vmem:[#allocation2] sm:$0xff]  ;;  %vm2302_vm13 = vcmask 261120   ;;  %v2299_v47 = vld [vmem:[#allocation2 + $0x8] sm:$0xff]  ;;  %s3743_s11 = sld [smem:[#allocation11_spill]] }
 0x3dc   : > { %v2300_v48 = vadd.f32 %v2298_v46, %v2283_v44  ;;  %v2301_v42 = vadd.f32 %v2299_v47, %v2288_v41 }
 0x3de   : > { %2303 = vst.msk [vmem:[#allocation2] sm:$0xff] %vm2302_vm13, %v2300_v48  ;;  %2304 = vst.msk [vmem:[#allocation2 + $0x8] sm:$0xff] %vm2302_vm13, %v2301_v42 }
 0x3e1   : > { %p2678_p13 = scmp.ne.s32.totalorder %s3743_s11, 1 }
 0x3e3   : > { %2308 = sbr.rel (%p2678_p13) target bundleno = 1002 (0x3ea), region = 326 }
 0x3e5   : > { %v2309_v49 = vld [vmem:[#allocation2] sm:$0xff] (!%p2678_p13)  ;;  %v2310_v50 = vld [vmem:[#allocation2 + $0x8] sm:$0xff] (!%p2678_p13) }
 0x3e6   : > { %2311 = vst.msk [vmem:[%s3485_s12] sm:$0xff] (!%p2678_p13), %vm2302_vm13, %v2309_v49  ;;  %2312 = vst.msk [vmem:[%s3485_s12 + $0x8] sm:$0xff] (!%p2678_p13), %vm2302_vm13, %v2310_v50 }
 0x3ea PF: > { %s18_s17 = sadd.s32 1, %s3200_s17   ;;  %s3745_s8 = sld [smem:[#allocation19_spill]] }
 0x3eb   : > { %p3655_p0 = scmp.ge.s32.totalorder %s18_s17, 18   ;;  %s3746_s7 = sld [smem:[#allocation18_spill]] }
 0x3ec   : > { %s3747_s25 = sld [smem:[#allocation17_spill]]  ;;  %s3748_s5 = sld [smem:[#allocation14_spill]] }
 0x3ed   : > { %s3749_s19 = sld [smem:[#allocation15_spill]]  ;;  %s3750_s24 = sld [smem:[#allocation16_spill]] }
 0x3ee   : > { %s3752_s27 = smov %s3156_s28  ;;  %s3754_s29 = smov %s3164_s30 }
 0x3ef   : > { %s3756_s9 = smov %s3172_s10  ;;  %s3758_s11 = smov %s3188_s14 }
 0x3f0   : > { %s3753_s28 = smov %s3745_s8  ;;  %s3759_s12 = smov %s3192_s15 }
 0x3f1   : > { %s3755_s30 = smov %s3746_s7  ;;  %s3760_s13 = smov %s3196_s16 }
 0x3f2   : > { %s3757_s10 = smov %s3747_s25  ;;  %s3761_s14 = smov %s3748_s5 }
 0x3f3   : > { %s3762_s15 = smov %s3749_s19  ;;  %s3763_s16 = smov %s3750_s24 }
 0x3f4   :  { %17 = sbr.rel (!%p3655_p0) target bundleno = 12 (0xc), region = 412 }

// kernel: local_mha_forward.2
= control target key start
LH: loop header
LB: loop body
LE: loop exit
PB: predicated region body
PF: predicated region fallthrough
CT: control target
= control target key end

     0   :  { %s2828_s27 = smov 0   ;;  %s2830_s28 = smov 0   ;;  %s4691_s0 = inlined_call_operand.vmem [shape: f32[2,64,32], index: 0, kind: input, shape index: {}]   ;;  %s4692_s1 = inlined_call_operand.vmem [shape: f32[192,32], index: 1, kind: input, shape index: {}]   ;;  %s4693_s2 = inlined_call_operand.vmem [shape: f32[64,16], index: 2, kind: input, shape index: {}]   ;;  %s4694_s3 = inlined_call_operand.vmem [shape: f32[64,16], index: 3, kind: input, shape index: {}]   ;;  %s4695_s4 = inlined_call_operand.vmem [shape: f32[64,16], index: 4, kind: input, shape index: {}]   ;;  %s4696_s5 = inlined_call_operand.vmem [shape: f32[64,16], index: 5, kind: input, shape index: {}]   ;;  %s4697_s6 = inlined_call_operand.vmem [shape: f32[2,4,64,16], index: 6, kind: output, shape index: {0}]   ;;  %s4698_s7 = inlined_call_operand.vmem [shape: f32[2,4,64,16], index: 7, kind: output, shape index: {1}]   ;;  %s4699_s8 = inlined_call_operand.vmem [shape: f32[2,4,64,16], index: 8, kind: output, shape index: {2}]  }
   0x1   :  { %s2832_s29 = smov 0  }
   0x2 LB: > { %s31_s30 = sadd.s32 1, %s2760_s28  ;;  %p2492_p0 = scmp.ge.s32.totalorder %s2764_s29, 1  ;;  %s2764_s29 = sphi %s2832_s29, %s19_s29   ;;  %s2760_s28 = sphi %s2830_s28, %s4868_s28   ;;  %s2756_s27 = sphi %s2828_s27, %s4867_s27  }
   0x3   : > { %p33_p1 = scmp.ge.s32.totalorder %s31_s30, 2  ;;  %p336_p2 = scmp.lt.s32.totalorder %s2764_s29, 3 }
   0x5   : > { %s4870_s30 = smov (%p33_p1, %s31_s30), 0  ;;  %p337_p3 = pnand %p2492_p0, %p336_p2 }
   0x7   : > { %340 = sbr.rel (%p337_p3) target bundleno = 1082 (0x43a), region = 44 }
   0xe   : > { %v488_v0 = vld [vmem:[%s4692_s1] sm:$0xff]  ;;  %v489_v1 = vld [vmem:[%s4692_s1 + $0x8] sm:$0xff]  ;;  %vm512_vm0 = vcmask 261120   ;;  %v2766_v2 = vmov 0.0|0.0   ;;  %v2767_v5 = vmov 0.0   ;;  %v490_v6 = vld [vmem:[%s4692_s1 + $0x10] sm:$0xff] }
   0xf   : > { %2611 = vmatprep.subr.bf16.mxu0 %v2766_v2  ;;  %v2612_v3 = vpack.c.bf16 %v489_v1, %v488_v0  ;;  %vm2857_vm1 = vmpackc.low %vm512_vm0, %vm512_vm0  ;;  %2659 = vmatprep.subr.bf16.mxu1 %v2766_v2  ;;  %v491_v7 = vld [vmem:[%s4692_s1 + $0x18] sm:$0xff]  ;;  %v2879_v9 = vld [vmem:[%s4695_s4] sm:$0xff]  ;;  %s2768_s19 = smov 64   ;;  %s2769_s9 = smov 16   ;;  %vm859_vm2 = vcmask 130048   ;;  %vm826_vm3 = vcmask 64512  }
  0x10   : > { %673 = vmatprep.mubr.f32.mxu0 %v2767_v5  ;;  %697 = vmatprep.mubr.f32.mxu1 %v2767_v5  ;;  %v2616_v8 = vpack.c.bf16 %v491_v7, %v490_v6  ;;  %v2890_v10 = vld [vmem:[%s4695_s4 + $0x10] sm:$0xff]  ;;  %v492_v11 = vld [vmem:[%s4692_s1 + $0x20] sm:$0xff]  ;;  %v493_v12 = vld [vmem:[%s4692_s1 + $0x28] sm:$0xff]  ;;  %s4706_s16 = smov 80   ;;  %s4704_s26 = smov 32  }
  0x11   : > { %2614 = vmatpush1.bf16.xpose.msk.msra.mxu0 %vm2857_vm1, %v2612_v3  ;;  %2671 = vmatpush1.bf16.xpose.msk.msra.mxu1 %vm2857_vm1, %v2612_v3  ;;  %v2903_v13 = vld [vmem:[%s4695_s4 + $0x8] sm:$0xff]  ;;  %v2912_v14 = vld [vmem:[%s4695_s4 + $0x18] sm:$0xff]  ;;  %v2620_v15 = vpack.c.bf16 %v493_v12, %v492_v11  ;;  %v2917_v16 = vld [vmem:[%s4695_s4 + $0x20] sm:$0xff]  ;;  %s2772_s20 = smov 96   ;;  %p417_p4 = scmp.lt.s32.totalorder %s2756_s27, 1 }
  0x12   : > { %2615 = vmatprep.subr.bf16.mxu0 %v2766_v2  ;;  %2660 = vmatprep.subr.bf16.mxu1 %v2766_v2  ;;  %v2926_v17 = vld [vmem:[%s4695_s4 + $0x28] sm:$0xff]  ;;  %v2935_v18 = vld [vmem:[%s4695_s4 + $0x30] sm:$0xff]  ;;  %v495_v20 = vld [vmem:[%s4692_s1 + $0x38] sm:$0xff]  ;;  %s2774_s24 = smov 8   ;;  %s2775_s25 = smov 72  }
  0x13   : > { %932 = vrot.lane.b32.xlu0 %v2879_v9, %s2768_s19  ;;  %934 = vrot.lane.b32.xlu1 %v2903_v13, %s2768_s19  ;;  %v494_v19 = vld [vmem:[%s4692_s1 + $0x30] sm:$0xff]  ;;  %v2952_v21 = vld [vmem:[%s4695_s4 + $0x38] sm:$0xff]  ;;  %s4872_s27 = smov (!%p417_p4, %s2756_s27), 1  ;;  %s2776_s10 = smov 120  }
  0x14   : > { %v2624_v22 = vpack.c.bf16 %v495_v20, %v494_v19  ;;  %v2957_v23 = vld [vmem:[%s4693_s2] sm:$0xff]  ;;  %v2966_v24 = vld [vmem:[%s4693_s2 + $0x8] sm:$0xff]  ;;  %v2975_v25 = vld [vmem:[%s4693_s2 + $0x10] sm:$0xff]  ;;  %s2607_s13 = sshll.u32 %s4872_s27, 6  ;;  %s3175_s18 = sshll.u32 %s4872_s27, 8 }
  0x15   : > { %v496_v26 = vld [vmem:[%s4692_s1 + $0x40] sm:$0xff]  ;;  %v497_v27 = vld [vmem:[%s4692_s1 + $0x48] sm:$0xff]  ;;  %v725_v28 = vld [vmem:[%s4693_s2 + $0x18] sm:$0xff]  ;;  %s424_s17 = scalar_lea.vmem %s4691_s0, %s2607_s13  ;;  %s3185_s23 = scalar_lea.vmem %s4699_s8, %s3175_s18 }
  0x16   : > { %v2628_v29 = vpack.c.bf16 %v497_v27, %v496_v26  ;;  %v2995_v30 = vld [vmem:[%s4693_s2 + $0x20] sm:$0xff]  ;;  %v3003_v31 = vld [vmem:[%s4693_s2 + $0x28] sm:$0xff]  ;;  %v728_v32 = vld [vmem:[%s4693_s2 + $0x30] sm:$0xff]  ;;  %s2773_s27 = smov 88   ;;  %s2777_s11 = smov 56  }
  0x17   : > { %936 = vrot.lane.b32.xlu0 %v2890_v10, %s2768_s19  ;;  %938 = vrot.lane.b32.xlu1 %v2912_v14, %s2768_s19  ;;  %v498_v33 = vld [vmem:[%s4692_s1 + $0x50] sm:$0xff]  ;;  %v499_v34 = vld [vmem:[%s4692_s1 + $0x58] sm:$0xff]  ;;  %s2778_s12 = smov 104   ;;  %s2779_s13 = smov 40  }
  0x18   : > { %v729_v35 = vld [vmem:[%s4693_s2 + $0x38] sm:$0xff]  ;;  %v2632_v36 = vpack.c.bf16 %v499_v34, %v498_v33  ;;  %v500_v37 = vld [vmem:[%s4692_s1 + $0x60] sm:$0xff]  ;;  %v501_v38 = vld [vmem:[%s4692_s1 + $0x68] sm:$0xff]  ;;  %s2780_s14 = smov 112   ;;  %s2781_s15 = smov 24  }
  0x19   : > { %2618 = vmatpush1.bf16.xpose.msk.msra.mxu0 %vm2857_vm1, %v2616_v8  ;;  %2672 = vmatpush1.bf16.xpose.msk.msra.mxu1 %vm2857_vm1, %v2616_v8  ;;  %v2636_v39 = vpack.c.bf16 %v501_v38, %v500_v37  ;;  %v502_v40 = vld [vmem:[%s4692_s1 + $0x70] sm:$0xff]  ;;  %v503_v41 = vld [vmem:[%s4692_s1 + $0x78] sm:$0xff]  ;;  %v504_v43 = vld [vmem:[%s4692_s1 + $0x80] sm:$0xff]  ;;  %s3597_s21 = scalar_lea.vmem %s4697_s6, %s3175_s18  ;;  %s2782_s22 = smov 48  }
  0x1a   : > { %2619 = vmatprep.subr.bf16.mxu0 %v2766_v2  ;;  %2661 = vmatprep.subr.bf16.mxu1 %v2766_v2  ;;  %v2640_v42 = vpack.c.bf16 %v503_v41, %v502_v40  ;;  %v505_v44 = vld [vmem:[%s4692_s1 + $0x88] sm:$0xff]  ;;  %v506_v46 = vld [vmem:[%s4692_s1 + $0x90] sm:$0xff]  ;;  %v507_v47 = vld [vmem:[%s4692_s1 + $0x98] sm:$0xff] }
  0x1b   : > { %940 = vrot.lane.b32.xlu0 %v2917_v16, %s2768_s19  ;;  %942 = vrot.lane.b32.xlu1 %v2926_v17, %s2768_s19  ;;  %v2644_v45 = vpack.c.bf16 %v505_v44, %v504_v43  ;;  %v2648_v48 = vpack.c.bf16 %v507_v47, %v506_v46  ;;  %v508_v49 = vld [vmem:[%s4692_s1 + $0xa0] sm:$0xff]  ;;  %v509_v50 = vld [vmem:[%s4692_s1 + $0xa8] sm:$0xff] }
  0x1c   : > { %v2652_v51 = vpack.c.bf16 %v509_v50, %v508_v49  ;;  %v510_v52 = vld [vmem:[%s4692_s1 + $0xb0] sm:$0xff]  ;;  %v511_v53 = vld [vmem:[%s4692_s1 + $0xb8] sm:$0xff]  ;;  %v480_v55 = vld [vmem:[%s424_s17] sm:$0xff] }
  0x1d   : > { %v2656_v54 = vpack.c.bf16 %v511_v53, %v510_v52  ;;  %v484_v56 = vld [vmem:[%s424_s17 + $0x20] sm:$0xff]  ;;  %v481_v57 = vld [vmem:[%s424_s17 + $0x8] sm:$0xff]  ;;  %v482_v59 = vld [vmem:[%s424_s17 + $0x10] sm:$0xff] }
  0x1e   : > { %v485_v58 = vld [vmem:[%s424_s17 + $0x28] sm:$0xff]  ;;  %v486_v60 = vld [vmem:[%s424_s17 + $0x30] sm:$0xff]  ;;  %v483_v61 = vld [vmem:[%s424_s17 + $0x18] sm:$0xff] }
  0x1f   : > { %944 = vrot.lane.b32.xlu0 %v2935_v18, %s2768_s19  ;;  %946 = vrot.lane.b32.xlu1 %v2952_v21, %s2768_s19  ;;  %v487_v62 = vld [vmem:[%s424_s17 + $0x38] sm:$0xff]  ;;  %s4500_s17 = scalar_lea.vmem %s4698_s7, %s3175_s18 }
  0x21   : > { %2622 = vmatpush1.bf16.xpose.msk.msra.mxu0 %vm2857_vm1, %v2620_v15  ;;  %2673 = vmatpush1.bf16.xpose.msk.msra.mxu1 %vm2857_vm1, %v2620_v15 }
  0x22   : > { %2623 = vmatprep.subr.bf16.mxu0 %v2766_v2  ;;  %2662 = vmatprep.subr.bf16.mxu1 %v2766_v2 }
  0x23   : > { %1124 = vrot.lane.b32.xlu0 %v2957_v23, %s2769_s9  ;;  %1126 = vrot.lane.b32.xlu1 %v2966_v24, %s2769_s9 }
  0x27   : > { %1128 = vrot.lane.b32.xlu0 %v2975_v25, %s2769_s9  ;;  %1130 = vrot.lane.b32.xlu1 %v725_v28, %s2769_s9 }
  0x29   : > { %2626 = vmatpush1.bf16.xpose.msk.msra.mxu0 %vm2857_vm1, %v2624_v22  ;;  %2674 = vmatpush1.bf16.xpose.msk.msra.mxu1 %vm2857_vm1, %v2624_v22 }
  0x2a   : > { %2627 = vmatprep.subr.bf16.mxu0 %v2766_v2  ;;  %2663 = vmatprep.subr.bf16.mxu1 %v2766_v2 }
  0x2b   : > { %1132 = vrot.lane.b32.xlu0 %v2995_v30, %s2769_s9  ;;  %1134 = vrot.lane.b32.xlu1 %v3003_v31, %s2769_s9 }
  0x2f   : > { %1136 = vrot.lane.b32.xlu0 %v728_v32, %s2769_s9  ;;  %1138 = vrot.lane.b32.xlu1 %v729_v35, %s2769_s9 }
  0x31   : > { %2630 = vmatpush1.bf16.xpose.msk.msra.mxu0 %vm2857_vm1, %v2628_v29  ;;  %2675 = vmatpush1.bf16.xpose.msk.msra.mxu1 %vm2857_vm1, %v2628_v29 }
  0x32   : > { %2631 = vmatprep.subr.bf16.mxu0 %v2766_v2  ;;  %2664 = vmatprep.subr.bf16.mxu1 %v2766_v2 }
  0x33   : > { %1301 = vrot.lane.b32.xlu0 %v2879_v9, %s4706_s16  ;;  %1303 = vrot.lane.b32.xlu1 %v2903_v13, %s4706_s16 }
  0x37   : > { %1305 = vrot.lane.b32.xlu0 %v2890_v10, %s4706_s16  ;;  %1307 = vrot.lane.b32.xlu1 %v2912_v14, %s4706_s16 }
  0x39   : > { %2634 = vmatpush1.bf16.xpose.msk.msra.mxu0 %vm2857_vm1, %v2632_v36  ;;  %2676 = vmatpush1.bf16.xpose.msk.msra.mxu1 %vm2857_vm1, %v2632_v36 }
  0x3a   : > { %2635 = vmatprep.subr.bf16.mxu0 %v2766_v2  ;;  %2665 = vmatprep.subr.bf16.mxu1 %v2766_v2 }
  0x3b   : > { %1309 = vrot.lane.b32.xlu0 %v2917_v16, %s4706_s16  ;;  %1311 = vrot.lane.b32.xlu1 %v2926_v17, %s4706_s16 }
  0x3f   : > { %1313 = vrot.lane.b32.xlu0 %v2935_v18, %s4706_s16  ;;  %1315 = vrot.lane.b32.xlu1 %v2952_v21, %s4706_s16 }
  0x41   : > { %2638 = vmatpush1.bf16.xpose.msk.msra.mxu0 %vm2857_vm1, %v2636_v39  ;;  %2677 = vmatpush1.bf16.xpose.msk.msra.mxu1 %vm2857_vm1, %v2636_v39 }
  0x42   : > { %2639 = vmatprep.subr.bf16.mxu0 %v2766_v2  ;;  %2666 = vmatprep.subr.bf16.mxu1 %v2766_v2 }
  0x43   : > { %1519 = vrot.lane.b32.xlu0 %v2957_v23, %s4704_s26  ;;  %1521 = vrot.lane.b32.xlu1 %v2966_v24, %s4704_s26 }
  0x47   : > { %1523 = vrot.lane.b32.xlu0 %v2975_v25, %s4704_s26  ;;  %1525 = vrot.lane.b32.xlu1 %v725_v28, %s4704_s26 }
  0x49   : > { %2642 = vmatpush1.bf16.xpose.msk.msra.mxu0 %vm2857_vm1, %v2640_v42  ;;  %2678 = vmatpush1.bf16.xpose.msk.msra.mxu1 %vm2857_vm1, %v2640_v42 }
  0x4a   : > { %2643 = vmatprep.subr.bf16.mxu0 %v2766_v2  ;;  %2667 = vmatprep.subr.bf16.mxu1 %v2766_v2 }
  0x4b   : > { %1527 = vrot.lane.b32.xlu0 %v2995_v30, %s4704_s26  ;;  %1529 = vrot.lane.b32.xlu1 %v3003_v31, %s4704_s26 }
  0x4f   : > { %1531 = vrot.lane.b32.xlu0 %v728_v32, %s4704_s26  ;;  %1533 = vrot.lane.b32.xlu1 %v729_v35, %s4704_s26 }
  0x51   : > { %2646 = vmatpush1.bf16.xpose.msk.msra.mxu0 %vm2857_vm1, %v2644_v45  ;;  %2679 = vmatpush1.bf16.xpose.msk.msra.mxu1 %vm2857_vm1, %v2644_v45 }
  0x52   : > { %2647 = vmatprep.subr.bf16.mxu0 %v2766_v2  ;;  %2668 = vmatprep.subr.bf16.mxu1 %v2766_v2 }
  0x53   : > { %1696 = vrot.lane.b32.xlu0 %v2879_v9, %s2772_s20  ;;  %1698 = vrot.lane.b32.xlu1 %v2903_v13, %s2772_s20 }
  0x57   : > { %1700 = vrot.lane.b32.xlu0 %v2890_v10, %s2772_s20  ;;  %1702 = vrot.lane.b32.xlu1 %v2912_v14, %s2772_s20 }
  0x59   : > { %2650 = vmatpush1.bf16.xpose.msk.msra.mxu0 %vm2857_vm1, %v2648_v48  ;;  %2680 = vmatpush1.bf16.xpose.msk.msra.mxu1 %vm2857_vm1, %v2648_v48 }
  0x5a   : > { %2651 = vmatprep.subr.bf16.mxu0 %v2766_v2  ;;  %2669 = vmatprep.subr.bf16.mxu1 %v2766_v2 }
  0x5b   : > { %1704 = vrot.lane.b32.xlu0 %v2917_v16, %s2772_s20  ;;  %1706 = vrot.lane.b32.xlu1 %v2926_v17, %s2772_s20 }
  0x5f   : > { %1708 = vrot.lane.b32.xlu0 %v2935_v18, %s2772_s20  ;;  %1710 = vrot.lane.b32.xlu1 %v2952_v21, %s2772_s20 }
  0x61   : > { %2654 = vmatpush1.bf16.xpose.msk.msra.mxu0 %vm2857_vm1, %v2652_v51  ;;  %2681 = vmatpush1.bf16.xpose.msk.msra.mxu1 %vm2857_vm1, %v2652_v51 }
  0x62   : > { %2655 = vmatprep.subr.bf16.mxu0 %v2766_v2  ;;  %2670 = vmatprep.subr.bf16.mxu1 %v2766_v2 }
  0x69   : > { %2658 = vmatpush1.bf16.xpose.msk.msra.mxu0 %vm2857_vm1, %v2656_v54  ;;  %2682 = vmatpush1.bf16.xpose.msk.msra.mxu1 %vm2857_vm1, %v2656_v54 }
  0x70   : > { %2525 = vmatmul.mubr.msk.f32.vlgmr.msra.gmra.mrb[0].mxu0 %vm512_vm0, %v480_v55  ;;  %2529 = vmatmul.mubr.msk.f32.vlgmr.msra.gmra.mrb[0].mxu1 %vm512_vm0, %v484_v56 }
  0x71   : > { %679 = vmatprep.mubr.f32.mxu0 %v2767_v5  ;;  %703 = vmatprep.mubr.f32.mxu1 %v2767_v5 }
  0x74   : > { %2526 = vmatmul.mubr.msk.f32.gmra.mrb[2].mxu0 %vm512_vm0, %v481_v57  ;;  %2530 = vmatmul.mubr.msk.f32.gmra.mrb[2].mxu1 %vm512_vm0, %v485_v58 }
  0x75   : > { %685 = vmatprep.mubr.f32.mxu0 %v2767_v5  ;;  %709 = vmatprep.mubr.f32.mxu1 %v2767_v5 }
  0x78   : > { %2527 = vmatmul.mubr.msk.f32.gmra.mrb[4].mxu0 %vm512_vm0, %v482_v59  ;;  %2531 = vmatmul.mubr.msk.f32.gmra.mrb[4].mxu1 %vm512_vm0, %v486_v60 }
  0x79   : > { %691 = vmatprep.mubr.f32.mxu0 %v2767_v5  ;;  %715 = vmatprep.mubr.f32.mxu1 %v2767_v5 }
  0x7c   : > { %2528 = vmatmul.mubr.msk.f32.gmra.mrb[6].mxu0 %vm512_vm0, %v483_v61  ;;  %2532 = vmatmul.mubr.msk.f32.gmra.mrb[6].mxu1 %vm512_vm0, %v487_v62 }
  0x85   : > { %v3170_v63 = vpop.permute.xlu0 %932  ;;  %v3172_v0 = vpop.permute.xlu1 %934 }
  0x86   : > { %4725 = vst [vmem:[#allocation2_spill] sm:$0xff] %v3170_v63  ;;  %4726 = vst [vmem:[#allocation3_spill] sm:$0xff] %v3172_v0  ;;  %v3728_v63 = vld [vmem:[%s4694_s3 + $0x8] sm:$0xff] }
  0x89   : > { %v3177_v1 = vpop.permute.xlu0 %936  ;;  %v3179_v2 = vpop.permute.xlu1 %938 }
  0x8a   : > { %4727 = vst [vmem:[#allocation4_spill] sm:$0xff] %v3177_v1  ;;  %4728 = vst [vmem:[#allocation5_spill] sm:$0xff] %v3179_v2 }
  0x8d   : > { %v3223_v11 = vpop.permute.xlu0 %940  ;;  %v3225_v12 = vpop.permute.xlu1 %942 }
  0x8e   : > { %4737 = vst [vmem:[#allocation14_spill] sm:$0xff] %v3223_v11  ;;  %4738 = vst [vmem:[#allocation15_spill] sm:$0xff] %v3225_v12 }
  0x91   : > { %v3264_v22 = vpop.permute.xlu0 %944  ;;  %v3266_v26 = vpop.permute.xlu1 %946 }
  0x92   : > { %4743 = vst [vmem:[#allocation20_spill] sm:$0xff] %v3264_v22  ;;  %4744 = vst [vmem:[#allocation21_spill] sm:$0xff] %v3266_v26 }
  0x95   : > { %v3277_v28 = vpop.permute.xlu0 %1124  ;;  %v3279_v29 = vpop.permute.xlu1 %1126 }
  0x96   : > { %4746 = vst [vmem:[#allocation23_spill] sm:$0xff] %v3277_v28  ;;  %4747 = vst [vmem:[#allocation24_spill] sm:$0xff] %v3279_v29 }
  0x99   : > { %v3289_v32 = vpop.permute.xlu0 %1128  ;;  %v3291_v33 = vpop.permute.xlu1 %1130 }
  0x9a   : > { %4748 = vst [vmem:[#allocation25_spill] sm:$0xff] %v3289_v32  ;;  %4749 = vst [vmem:[#allocation26_spill] sm:$0xff] %v3291_v33 }
  0x9d   : > { %v3297_v34 = vpop.permute.xlu0 %1132  ;;  %v3299_v35 = vpop.permute.xlu1 %1134 }
  0x9e   : > { %4750 = vst [vmem:[#allocation27_spill] sm:$0xff] %v3297_v34  ;;  %4751 = vst [vmem:[#allocation28_spill] sm:$0xff] %v3299_v35 }
  0xa1   : > { %v3309_v36 = vpop.permute.xlu0 %1136  ;;  %v3311_v37 = vpop.permute.xlu1 %1138 }
  0xa2   : > { %4752 = vst [vmem:[#allocation29_spill] sm:$0xff] %v3309_v36  ;;  %4753 = vst [vmem:[#allocation30_spill] sm:$0xff] %v3311_v37 }
  0xa5   : > { %v3317_v38 = vpop.permute.xlu0 %1301  ;;  %v3319_v39 = vpop.permute.xlu1 %1303 }
  0xa6   : > { %4754 = vst [vmem:[#allocation31_spill] sm:$0xff] %v3317_v38  ;;  %4755 = vst [vmem:[#allocation32_spill] sm:$0xff] %v3319_v39 }
  0xa9   : > { %v3329_v40 = vpop.permute.xlu0 %1305  ;;  %v3331_v41 = vpop.permute.xlu1 %1307 }
  0xaa   : > { %4756 = vst [vmem:[#allocation33_spill] sm:$0xff] %v3329_v40  ;;  %4757 = vst [vmem:[#allocation34_spill] sm:$0xff] %v3331_v41 }
  0xad   : > { %v3337_v42 = vpop.permute.xlu0 %1309  ;;  %v3339_v43 = vpop.permute.xlu1 %1311 }
  0xae   : > { %4758 = vst [vmem:[#allocation35_spill] sm:$0xff] %v3337_v42  ;;  %4759 = vst [vmem:[#allocation36_spill] sm:$0xff] %v3339_v43 }
  0xb1   : > { %v3349_v44 = vpop.permute.xlu0 %1313  ;;  %v3351_v45 = vpop.permute.xlu1 %1315 }
  0xb2   : > { %4760 = vst [vmem:[#allocation37_spill] sm:$0xff] %v3349_v44  ;;  %4761 = vst [vmem:[#allocation38_spill] sm:$0xff] %v3351_v45 }
  0xb5   : > { %v3357_v46 = vpop.permute.xlu0 %1519  ;;  %v3359_v47 = vpop.permute.xlu1 %1521 }
  0xb6   : > { %4762 = vst [vmem:[#allocation39_spill] sm:$0xff] %v3357_v46  ;;  %4763 = vst [vmem:[#allocation40_spill] sm:$0xff] %v3359_v47  ;;  %v3580_v47 = vld [vmem:[%s4694_s3] sm:$0xff] }
  0xb9   : > { %v3369_v48 = vpop.permute.xlu0 %1523  ;;  %v3371_v49 = vpop.permute.xlu1 %1525 }
  0xba   : > { %4764 = vst [vmem:[#allocation41_spill] sm:$0xff] %v3369_v48  ;;  %4765 = vst [vmem:[#allocation42_spill] sm:$0xff] %v3371_v49 }
  0xbd   : > { %v3380_v51 = vpop.permute.xlu0 %1527  ;;  %v3382_v52 = vpop.permute.xlu1 %1529 }
  0xbe   : > { %4766 = vst [vmem:[#allocation43_spill] sm:$0xff] %v3380_v51  ;;  %4767 = vst [vmem:[#allocation44_spill] sm:$0xff] %v3382_v52 }
  0xc1   : > { %v3395_v54 = vpop.permute.xlu0 %1531  ;;  %v3397_v55 = vpop.permute.xlu1 %1533 }
  0xc2   : > { %4768 = vst [vmem:[#allocation45_spill] sm:$0xff] %v3395_v54  ;;  %4769 = vst [vmem:[#allocation46_spill] sm:$0xff] %v3397_v55 }
  0xc5   : > { %v3403_v56 = vpop.permute.xlu0 %1696  ;;  %v3405_v57 = vpop.permute.xlu1 %1698 }
  0xc6   : > { %4770 = vst [vmem:[#allocation47_spill] sm:$0xff] %v3403_v56  ;;  %4771 = vst [vmem:[#allocation48_spill] sm:$0xff] %v3405_v57 }
  0xc9   : > { %v3415_v58 = vpop.permute.xlu0 %1700  ;;  %v3417_v59 = vpop.permute.xlu1 %1702 }
  0xca   : > { %4772 = vst [vmem:[#allocation49_spill] sm:$0xff] %v3415_v58  ;;  %4773 = vst [vmem:[#allocation50_spill] sm:$0xff] %v3417_v59 }
  0xcd   : > { %v3423_v60 = vpop.permute.xlu0 %1704  ;;  %v3425_v61 = vpop.permute.xlu1 %1706 }
  0xce   : > { %4774 = vst [vmem:[#allocation51_spill] sm:$0xff] %v3423_v60  ;;  %4775 = vst [vmem:[#allocation52_spill] sm:$0xff] %v3425_v61 }
  0xd1   : > { %v3435_v62 = vpop.permute.xlu1 %1710 }
  0xd2   : > { %4776 = vst [vmem:[#allocation53_spill] sm:$0xff] %v3435_v62 }
 0x143   : > { %v3187_v3 = vpop.f32.mrb[0].mxu0  ;;  %v3189_v4 = vpop.f32.mrb[0].mxu1 }
 0x144   : > { %4729 = vst [vmem:[#allocation6_spill] sm:$0xff] %v3187_v3  ;;  %4730 = vst [vmem:[#allocation7_spill] sm:$0xff] %v3189_v4  ;;  %1874 = vrot.lane.b32.xlu1 %v3187_v3, %s2773_s27  ;;  %802 = vrot.lane.b32.xlu0 %v3187_v3, %s2774_s24  ;;  %v3195_v5 = vpop.f32.mrb[1].mxu0  ;;  %v3197_v6 = vpop.f32.mrb[1].mxu1  ;;  %v3228_v13 = vsub.f32 0.0, %v3187_v3  ;;  %v3249_v18 = vsub.f32 0.0, %v3189_v4  ;;  %v839_v42 = vmul.f32 %v2995_v30, %v3189_v4 }
 0x145   : > { %4731 = vst [vmem:[#allocation8_spill] sm:$0xff] %v3195_v5  ;;  %4732 = vst [vmem:[#allocation9_spill] sm:$0xff] %v3197_v6 }
 0x146   : > { %1052 = vst.msk [vmem:[%s3185_s23] sm:$0xff] %vm859_vm2, %v3195_v5  ;;  %1056 = vst.msk [vmem:[%s3185_s23 + $0x20] sm:$0xff] %vm859_vm2, %v3197_v6 }
 0x147   : > { %v3205_v7 = vpop.f32.mrb[2].mxu0  ;;  %v3207_v8 = vpop.f32.mrb[2].mxu1 }
 0x148   : > { %4733 = vst [vmem:[#allocation10_spill] sm:$0xff] %v3205_v7  ;;  %4734 = vst [vmem:[#allocation11_spill] sm:$0xff] %v3207_v8  ;;  %1882 = vrot.lane.b32.xlu1 %v3189_v4, %s2773_s27  ;;  %810 = vrot.lane.b32.xlu0 %v3189_v4, %s2774_s24  ;;  %v3213_v9 = vpop.f32.mrb[3].mxu0  ;;  %v3215_v10 = vpop.f32.mrb[3].mxu1  ;;  %v3378_v50 = vsub.f32 0.0, %v3207_v8  ;;  %v3389_v53 = vsub.f32 0.0, %v3205_v7 }
 0x149   : > { %4735 = vst [vmem:[#allocation12_spill] sm:$0xff] %v3213_v9  ;;  %4736 = vst [vmem:[#allocation13_spill] sm:$0xff] %v3215_v10 }
 0x14a   : > { %1053 = vst.msk [vmem:[%s3185_s23 + $0x8] sm:$0xff] %vm859_vm2, %v3213_v9  ;;  %1057 = vst.msk [vmem:[%s3185_s23 + $0x28] sm:$0xff] %vm859_vm2, %v3215_v10 }
 0x14b   : > { %v3230_v14 = vpop.f32.mrb[4].mxu0  ;;  %v3232_v15 = vpop.f32.mrb[4].mxu1 }
 0x14c   : > { %4739 = vst [vmem:[#allocation16_spill] sm:$0xff] %v3230_v14  ;;  %892 = vrot.lane.b32.xlu0 %v3187_v3, %s2775_s25  ;;  %1850 = vrot.lane.b32.xlu1 %v3228_v13, %s2775_s25  ;;  %v3238_v16 = vpop.f32.mrb[5].mxu0  ;;  %v3240_v17 = vpop.f32.mrb[5].mxu1 }
 0x14d   : > { %4740 = vst [vmem:[#allocation17_spill] sm:$0xff] %v3238_v16  ;;  %4741 = vst [vmem:[#allocation18_spill] sm:$0xff] %v3240_v17 }
 0x14e   : > { %1054 = vst.msk [vmem:[%s3185_s23 + $0x10] sm:$0xff] %vm859_vm2, %v3238_v16  ;;  %1058 = vst.msk [vmem:[%s3185_s23 + $0x30] sm:$0xff] %vm859_vm2, %v3240_v17 }
 0x14f   : > { %v3251_v19 = vpop.f32.mrb[6].mxu0  ;;  %v3253_v20 = vpop.f32.mrb[6].mxu1 }
 0x150   : > { %900 = vrot.lane.b32.xlu0 %v3189_v4, %s2775_s25  ;;  %1858 = vrot.lane.b32.xlu1 %v3249_v18, %s2775_s25  ;;  %v3259_v21 = vpop.f32.mrb[7].mxu0  ;;  %v3272_v27 = vpop.f32.mrb[7].mxu1 }
 0x151   : > { %4742 = vst [vmem:[#allocation19_spill] sm:$0xff] %v3259_v21  ;;  %1055 = vst.msk [vmem:[%s3185_s23 + $0x18] sm:$0xff] %vm859_vm2, %v3259_v21 }
 0x152   : > { %4745 = vst [vmem:[#allocation22_spill] sm:$0xff] %v3272_v27  ;;  %1059 = vst.msk [vmem:[%s3185_s23 + $0x38] sm:$0xff] %vm859_vm2, %v3272_v27 }
 0x154   : > { %1084 = vrot.lane.b32.xlu0 %v3187_v3, %s2776_s10  ;;  %804 = vrot.lane.b32.xlu1 %v3205_v7, %s2774_s24 }
 0x158   : > { %1092 = vrot.lane.b32.xlu0 %v3189_v4, %s2776_s10  ;;  %812 = vrot.lane.b32.xlu1 %v3207_v8, %s2774_s24 }
 0x15c   : > { %1269 = vrot.lane.b32.xlu0 %v3187_v3, %s2777_s11  ;;  %894 = vrot.lane.b32.xlu1 %v3205_v7, %s2775_s25 }
 0x160   : > { %1277 = vrot.lane.b32.xlu0 %v3189_v4, %s2777_s11  ;;  %902 = vrot.lane.b32.xlu1 %v3207_v8, %s2775_s25 }
 0x164   : > { %1487 = vrot.lane.b32.xlu0 %v3187_v3, %s2778_s12  ;;  %1086 = vrot.lane.b32.xlu1 %v3205_v7, %s2776_s10 }
 0x168   : > { %1495 = vrot.lane.b32.xlu0 %v3189_v4, %s2778_s12  ;;  %1094 = vrot.lane.b32.xlu1 %v3207_v8, %s2776_s10 }
 0x16c   : > { %1664 = vrot.lane.b32.xlu0 %v3187_v3, %s2779_s13  ;;  %1271 = vrot.lane.b32.xlu1 %v3205_v7, %s2777_s11 }
 0x170   : > { %1672 = vrot.lane.b32.xlu0 %v3189_v4, %s2779_s13  ;;  %1279 = vrot.lane.b32.xlu1 %v3207_v8, %s2777_s11 }
 0x174   : > { %1430 = vrot.lane.b32.xlu0 %v3195_v5, %s2780_s14  ;;  %1489 = vrot.lane.b32.xlu1 %v3205_v7, %s2778_s12 }
 0x178   : > { %1438 = vrot.lane.b32.xlu0 %v3197_v6, %s2780_s14  ;;  %1497 = vrot.lane.b32.xlu1 %v3207_v8, %s2778_s12 }
 0x17c   : > { %1817 = vrot.lane.b32.xlu0 %v3195_v5, %s2772_s20  ;;  %1666 = vrot.lane.b32.xlu1 %v3205_v7, %s2779_s13 }
 0x180   : > { %1825 = vrot.lane.b32.xlu0 %v3197_v6, %s2772_s20  ;;  %1674 = vrot.lane.b32.xlu1 %v3207_v8, %s2779_s13 }
 0x184   : > { %770 = vrot.lane.b32.xlu0 %v3228_v13, %s2776_s10  ;;  %1432 = vrot.lane.b32.xlu1 %v3213_v9, %s2780_s14 }
 0x188   : > { %778 = vrot.lane.b32.xlu0 %v3249_v18, %s2776_s10  ;;  %1440 = vrot.lane.b32.xlu1 %v3215_v10, %s2780_s14 }
 0x18c   : > { %868 = vrot.lane.b32.xlu0 %v3228_v13, %s2777_s11  ;;  %1819 = vrot.lane.b32.xlu1 %v3213_v9, %s2772_s20 }
 0x190   : > { %876 = vrot.lane.b32.xlu0 %v3249_v18, %s2777_s11  ;;  %1827 = vrot.lane.b32.xlu1 %v3215_v10, %s2772_s20  ;;  %v3437_v10 = vpop.permute.xlu0 %1708 }
 0x191   : > { %4777 = vst [vmem:[#allocation54_spill] sm:$0xff] %v3437_v10 }
 0x194   : > { %1060 = vrot.lane.b32.xlu0 %v3228_v13, %s2778_s12  ;;  %780 = vrot.lane.b32.xlu1 %v3378_v50, %s2776_s10 }
 0x198   : > { %1068 = vrot.lane.b32.xlu0 %v3249_v18, %s2778_s12  ;;  %870 = vrot.lane.b32.xlu1 %v3389_v53, %s2777_s11 }
 0x19c   : > { %1245 = vrot.lane.b32.xlu0 %v3228_v13, %s2779_s13  ;;  %878 = vrot.lane.b32.xlu1 %v3378_v50, %s2777_s11 }
 0x1a0   : > { %1253 = vrot.lane.b32.xlu0 %v3249_v18, %s2779_s13  ;;  %1062 = vrot.lane.b32.xlu1 %v3389_v53, %s2778_s12 }
 0x1a4   : > { %1463 = vrot.lane.b32.xlu0 %v3228_v13, %s2773_s27  ;;  %1070 = vrot.lane.b32.xlu1 %v3378_v50, %s2778_s12 }
 0x1a8   : > { %1471 = vrot.lane.b32.xlu0 %v3249_v18, %s2773_s27  ;;  %1247 = vrot.lane.b32.xlu1 %v3389_v53, %s2779_s13 }
 0x1ac   : > { %1640 = vrot.lane.b32.xlu0 %v3228_v13, %s2781_s15  ;;  %1255 = vrot.lane.b32.xlu1 %v3378_v50, %s2779_s13 }
 0x1b0   : > { %1648 = vrot.lane.b32.xlu0 %v3249_v18, %s2781_s15  ;;  %1465 = vrot.lane.b32.xlu1 %v3389_v53, %s2773_s27 }
 0x1b4   : > { %1876 = vrot.lane.b32.xlu0 %v3205_v7, %s2773_s27  ;;  %1473 = vrot.lane.b32.xlu1 %v3378_v50, %s2773_s27 }
 0x1b6   : > { %v3443_v6 = vpop.permute.xlu1 %1874  ;;  %v3445_v9 = vpop.permute.xlu0 %802 }
 0x1b7   : > { %4778 = vst [vmem:[#allocation55_spill] sm:$0xff] %v3443_v6 }
 0x1b8   : > { %772 = vrot.lane.b32.xlu0 %v3389_v53, %s2776_s10  ;;  %1642 = vrot.lane.b32.xlu1 %v3389_v53, %s2781_s15 }
 0x1ba   : > { %v3451_v5 = vpop.permute.xlu1 %1882  ;;  %v3453_v62 = vpop.permute.xlu0 %810 }
 0x1bb   : > { %4779 = vst [vmem:[#allocation56_spill] sm:$0xff] %v3451_v5  ;;  %v3468_v5 = vsub.f32 0.0, %v3230_v14 }
 0x1bc   : > { %1852 = vrot.lane.b32.xlu0 %v3389_v53, %s2775_s25  ;;  %1650 = vrot.lane.b32.xlu1 %v3378_v50, %s2781_s15 }
 0x1be   : > { %v3459_v59 = vpop.permute.xlu0 %892  ;;  %v3461_v10 = vpop.permute.xlu1 %1850 }
 0x1bf   : > { %4780 = vst [vmem:[#allocation57_spill] sm:$0xff] %v3461_v10 }
 0x1c0   : > { %1860 = vrot.lane.b32.xlu0 %v3378_v50, %s2775_s25  ;;  %1878 = vrot.lane.b32.xlu1 %v3230_v14, %s2773_s27 }
 0x1c2   : > { %v3470_v55 = vpop.permute.xlu0 %900  ;;  %v3472_v58 = vpop.permute.xlu1 %1858 }
 0x1c3   : > { %4781 = vst [vmem:[#allocation58_spill] sm:$0xff] %v3472_v58  ;;  %v3491_v58 = vsub.f32 0.0, %v3232_v15 }
 0x1c4   : > { %806 = vrot.lane.b32.xlu0 %v3230_v14, %s2774_s24  ;;  %774 = vrot.lane.b32.xlu1 %v3468_v5, %s2776_s10 }
 0x1c6   : > { %v3478_v49 = vpop.permute.xlu0 %1084  ;;  %v3480_v54 = vpop.permute.xlu1 %804 }
 0x1c8   : > { %814 = vrot.lane.b32.xlu0 %v3232_v15, %s2774_s24  ;;  %1854 = vrot.lane.b32.xlu1 %v3468_v5, %s2775_s25 }
 0x1ca   : > { %v3486_v45 = vpop.permute.xlu0 %1092  ;;  %v3488_v48 = vpop.permute.xlu1 %812 }
 0x1cc   : > { %896 = vrot.lane.b32.xlu0 %v3230_v14, %s2775_s25  ;;  %1862 = vrot.lane.b32.xlu1 %v3491_v58, %s2775_s25 }
 0x1ce   : > { %v3497_v41 = vpop.permute.xlu0 %1269  ;;  %v3499_v44 = vpop.permute.xlu1 %894 }
 0x1d0   : > { %904 = vrot.lane.b32.xlu0 %v3232_v15, %s2775_s25  ;;  %808 = vrot.lane.b32.xlu1 %v3251_v19, %s2774_s24 }
 0x1d2   : > { %v3505_v37 = vpop.permute.xlu0 %1277  ;;  %v3507_v40 = vpop.permute.xlu1 %902 }
 0x1d4   : > { %1088 = vrot.lane.b32.xlu0 %v3230_v14, %s2776_s10  ;;  %816 = vrot.lane.b32.xlu1 %v3253_v20, %s2774_s24 }
 0x1d6   : > { %v3513_v33 = vpop.permute.xlu0 %1487  ;;  %v3515_v36 = vpop.permute.xlu1 %1086 }
 0x1d8   : > { %1096 = vrot.lane.b32.xlu0 %v3232_v15, %s2776_s10  ;;  %898 = vrot.lane.b32.xlu1 %v3251_v19, %s2775_s25 }
 0x1da   : > { %v3521_v26 = vpop.permute.xlu0 %1495  ;;  %v3523_v32 = vpop.permute.xlu1 %1094 }
 0x1dc   : > { %1273 = vrot.lane.b32.xlu0 %v3230_v14, %s2777_s11  ;;  %906 = vrot.lane.b32.xlu1 %v3253_v20, %s2775_s25 }
 0x1de   : > { %v3529_v2 = vpop.permute.xlu0 %1664  ;;  %v3531_v22 = vpop.permute.xlu1 %1271 }
 0x1e0   : > { %1281 = vrot.lane.b32.xlu0 %v3232_v15, %s2777_s11  ;;  %1090 = vrot.lane.b32.xlu1 %v3251_v19, %s2776_s10 }
 0x1e2   : > { %v3537_v1 = vpop.permute.xlu0 %1672  ;;  %v3539_v10 = vpop.permute.xlu1 %1279 }
 0x1e3   : > { %4782 = vst [vmem:[#allocation59_spill] sm:$0xff] %v3537_v1 }
 0x1e4   : > { %1491 = vrot.lane.b32.xlu0 %v3230_v14, %s2778_s12  ;;  %1098 = vrot.lane.b32.xlu1 %v3253_v20, %s2776_s10 }
 0x1e6   : > { %v1431_v6 = vpop.permute.xlu0 %1430  ;;  %v3545_v61 = vpop.permute.xlu1 %1489 }
 0x1e7   : > { %2549 = vst.msk [vmem:[%s3185_s23 + $0x40] sm:$0xff] %vm859_vm2, %v1431_v6 }
 0x1e8   : > { %1499 = vrot.lane.b32.xlu0 %v3232_v15, %s2778_s12  ;;  %1275 = vrot.lane.b32.xlu1 %v3251_v19, %s2777_s11 }
 0x1ea   : > { %v1439_v60 = vpop.permute.xlu0 %1438  ;;  %v3553_v57 = vpop.permute.xlu1 %1497 }
 0x1eb   : > { %2553 = vst.msk [vmem:[%s3185_s23 + $0x60] sm:$0xff] %vm859_vm2, %v1439_v60 }
 0x1ec   : > { %1668 = vrot.lane.b32.xlu0 %v3230_v14, %s2779_s13  ;;  %1283 = vrot.lane.b32.xlu1 %v3253_v20, %s2777_s11 }
 0x1ee   : > { %v1818_v56 = vpop.permute.xlu0 %1817  ;;  %v3561_v6 = vpop.permute.xlu1 %1666 }
 0x1ef   : > { %4783 = vst [vmem:[#allocation60_spill] sm:$0xff] %v3561_v6  ;;  %2573 = vst.msk [vmem:[%s3185_s23 + $0x80] sm:$0xff] %vm859_vm2, %v1818_v56 }
 0x1f0   : > { %1676 = vrot.lane.b32.xlu0 %v3232_v15, %s2779_s13  ;;  %1493 = vrot.lane.b32.xlu1 %v3251_v19, %s2778_s12 }
 0x1f2   : > { %v1826_v60 = vpop.permute.xlu0 %1825  ;;  %v3569_v52 = vpop.permute.xlu1 %1674 }
 0x1f3   : > { %4784 = vst [vmem:[#allocation61_spill] sm:$0xff] %v3569_v52  ;;  %2577 = vst.msk [vmem:[%s3185_s23 + $0xa0] sm:$0xff] %vm859_vm2, %v1826_v60  ;;  %v835_v60 = vmul.f32 %v2957_v23, %v3187_v3  ;;  %v3602_v23 = vld [vmem:[%s4694_s3 + $0x20] sm:$0xff] }
 0x1f4   : > { %1434 = vrot.lane.b32.xlu0 %v3238_v16, %s2780_s14  ;;  %1501 = vrot.lane.b32.xlu1 %v3253_v20, %s2778_s12 }
 0x1f6   : > { %v771_v56 = vpop.permute.xlu0 %770  ;;  %v1433_v51 = vpop.permute.xlu1 %1432 }
 0x1f7   : > { %v827_v46 = vsel %vm826_vm3, %v771_v56, %v3445_v9  ;;  %2550 = vst.msk [vmem:[%s3185_s23 + $0x48] sm:$0xff] %vm859_vm2, %v1433_v51 }
 0x1f8   : > { %v843_v43 = vmul.f32 %v827_v46, %v3580_v47  ;;  %1442 = vrot.lane.b32.xlu0 %v3240_v17, %s2780_s14  ;;  %1670 = vrot.lane.b32.xlu1 %v3251_v19, %s2779_s13 }
 0x1fa   : > { %v851_v9 = vadd.f32 %v843_v43, %v835_v60  ;;  %v779_v51 = vpop.permute.xlu0 %778  ;;  %v1441_v56 = vpop.permute.xlu1 %1440 }
 0x1fb   : > { %v831_v46 = vsel %vm826_vm3, %v779_v51, %v3453_v62  ;;  %2554 = vst.msk [vmem:[%s3185_s23 + $0x68] sm:$0xff] %vm859_vm2, %v1441_v56 }
 0x1fc   : > { %860 = vst.msk [vmem:[%s3597_s21] sm:$0xff] %vm859_vm2, %v851_v9  ;;  %v847_v43 = vmul.f32 %v831_v46, %v3602_v23  ;;  %1821 = vrot.lane.b32.xlu0 %v3238_v16, %s2772_s20  ;;  %1678 = vrot.lane.b32.xlu1 %v3253_v20, %s2779_s13  ;;  %v3656_v16 = vsub.f32 0.0, %v3251_v19 }
 0x1fe   : > { %v855_v60 = vadd.f32 %v847_v43, %v839_v42  ;;  %v3617_v39 = vpop.permute.xlu0 %868  ;;  %v1820_v62 = vpop.permute.xlu1 %1819  ;;  %v3638_v42 = vld [vmem:[%s4694_s3 + $0x28] sm:$0xff]  ;;  %v840_v43 = vmul.f32 %v3003_v31, %v3207_v8 }
 0x1ff   : > { %2574 = vst.msk [vmem:[%s3185_s23 + $0x88] sm:$0xff] %vm859_vm2, %v1820_v62 }
 0x200   : > { %864 = vst.msk [vmem:[%s3597_s21 + $0x20] sm:$0xff] %vm859_vm2, %v855_v60  ;;  %1829 = vrot.lane.b32.xlu0 %v3240_v17, %s2772_s20  ;;  %1436 = vrot.lane.b32.xlu1 %v3259_v21, %s2780_s14 }
 0x202   : > { %v3627_v30 = vpop.permute.xlu0 %876  ;;  %v1828_v9 = vpop.permute.xlu1 %1827 }
 0x203   : > { %2578 = vst.msk [vmem:[%s3185_s23 + $0xa8] sm:$0xff] %vm859_vm2, %v1828_v9 }
 0x204   : > { %782 = vrot.lane.b32.xlu0 %v3491_v58, %s2776_s10  ;;  %1444 = vrot.lane.b32.xlu1 %v3272_v27, %s2780_s14 }
 0x206   : > { %v3640_v51 = vpop.permute.xlu0 %1060  ;;  %v781_v56 = vpop.permute.xlu1 %780 }
 0x207   : > { %v832_v46 = vsel %vm826_vm3, %v781_v56, %v3488_v48  ;;  %v3669_v56 = vsub.f32 0.0, %v3253_v20 }
 0x208   : > { %v848_v60 = vmul.f32 %v832_v46, %v3638_v42  ;;  %872 = vrot.lane.b32.xlu0 %v3468_v5, %s2777_s11  ;;  %1823 = vrot.lane.b32.xlu1 %v3259_v21, %s2772_s20 }
 0x20a   : > { %v856_v62 = vadd.f32 %v848_v60, %v840_v43  ;;  %v3651_v9 = vpop.permute.xlu0 %1068  ;;  %v3653_v17 = vpop.permute.xlu1 %870 }
 0x20c   : > { %865 = vst.msk [vmem:[%s3597_s21 + $0x28] sm:$0xff] %vm859_vm2, %v856_v62  ;;  %880 = vrot.lane.b32.xlu0 %v3491_v58, %s2777_s11  ;;  %776 = vrot.lane.b32.xlu1 %v3656_v16, %s2776_s10 }
 0x20e   : > { %v3664_v31 = vpop.permute.xlu0 %1245  ;;  %v3666_v48 = vpop.permute.xlu1 %878 }
 0x210   : > { %1064 = vrot.lane.b32.xlu0 %v3468_v5, %s2778_s12  ;;  %784 = vrot.lane.b32.xlu1 %v3669_v56, %s2776_s10 }
 0x212   : > { %v3675_v46 = vpop.permute.xlu0 %1253  ;;  %v3677_v43 = vpop.permute.xlu1 %1062 }
 0x214   : > { %1072 = vrot.lane.b32.xlu0 %v3491_v58, %s2778_s12  ;;  %874 = vrot.lane.b32.xlu1 %v3656_v16, %s2777_s11 }
 0x216   : > { %v3683_v60 = vpop.permute.xlu0 %1463  ;;  %v3685_v62 = vpop.permute.xlu1 %1070 }
 0x218   : > { %1249 = vrot.lane.b32.xlu0 %v3468_v5, %s2779_s13  ;;  %882 = vrot.lane.b32.xlu1 %v3669_v56, %s2777_s11  ;;  %s4795_s11 = smov 80  }
 0x21a   : > { %v3691_v21 = vpop.permute.xlu0 %1471  ;;  %v3693_v27 = vpop.permute.xlu1 %1247 }
 0x21c   : > { %1257 = vrot.lane.b32.xlu0 %v3491_v58, %s2779_s13  ;;  %1066 = vrot.lane.b32.xlu1 %v3656_v16, %s2778_s12 }
 0x21e   : > { %v3699_v38 = vpop.permute.xlu0 %1640  ;;  %v3701_v35 = vpop.permute.xlu1 %1255 }
 0x220   : > { %1467 = vrot.lane.b32.xlu0 %v3468_v5, %s2773_s27  ;;  %1074 = vrot.lane.b32.xlu1 %v3669_v56, %s2778_s12  ;;  %s4796_s12 = smov 32  }
 0x222   : > { %v3707_v34 = vpop.permute.xlu0 %1648  ;;  %v3709_v29 = vpop.permute.xlu1 %1465 }
 0x223   : > { %4785 = vst [vmem:[#allocation62_spill] sm:$0xff] %v3707_v34 }
 0x224   : > { %1475 = vrot.lane.b32.xlu0 %v3491_v58, %s2773_s27  ;;  %1251 = vrot.lane.b32.xlu1 %v3656_v16, %s2779_s13 }
 0x226   : > { %v3715_v28 = vpop.permute.xlu0 %1876  ;;  %v3717_v12 = vpop.permute.xlu1 %1473 }
 0x227   : > { %4786 = vst [vmem:[#allocation63_spill] sm:$0xff] %v3715_v28  ;;  %v836_v28 = vmul.f32 %v2966_v24, %v3205_v7 }
 0x228   : > { %1644 = vrot.lane.b32.xlu0 %v3468_v5, %s2781_s15  ;;  %1259 = vrot.lane.b32.xlu1 %v3669_v56, %s2779_s13 }
 0x22a   : > { %v773_v11 = vpop.permute.xlu0 %772  ;;  %v3723_v0 = vpop.permute.xlu1 %1642 }
 0x22b   : > { %4787 = vst [vmem:[#allocation64_spill] sm:$0xff] %v3723_v0  ;;  %v828_v52 = vsel %vm826_vm3, %v773_v11, %v3480_v54  ;;  %v837_v54 = vmul.f32 %v2975_v25, %v3230_v14 }
 0x22c   : > { %v844_v34 = vmul.f32 %v828_v52, %v3728_v63  ;;  %1652 = vrot.lane.b32.xlu0 %v3491_v58, %s2781_s15  ;;  %1469 = vrot.lane.b32.xlu1 %v3656_v16, %s2773_s27 }
 0x22e   : > { %v852_v1 = vadd.f32 %v844_v34, %v836_v28  ;;  %v3739_v0 = vpop.permute.xlu0 %1852  ;;  %v3741_v6 = vpop.permute.xlu1 %1650 }
 0x22f   : > { %4788 = vst [vmem:[#allocation65_spill] sm:$0xff] %v3739_v0  ;;  %4789 = vst [vmem:[#allocation66_spill] sm:$0xff] %v3741_v6 }
 0x230   : > { %861 = vst.msk [vmem:[%s3597_s21 + $0x8] sm:$0xff] %vm859_vm2, %v852_v1  ;;  %1880 = vrot.lane.b32.xlu0 %v3251_v19, %s2773_s27  ;;  %1477 = vrot.lane.b32.xlu1 %v3669_v56, %s2773_s27  ;;  %v3760_v1 = vld [vmem:[%s4694_s3 + $0x10] sm:$0xff] }
 0x232   : > { %v3749_v24 = vpop.permute.xlu0 %1860  ;;  %v3751_v11 = vpop.permute.xlu1 %1878 }
 0x233   : > { %4790 = vst [vmem:[#allocation67_spill] sm:$0xff] %v3749_v24  ;;  %4791 = vst [vmem:[#allocation68_spill] sm:$0xff] %v3751_v11 }
 0x234   : > { %1856 = vrot.lane.b32.xlu0 %v3656_v16, %s2775_s25  ;;  %1646 = vrot.lane.b32.xlu1 %v3656_v16, %s2781_s15 }
 0x236   : > { %v807_v28 = vpop.permute.xlu0 %806  ;;  %v775_v34 = vpop.permute.xlu1 %774 }
 0x237   : > { %v829_v52 = vsel %vm826_vm3, %v775_v34, %v807_v28 }
 0x238   : > { %v845_v24 = vmul.f32 %v829_v52, %v3760_v1  ;;  %1864 = vrot.lane.b32.xlu0 %v3669_v56, %s2775_s25  ;;  %1654 = vrot.lane.b32.xlu1 %v3669_v56, %s2781_s15 }
 0x23a   : > { %v853_v11 = vadd.f32 %v845_v24, %v837_v54  ;;  %v3770_v0 = vpop.permute.xlu0 %814  ;;  %v3772_v6 = vpop.permute.xlu1 %1854 }
 0x23b   : > { %4792 = vst [vmem:[#allocation69_spill] sm:$0xff] %v3772_v6  ;;  %v3843_v6 = vld [vmem:[%s4696_s5 + $0x8] sm:$0xff] }
 0x23c   : > { %862 = vst.msk [vmem:[%s3597_s21 + $0x10] sm:$0xff] %vm859_vm2, %v853_v11  ;;  %1884 = vrot.lane.b32.xlu0 %v3207_v8, %s2773_s27  ;;  %1886 = vrot.lane.b32.xlu1 %v3232_v15, %s2773_s27  ;;  %v3861_v8 = vld [vmem:[%s4696_s5 + $0x20] sm:$0xff] }
 0x23e   : > { %v3780_v25 = vpop.permute.xlu0 %896  ;;  %v3782_v28 = vpop.permute.xlu1 %1862 }
 0x23f   : > { %4793 = vst [vmem:[#allocation70_spill] sm:$0xff] %v3782_v28  ;;  %v916_v28 = vsel %vm826_vm3, %v3617_v39, %v3459_v59 }
 0x240   : > { %1888 = vrot.lane.b32.xlu0 %v3253_v20, %s2773_s27  ;;  %2027 = vrot.lane.b32.xlu1 %v3228_v13, %s2774_s24 }
 0x242   : > { %v3788_v24 = vpop.permute.xlu0 %904  ;;  %v3790_v34 = vpop.permute.xlu1 %808 }
 0x244   : > { %2029 = vrot.lane.b32.xlu0 %v3389_v53, %s2774_s24  ;;  %2031 = vrot.lane.b32.xlu1 %v3468_v5, %s2774_s24 }
 0x246   : > { %v3796_v11 = vpop.permute.xlu0 %1088  ;;  %v3798_v52 = vpop.permute.xlu1 %816 }
 0x248   : > { %2033 = vrot.lane.b32.xlu0 %v3656_v16, %s2774_s24  ;;  %2035 = vrot.lane.b32.xlu1 %v3249_v18, %s2774_s24 }
 0x24a   : > { %v3804_v13 = vpop.permute.xlu0 %1096  ;;  %v3806_v54 = vpop.permute.xlu1 %898 }
 0x24c   : > { %2037 = vrot.lane.b32.xlu0 %v3378_v50, %s2774_s24  ;;  %2039 = vrot.lane.b32.xlu1 %v3491_v58, %s2774_s24 }
 0x24e   : > { %v3812_v5 = vpop.permute.xlu0 %1273  ;;  %v3814_v53 = vpop.permute.xlu1 %906 }
 0x250   : > { %2041 = vrot.lane.b32.xlu0 %v3669_v56, %s2774_s24  ;;  %2051 = vrot.lane.b32.xlu1 %v3187_v3, %s2781_s15  ;;  %v3835_v56 = vld [vmem:[%s4696_s5] sm:$0xff] }
 0x252   : > { %v3820_v16 = vpop.permute.xlu0 %1281  ;;  %v3822_v18 = vpop.permute.xlu1 %1090 }
 0x254   : > { %2053 = vrot.lane.b32.xlu0 %v3205_v7, %s2781_s15  ;;  %2055 = vrot.lane.b32.xlu1 %v3230_v14, %s2781_s15  ;;  %v917_v14 = vsel %vm826_vm3, %v3653_v17, %v3499_v44  ;;  %v964_v7 = vmul.f32 %v916_v28, %v3835_v56  ;;  %v920_v17 = vsel %vm826_vm3, %v3627_v30, %v3470_v55  ;;  %v3869_v44 = vld [vmem:[%s4696_s5 + $0x28] sm:$0xff] }
 0x255   : > { %v965_v3 = vmul.f32 %v917_v14, %v3843_v6  ;;  %v921_v14 = vsel %vm826_vm3, %v3666_v48, %v3507_v40  ;;  %v968_v28 = vmul.f32 %v920_v17, %v3861_v8  ;;  %v1108_v30 = vsel %vm826_vm3, %v3640_v51, %v3478_v49 }
 0x256   : > { %v3828_v50 = vpop.permute.xlu0 %1491  ;;  %v3830_v58 = vpop.permute.xlu1 %1098  ;;  %v1109_v40 = vsel %vm826_vm3, %v3677_v43, %v3515_v36  ;;  %v1112_v49 = vsel %vm826_vm3, %v3651_v9, %v3486_v45  ;;  %v1113_v36 = vsel %vm826_vm3, %v3685_v62, %v3523_v32  ;;  %v1293_v45 = vsel %vm826_vm3, %v3664_v31, %v3497_v41 }
 0x257   : > { %v1161_v51 = vmul.f32 %v1113_v36, %v3638_v42  ;;  %v1294_v32 = vsel %vm826_vm3, %v3693_v27, %v3531_v22  ;;  %v1333_v9 = vmul.f32 %v1293_v45, %v3835_v56  ;;  %v1297_v41 = vsel %vm826_vm3, %v3675_v46, %v3505_v37 }
 0x258   : > { %2057 = vrot.lane.b32.xlu0 %v3251_v19, %s2781_s15  ;;  %2059 = vrot.lane.b32.xlu1 %v3189_v4, %s2781_s15  ;;  %v969_v4 = vmul.f32 %v921_v14, %v3869_v44  ;;  %v1334_v62 = vmul.f32 %v1294_v32, %v3843_v6  ;;  %v1298_v22 = vsel %vm826_vm3, %v3701_v35, %v3539_v10 }
 0x259   : > { %v1337_v27 = vmul.f32 %v1297_v41, %v3861_v8  ;;  %v1338_v31 = vmul.f32 %v1298_v22, %v3869_v44  ;;  %v1511_v37 = vsel %vm826_vm3, %v3683_v60, %v3513_v33  ;;  %v1512_v10 = vsel %vm826_vm3, %v3709_v29, %v3545_v61  ;;  %v3963_v61 = vld [vmem:[%s4694_s3 + $0x30] sm:$0xff]  ;;  %v4801_v22 = vld [vmem:[#allocation61_spill] sm:$0xff] }
 0x25a   : > { %v3854_v39 = vpop.permute.xlu0 %1499  ;;  %v3856_v59 = vpop.permute.xlu1 %1275  ;;  %v1551_v35 = vmul.f32 %v1511_v37, %v3580_v47  ;;  %v1552_v46 = vmul.f32 %v1512_v10, %v3728_v63  ;;  %v1515_v33 = vsel %vm826_vm3, %v3691_v21, %v3521_v26  ;;  %v1516_v29 = vsel %vm826_vm3, %v3717_v12, %v3553_v57  ;;  %v4797_v57 = vld [vmem:[#allocation60_spill] sm:$0xff] }
 0x25b   : > { %4794 = vst [vmem:[#allocation71_spill] sm:$0xff] %v3854_v39  ;;  %v1555_v60 = vmul.f32 %v1515_v33, %v3602_v23  ;;  %v1556_v21 = vmul.f32 %v1516_v29, %v3638_v42  ;;  %v1688_v12 = vsel %vm826_vm3, %v3699_v38, %v3529_v2  ;;  %v4020_v29 = vld [vmem:[%s4693_s2 + $0x18] sm:$0xff] }
 0x25c   : > { %980 = vrot.lane.b32.xlu0 %v964_v7, %s2768_s19  ;;  %982 = vrot.lane.b32.xlu1 %v965_v3, %s2768_s19  ;;  %v1156_v3 = vmul.f32 %v1108_v30, %v3580_v47  ;;  %v1157_v7 = vmul.f32 %v1109_v40, %v3728_v63  ;;  %v1728_v38 = vmul.f32 %v1688_v12, %v3835_v56 }
 0x25e   : > { %v3878_v39 = vpop.permute.xlu0 %1668  ;;  %v3880_v55 = vpop.permute.xlu1 %1283 }
 0x260   : > { %988 = vrot.lane.b32.xlu0 %v968_v28, %s2768_s19  ;;  %990 = vrot.lane.b32.xlu1 %v969_v4, %s2768_s19  ;;  %v1160_v4 = vmul.f32 %v1112_v49, %v3602_v23  ;;  %v3980_v23 = vld [vmem:[%s4693_s2 + $0x30] sm:$0xff] }
 0x261   : > { %v841_v42 = vmul.f32 %v3980_v23, %v3232_v15 }
 0x262   : > { %v3892_v48 = vpop.permute.xlu0 %1676  ;;  %v3894_v17 = vpop.permute.xlu1 %1493 }
 0x264   : > { %1172 = vrot.lane.b32.xlu0 %v1156_v3, %s2769_s9  ;;  %1174 = vrot.lane.b32.xlu1 %v1157_v7, %s2769_s9 }
 0x266   : > { %v1435_v43 = vpop.permute.xlu0 %1434  ;;  %v3906_v14 = vpop.permute.xlu1 %1501 }
 0x267   : > { %2551 = vst.msk [vmem:[%s3185_s23 + $0x50] sm:$0xff] %vm859_vm2, %v1435_v43 }
 0x268   : > { %1180 = vrot.lane.b32.xlu0 %v1160_v4, %s2769_s9  ;;  %1182 = vrot.lane.b32.xlu1 %v1161_v51, %s2769_s9  ;;  %v4798_v4 = vld [vmem:[#allocation64_spill] sm:$0xff] }
 0x269   : > { %v1689_v51 = vsel %vm826_vm3, %v4798_v4, %v4797_v57  ;;  %v4036_v57 = vld [vmem:[%s4696_s5 + $0x30] sm:$0xff] }
 0x26a   : > { %v1443_v28 = vpop.permute.xlu0 %1442  ;;  %v3920_v30 = vpop.permute.xlu1 %1670 }
 0x26b   : > { %2555 = vst.msk [vmem:[%s3185_s23 + $0x70] sm:$0xff] %vm859_vm2, %v1443_v28  ;;  %v4800_v28 = vld [vmem:[#allocation62_spill] sm:$0xff] }
 0x26c   : > { %1349 = vrot.lane.b32.xlu0 %v1333_v9, %s4795_s11  ;;  %1351 = vrot.lane.b32.xlu1 %v1334_v62, %s4795_s11  ;;  %v4799_v62 = vld [vmem:[#allocation59_spill] sm:$0xff] }
 0x26d   : > { %v1692_v41 = vsel %vm826_vm3, %v4800_v28, %v4799_v62  ;;  %v4072_v28 = vld [vmem:[%s4696_s5 + $0x38] sm:$0xff] }
 0x26e   : > { %v1822_v40 = vpop.permute.xlu0 %1821  ;;  %v3934_v3 = vpop.permute.xlu1 %1678  ;;  %v1732_v37 = vmul.f32 %v1692_v41, %v3861_v8 }
 0x26f   : > { %2575 = vst.msk [vmem:[%s3185_s23 + $0x90] sm:$0xff] %vm859_vm2, %v1822_v40  ;;  %v4004_v40 = vld [vmem:[%s4694_s3 + $0x18] sm:$0xff] }
 0x270   : > { %1357 = vrot.lane.b32.xlu0 %v1337_v27, %s4795_s11  ;;  %1359 = vrot.lane.b32.xlu1 %v1338_v31, %s4795_s11  ;;  %v4802_v27 = vld [vmem:[#allocation66_spill] sm:$0xff] }
 0x271   : > { %v1693_v31 = vsel %vm826_vm3, %v4802_v27, %v4801_v22 }
 0x272   : > { %v1830_v7 = vpop.permute.xlu0 %1829  ;;  %v1437_v49 = vpop.permute.xlu1 %1436  ;;  %v1733_v10 = vmul.f32 %v1693_v31, %v3869_v44 }
 0x273   : > { %2579 = vst.msk [vmem:[%s3185_s23 + $0xb0] sm:$0xff] %vm859_vm2, %v1830_v7  ;;  %2552 = vst.msk [vmem:[%s3185_s23 + $0x58] sm:$0xff] %vm859_vm2, %v1437_v49  ;;  %v4011_v7 = vld [vmem:[%s4696_s5 + $0x10] sm:$0xff] }
 0x274   : > { %1567 = vrot.lane.b32.xlu0 %v1551_v35, %s4796_s12  ;;  %1569 = vrot.lane.b32.xlu1 %v1552_v46, %s4796_s12 }
 0x276   : > { %v783_v26 = vpop.permute.xlu0 %782  ;;  %v1445_v36 = vpop.permute.xlu1 %1444 }
 0x277   : > { %v833_v43 = vsel %vm826_vm3, %v783_v26, %v3770_v0  ;;  %2556 = vst.msk [vmem:[%s3185_s23 + $0x78] sm:$0xff] %vm859_vm2, %v1445_v36  ;;  %v1729_v0 = vmul.f32 %v1689_v51, %v3843_v6 }
 0x278   : > { %v849_v2 = vmul.f32 %v833_v43, %v3963_v61  ;;  %1575 = vrot.lane.b32.xlu0 %v1555_v60, %s4796_s12  ;;  %1577 = vrot.lane.b32.xlu1 %v1556_v21, %s4796_s12  ;;  %v838_v60 = vmul.f32 %v4020_v29, %v3251_v19  ;;  %v4047_v43 = vld [vmem:[%s4693_s2 + $0x38] sm:$0xff] }
 0x27a   : > { %v857_v45 = vadd.f32 %v849_v2, %v841_v42  ;;  %v873_v32 = vpop.permute.xlu0 %872  ;;  %v1824_v9 = vpop.permute.xlu1 %1823  ;;  %v842_v42 = vmul.f32 %v4047_v43, %v3253_v20 }
 0x27b   : > { %2576 = vst.msk [vmem:[%s3185_s23 + $0x98] sm:$0xff] %vm859_vm2, %v1824_v9  ;;  %v918_v49 = vsel %vm826_vm3, %v873_v32, %v3780_v25  ;;  %v4030_v25 = vld [vmem:[%s4694_s3 + $0x38] sm:$0xff] }
 0x27c   : > { %866 = vst.msk [vmem:[%s3597_s21 + $0x30] sm:$0xff] %vm859_vm2, %v857_v45  ;;  %1744 = vrot.lane.b32.xlu0 %v1728_v38, %s2772_s20  ;;  %1746 = vrot.lane.b32.xlu1 %v1729_v0, %s2772_s20 }
 0x27e   : > { %v881_v35 = vpop.permute.xlu0 %880  ;;  %v777_v46 = vpop.permute.xlu1 %776 }
 0x27f   : > { %v830_v33 = vsel %vm826_vm3, %v777_v46, %v3790_v34  ;;  %v966_v34 = vmul.f32 %v918_v49, %v4011_v7  ;;  %v922_v4 = vsel %vm826_vm3, %v881_v35, %v3788_v24  ;;  %v4058_v24 = vld [vmem:[%s4696_s5 + $0x18] sm:$0xff] }
 0x280   : > { %v846_v21 = vmul.f32 %v830_v33, %v4004_v40  ;;  %1752 = vrot.lane.b32.xlu0 %v1732_v37, %s2772_s20  ;;  %1754 = vrot.lane.b32.xlu1 %v1733_v10, %s2772_s20 }
 0x282   : > { %v854_v26 = vadd.f32 %v846_v21, %v838_v60  ;;  %v1065_v36 = vpop.permute.xlu0 %1064  ;;  %v785_v12 = vpop.permute.xlu1 %784 }
 0x283   : > { %v834_v51 = vsel %vm826_vm3, %v785_v12, %v3798_v52  ;;  %v970_v52 = vmul.f32 %v922_v4, %v4036_v57  ;;  %v1110_v32 = vsel %vm826_vm3, %v1065_v36, %v3796_v11 }
 0x284   : > { %863 = vst.msk [vmem:[%s3597_s21 + $0x18] sm:$0xff] %vm859_vm2, %v854_v26  ;;  %v850_v2 = vmul.f32 %v834_v51, %v4030_v25  ;;  %984 = vrot.lane.b32.xlu0 %v966_v34, %s2768_s19  ;;  %2063 = vrot.lane.b32.xlu1 %v3232_v15, %s2781_s15  ;;  %v1158_v41 = vmul.f32 %v1110_v32, %v3760_v1 }
 0x286   : > { %v858_v38 = vadd.f32 %v850_v2, %v842_v42  ;;  %v1073_v0 = vpop.permute.xlu0 %1072  ;;  %v875_v45 = vpop.permute.xlu1 %874  ;;  %v4803_v2 = vld [vmem:[#allocation71_spill] sm:$0xff] }
 0x287   : > { %v919_v9 = vsel %vm826_vm3, %v875_v45, %v3806_v54  ;;  %v1114_v54 = vsel %vm826_vm3, %v1073_v0, %v3804_v13 }
 0x288   : > { %867 = vst.msk [vmem:[%s3597_s21 + $0x38] sm:$0xff] %vm859_vm2, %v858_v38  ;;  %v967_v62 = vmul.f32 %v919_v9, %v4058_v24  ;;  %992 = vrot.lane.b32.xlu0 %v970_v52, %s2768_s19  ;;  %v1162_v37 = vmul.f32 %v1114_v54, %v3963_v61 }
 0x28a   : > { %v1250_v22 = vpop.permute.xlu0 %1249  ;;  %986 = vrot.lane.b32.xlu1 %v967_v62, %s2768_s19  ;;  %v883_v11 = vpop.permute.xlu1 %882 }
 0x28b   : > { %v923_v27 = vsel %vm826_vm3, %v883_v11, %v3814_v53  ;;  %v1295_v46 = vsel %vm826_vm3, %v1250_v22, %v3812_v5 }
 0x28c   : > { %v971_v31 = vmul.f32 %v923_v27, %v4072_v28  ;;  %1176 = vrot.lane.b32.xlu0 %v1158_v41, %s2769_s9  ;;  %v1335_v53 = vmul.f32 %v1295_v46, %v4011_v7 }
 0x28e   : > { %v1258_v10 = vpop.permute.xlu0 %1257  ;;  %994 = vrot.lane.b32.xlu1 %v971_v31, %s2768_s19  ;;  %v1067_v35 = vpop.permute.xlu1 %1066 }
 0x28f   : > { %v1111_v49 = vsel %vm826_vm3, %v1067_v35, %v3822_v18  ;;  %v1299_v21 = vsel %vm826_vm3, %v1258_v10, %v3820_v16 }
 0x290   : > { %v1159_v13 = vmul.f32 %v1111_v49, %v4004_v40  ;;  %1184 = vrot.lane.b32.xlu0 %v1162_v37, %s2769_s9  ;;  %v1339_v18 = vmul.f32 %v1299_v21, %v4036_v57  ;;  %v4804_v49 = vld [vmem:[#allocation11_spill] sm:$0xff] }
 0x292   : > { %v1468_v33 = vpop.permute.xlu0 %1467  ;;  %1178 = vrot.lane.b32.xlu1 %v1159_v13, %s2769_s9  ;;  %v1075_v60 = vpop.permute.xlu1 %1074 }
 0x293   : > { %v1115_v34 = vsel %vm826_vm3, %v1075_v60, %v3830_v58  ;;  %v1513_v12 = vsel %vm826_vm3, %v1468_v33, %v3828_v50  ;;  %v2728_v60 = vld [vmem:[%s4693_s2 + $0x8] sm:$0xff] }
 0x294   : > { %v1163_v5 = vmul.f32 %v1115_v34, %v4030_v25  ;;  %1353 = vrot.lane.b32.xlu0 %v1335_v53, %s4795_s11  ;;  %v1553_v58 = vmul.f32 %v1513_v12, %v3760_v1  ;;  %v2729_v34 = vld [vmem:[%s4693_s2 + $0x10] sm:$0xff]  ;;  %v2731_v12 = vld [vmem:[%s4693_s2 + $0x28] sm:$0xff] }
 0x296   : > { %v1476_v26 = vpop.permute.xlu0 %1475  ;;  %1186 = vrot.lane.b32.xlu1 %v1163_v5, %s2769_s9  ;;  %v1252_v36 = vpop.permute.xlu1 %1251 }
 0x297   : > { %v1296_v4 = vsel %vm826_vm3, %v1252_v36, %v3856_v59  ;;  %v1517_v52 = vsel %vm826_vm3, %v1476_v26, %v4803_v2  ;;  %v2730_v26 = vld [vmem:[%s4693_s2 + $0x20] sm:$0xff] }
 0x298   : > { %v1336_v16 = vmul.f32 %v1296_v4, %v4058_v24  ;;  %1361 = vrot.lane.b32.xlu0 %v1339_v18, %s4795_s11  ;;  %v1557_v59 = vmul.f32 %v1517_v52, %v3963_v61  ;;  %v2735_v52 = vld [vmem:[%s4695_s4 + $0x18] sm:$0xff] }
 0x29a   : > { %v1645_v51 = vpop.permute.xlu0 %1644  ;;  %1355 = vrot.lane.b32.xlu1 %v1336_v16, %s4795_s11  ;;  %v1260_v42 = vpop.permute.xlu1 %1259 }
 0x29b   : > { %v1300_v38 = vsel %vm826_vm3, %v1260_v42, %v3880_v55  ;;  %v1690_v32 = vsel %vm826_vm3, %v1645_v51, %v3878_v39  ;;  %v2733_v42 = vld [vmem:[%s4695_s4 + $0x8] sm:$0xff] }
 0x29c   : > { %v1340_v50 = vmul.f32 %v1300_v38, %v4072_v28  ;;  %1571 = vrot.lane.b32.xlu0 %v1553_v58, %s4796_s12  ;;  %v1730_v55 = vmul.f32 %v1690_v32, %v4011_v7  ;;  %v2732_v58 = vld [vmem:[%s4695_s4] sm:$0xff] }
 0x29d   : > { %v4806_v32 = vld [vmem:[#allocation2_spill] sm:$0xff] }
 0x29e   : > { %v1653_v0 = vpop.permute.xlu0 %1652  ;;  %1363 = vrot.lane.b32.xlu1 %v1340_v50, %s4795_s11  ;;  %v1470_v45 = vpop.permute.xlu1 %1469  ;;  %v2736_v50 = vld [vmem:[%s4695_s4 + $0x20] sm:$0xff] }
 0x29f   : > { %v1514_v9 = vsel %vm826_vm3, %v1470_v45, %v3894_v17  ;;  %v1694_v11 = vsel %vm826_vm3, %v1653_v0, %v3892_v48  ;;  %v2737_v0 = vld [vmem:[%s4695_s4 + $0x28] sm:$0xff]  ;;  %v4805_v45 = vld [vmem:[#allocation6_spill] sm:$0xff] }
 0x2a0   : > { %v1554_v62 = vmul.f32 %v1514_v9, %v4004_v40  ;;  %1579 = vrot.lane.b32.xlu0 %v1557_v59, %s4796_s12  ;;  %v1734_v17 = vmul.f32 %v1694_v11, %v4036_v57  ;;  %v956_v9 = vmul.f32 %v4806_v32, %v4805_v45 }
 0x2a2   : > { %v4123_v41 = vpop.permute.xlu0 %1880  ;;  %1573 = vrot.lane.b32.xlu1 %v1554_v62, %s4796_s12  ;;  %v1478_v22 = vpop.permute.xlu1 %1477  ;;  %v4807_v62 = vld [vmem:[#allocation10_spill] sm:$0xff] }
 0x2a3   : > { %v1518_v39 = vsel %vm826_vm3, %v1478_v22, %v3906_v14 }
 0x2a4   : > { %v1558_v54 = vmul.f32 %v1518_v39, %v4030_v25  ;;  %1748 = vrot.lane.b32.xlu0 %v1730_v55, %s2772_s20  ;;  %v4808_v55 = vld [vmem:[#allocation3_spill] sm:$0xff]  ;;  %v2738_v39 = vld [vmem:[%s4695_s4 + $0x30] sm:$0xff] }
 0x2a5   : > { %v957_v22 = vmul.f32 %v4808_v55, %v4807_v62 }
 0x2a6   : > { %v4133_v27 = vpop.permute.xlu0 %1856  ;;  %1581 = vrot.lane.b32.xlu1 %v1558_v54, %s4796_s12  ;;  %v1647_v31 = vpop.permute.xlu1 %1646 }
 0x2a7   : > { %v1691_v37 = vsel %vm826_vm3, %v1647_v31, %v3920_v30 }
 0x2a8   : > { %v1731_v10 = vmul.f32 %v1691_v37, %v4058_v24  ;;  %1756 = vrot.lane.b32.xlu0 %v1734_v17, %s2772_s20  ;;  %v4809_v37 = vld [vmem:[#allocation7_spill] sm:$0xff] }
 0x2aa   : > { %v4140_v48 = vpop.permute.xlu0 %1864  ;;  %1750 = vrot.lane.b32.xlu1 %v1731_v10, %s2772_s20  ;;  %v1655_v14 = vpop.permute.xlu1 %1654  ;;  %v4810_v10 = vld [vmem:[#allocation14_spill] sm:$0xff] }
 0x2ab   : > { %v1695_v35 = vsel %vm826_vm3, %v1655_v14, %v3934_v3  ;;  %v2727_v3 = vld [vmem:[%s4693_s2] sm:$0xff]  ;;  %v960_v14 = vmul.f32 %v4810_v10, %v4809_v37  ;;  %v4816_v10 = vld [vmem:[#allocation31_spill] sm:$0xff] }
 0x2ac   : > { %v1735_v46 = vmul.f32 %v1695_v35, %v4072_v28  ;;  %2061 = vrot.lane.b32.xlu0 %v4804_v49, %s2781_s15  ;;  %v4811_v35 = vld [vmem:[#allocation15_spill] sm:$0xff] }
 0x2ae   : > { %v4148_v13 = vpop.permute.xlu0 %1884  ;;  %1758 = vrot.lane.b32.xlu1 %v1735_v46, %s2772_s20  ;;  %v4151_v30 = vpop.permute.xlu1 %1886  ;;  %v961_v46 = vmul.f32 %v4811_v35, %v4804_v49  ;;  %v4817_v35 = vld [vmem:[#allocation32_spill] sm:$0xff] }
 0x2b0   : > { %2065 = vrot.lane.b32.xlu0 %v3253_v20, %s2781_s15 }
 0x2b2   : > { %v4155_v53 = vpop.permute.xlu0 %1888  ;;  %1906 = vrot.lane.b32.xlu1 %v2727_v3, %s2782_s22  ;;  %v4161_v33 = vpop.permute.xlu1 %2027 }
 0x2b4   : > { %1908 = vrot.lane.b32.xlu0 %v2728_v60, %s2782_s22 }
 0x2b6   : > { %v4167_v21 = vpop.permute.xlu0 %2029  ;;  %1910 = vrot.lane.b32.xlu1 %v2729_v34, %s2782_s22  ;;  %v4173_v5 = vpop.permute.xlu1 %2031 }
 0x2b8   : > { %1912 = vrot.lane.b32.xlu0 %v4020_v29, %s2782_s22 }
 0x2ba   : > { %v4177_v18 = vpop.permute.xlu0 %2033  ;;  %1914 = vrot.lane.b32.xlu1 %v2730_v26, %s2782_s22  ;;  %v4183_v36 = vpop.permute.xlu1 %2035 }
 0x2bc   : > { %1916 = vrot.lane.b32.xlu0 %v2731_v12, %s2782_s22  ;;  %v4812_v12 = vld [vmem:[#allocation23_spill] sm:$0xff] }
 0x2be   : > { %v4189_v4 = vpop.permute.xlu0 %2037  ;;  %1918 = vrot.lane.b32.xlu1 %v3980_v23, %s2782_s22  ;;  %v4193_v29 = vpop.permute.xlu1 %2039 }
 0x2c0   : > { %1920 = vrot.lane.b32.xlu0 %v4047_v43, %s2782_s22  ;;  %v2734_v43 = vld [vmem:[%s4695_s4 + $0x10] sm:$0xff] }
 0x2c2   : > { %v4197_v16 = vpop.permute.xlu0 %2041  ;;  %2083 = vrot.lane.b32.xlu1 %v2732_v58, %s2780_s14  ;;  %v4203_v51 = vpop.permute.xlu1 %2051  ;;  %v1148_v58 = vmul.f32 %v4812_v12, %v4805_v45  ;;  %v4818_v12 = vld [vmem:[#allocation35_spill] sm:$0xff] }
 0x2c4   : > { %2085 = vrot.lane.b32.xlu0 %v2733_v42, %s2780_s14  ;;  %v4813_v42 = vld [vmem:[#allocation24_spill] sm:$0xff] }
 0x2c6   : > { %v4209_v23 = vpop.permute.xlu0 %2053  ;;  %2087 = vrot.lane.b32.xlu1 %v2734_v43, %s2780_s14  ;;  %v4215_v2 = vpop.permute.xlu1 %2055  ;;  %v1149_v43 = vmul.f32 %v4813_v42, %v4807_v62  ;;  %v4819_v42 = vld [vmem:[#allocation36_spill] sm:$0xff] }
 0x2c8   : > { %2089 = vrot.lane.b32.xlu0 %v2735_v52, %s2780_s14 }
 0x2ca   : > { %v4221_v38 = vpop.permute.xlu0 %2057  ;;  %2091 = vrot.lane.b32.xlu1 %v2736_v50, %s2780_s14  ;;  %v4227_v59 = vpop.permute.xlu1 %2059 }
 0x2cc   : > { %2093 = vrot.lane.b32.xlu0 %v2737_v0, %s2780_s14 }
 0x2ce   : > { %v981_v11 = vpop.permute.xlu0 %980  ;;  %2095 = vrot.lane.b32.xlu1 %v2738_v39, %s2780_s14  ;;  %v983_v54 = vpop.permute.xlu1 %982 }
 0x2cf   : > { %v1004_v17 = vadd.f32 %v981_v11, %v956_v9  ;;  %v1005_v31 = vadd.f32 %v983_v54, %v957_v22  ;;  %v4814_v9 = vld [vmem:[#allocation27_spill] sm:$0xff]  ;;  %v4815_v22 = vld [vmem:[#allocation28_spill] sm:$0xff] }
 0x2d0   : > { %v1152_v55 = vmul.f32 %v4814_v9, %v4809_v37  ;;  %v1153_v11 = vmul.f32 %v4815_v22, %v4804_v49  ;;  %v4820_v9 = vld [vmem:[#allocation39_spill] sm:$0xff]  ;;  %v4821_v22 = vld [vmem:[#allocation40_spill] sm:$0xff] }
 0x2d1   : > { %1020 = vrot.lane.b32.xlu0 %v1004_v17, %s2768_s19 }
 0x2d2   : > { %v989_v3 = vpop.permute.xlu0 %988  ;;  %1022 = vrot.lane.b32.xlu1 %v1005_v31, %s2768_s19  ;;  %v991_v60 = vpop.permute.xlu1 %990 }
 0x2d3   : > { %v1008_v34 = vadd.f32 %v989_v3, %v960_v14  ;;  %v1009_v26 = vadd.f32 %v991_v60, %v961_v46  ;;  %v1325_v14 = vmul.f32 %v4816_v10, %v4805_v45  ;;  %v1326_v46 = vmul.f32 %v4817_v35, %v4807_v62  ;;  %v4822_v10 = vld [vmem:[#allocation43_spill] sm:$0xff]  ;;  %v4823_v35 = vld [vmem:[#allocation44_spill] sm:$0xff] }
 0x2d5   : > { %1028 = vrot.lane.b32.xlu0 %v1008_v34, %s2768_s19 }
 0x2d6   : > { %v1173_v52 = vpop.permute.xlu0 %1172  ;;  %1030 = vrot.lane.b32.xlu1 %v1009_v26, %s2768_s19  ;;  %v1175_v50 = vpop.permute.xlu1 %1174 }
 0x2d7   : > { %v1196_v0 = vadd.f32 %v1173_v52, %v1148_v58  ;;  %v1197_v32 = vadd.f32 %v1175_v50, %v1149_v43  ;;  %v1329_v58 = vmul.f32 %v4818_v12, %v4809_v37  ;;  %v1330_v43 = vmul.f32 %v4819_v42, %v4804_v49  ;;  %v4824_v12 = vld [vmem:[#allocation47_spill] sm:$0xff]  ;;  %v4825_v42 = vld [vmem:[#allocation48_spill] sm:$0xff] }
 0x2d9   : > { %1212 = vrot.lane.b32.xlu0 %v1196_v0, %s2780_s14 }
 0x2da   : > { %v1181_v39 = vpop.permute.xlu0 %1180  ;;  %1214 = vrot.lane.b32.xlu1 %v1197_v32, %s2780_s14  ;;  %v1183_v54 = vpop.permute.xlu1 %1182 }
 0x2db   : > { %v1200_v17 = vadd.f32 %v1181_v39, %v1152_v55  ;;  %v1201_v31 = vadd.f32 %v1183_v54, %v1153_v11  ;;  %v1543_v55 = vmul.f32 %v4820_v9, %v4805_v45  ;;  %v1544_v11 = vmul.f32 %v4821_v22, %v4807_v62  ;;  %v4826_v9 = vld [vmem:[#allocation51_spill] sm:$0xff]  ;;  %v4827_v22 = vld [vmem:[#allocation52_spill] sm:$0xff] }
 0x2dd   : > { %1220 = vrot.lane.b32.xlu0 %v1200_v17, %s2780_s14 }
 0x2de   : > { %v1350_v3 = vpop.permute.xlu0 %1349  ;;  %1222 = vrot.lane.b32.xlu1 %v1201_v31, %s2780_s14  ;;  %v1352_v60 = vpop.permute.xlu1 %1351 }
 0x2df   : > { %v1373_v34 = vadd.f32 %v1350_v3, %v1325_v14  ;;  %v1374_v26 = vadd.f32 %v1352_v60, %v1326_v46  ;;  %v1547_v14 = vmul.f32 %v4822_v10, %v4809_v37  ;;  %v1548_v46 = vmul.f32 %v4823_v35, %v4804_v49  ;;  %v4828_v10 = vld [vmem:[#allocation55_spill] sm:$0xff] }
 0x2e1   : > { %1389 = vrot.lane.b32.xlu0 %v1373_v34, %s2782_s22 }
 0x2e2   : > { %v1358_v52 = vpop.permute.xlu0 %1357  ;;  %1391 = vrot.lane.b32.xlu1 %v1374_v26, %s2782_s22  ;;  %v1360_v50 = vpop.permute.xlu1 %1359 }
 0x2e3   : > { %v1377_v0 = vadd.f32 %v1358_v52, %v1329_v58  ;;  %v1378_v32 = vadd.f32 %v1360_v50, %v1330_v43  ;;  %v1720_v58 = vmul.f32 %v4824_v12, %v4805_v45  ;;  %v1721_v43 = vmul.f32 %v4825_v42, %v4807_v62  ;;  %v4832_v42 = vld [vmem:[#allocation20_spill] sm:$0xff] }
 0x2e5   : > { %1397 = vrot.lane.b32.xlu0 %v1377_v0, %s2782_s22 }
 0x2e6   : > { %v1568_v39 = vpop.permute.xlu0 %1567  ;;  %1399 = vrot.lane.b32.xlu1 %v1378_v32, %s2782_s22  ;;  %v1570_v54 = vpop.permute.xlu1 %1569 }
 0x2e7   : > { %v1591_v17 = vadd.f32 %v1568_v39, %v1543_v55  ;;  %v1592_v31 = vadd.f32 %v1570_v54, %v1544_v11  ;;  %v1724_v55 = vmul.f32 %v4826_v9, %v4809_v37  ;;  %v1725_v11 = vmul.f32 %v4827_v22, %v4804_v49 }
 0x2e9   : > { %1607 = vrot.lane.b32.xlu0 %v1591_v17, %s2772_s20 }
 0x2ea   : > { %v1576_v3 = vpop.permute.xlu0 %1575  ;;  %1609 = vrot.lane.b32.xlu1 %v1592_v31, %s2772_s20  ;;  %v1578_v60 = vpop.permute.xlu1 %1577 }
 0x2eb   : > { %v1595_v34 = vadd.f32 %v1576_v3, %v1547_v14  ;;  %v1596_v26 = vadd.f32 %v1578_v60, %v1548_v46  ;;  %v4829_v14 = vld [vmem:[#allocation57_spill] sm:$0xff]  ;;  %v4830_v46 = vld [vmem:[#allocation16_spill] sm:$0xff] }
 0x2ec   : > { %v1898_v35 = vsel %vm826_vm3, %v4829_v14, %v4828_v10  ;;  %v4831_v3 = vld [vmem:[#allocation4_spill] sm:$0xff]  ;;  %v4836_v14 = vld [vmem:[#allocation29_spill] sm:$0xff] }
 0x2ed   : > { %1615 = vrot.lane.b32.xlu0 %v1595_v34, %s2772_s20  ;;  %v958_v60 = vmul.f32 %v4831_v3, %v4830_v46  ;;  %v1938_v12 = vmul.f32 %v1898_v35, %v3580_v47  ;;  %v4834_v47 = vld [vmem:[#allocation25_spill] sm:$0xff]  ;;  %v1154_v35 = vmul.f32 %v4836_v14, %v3232_v15 }
 0x2ee   : > { %v1745_v52 = vpop.permute.xlu0 %1744  ;;  %1617 = vrot.lane.b32.xlu1 %v1596_v26, %s2772_s20  ;;  %v1747_v50 = vpop.permute.xlu1 %1746  ;;  %v1150_v22 = vmul.f32 %v4834_v47, %v4830_v46 }
 0x2ef   : > { %v1768_v0 = vadd.f32 %v1745_v52, %v1720_v58  ;;  %v1769_v32 = vadd.f32 %v1747_v50, %v1721_v43  ;;  %v962_v43 = vmul.f32 %v4832_v42, %v3232_v15 }
 0x2f1   : > { %1784 = vrot.lane.b32.xlu0 %v1768_v0, %s4796_s12  ;;  %v4833_v0 = vld [vmem:[#allocation5_spill] sm:$0xff] }
 0x2f2   : > { %v1753_v39 = vpop.permute.xlu0 %1752  ;;  %1786 = vrot.lane.b32.xlu1 %v1769_v32, %s4796_s12  ;;  %v1755_v54 = vpop.permute.xlu1 %1754  ;;  %v959_v32 = vmul.f32 %v4833_v0, %v3251_v19 }
 0x2f3   : > { %v1772_v17 = vadd.f32 %v1753_v39, %v1724_v55  ;;  %v1773_v31 = vadd.f32 %v1755_v54, %v1725_v11  ;;  %v4835_v54 = vld [vmem:[#allocation21_spill] sm:$0xff] }
 0x2f5   : > { %1792 = vrot.lane.b32.xlu0 %v1772_v17, %s4796_s12  ;;  %v963_v17 = vmul.f32 %v4835_v54, %v3253_v20 }
 0x2f6   : > { %v985_v34 = vpop.permute.xlu0 %984  ;;  %1794 = vrot.lane.b32.xlu1 %v1773_v31, %s4796_s12  ;;  %v4303_v58 = vpop.permute.xlu1 %2063 }
 0x2f7   : > { %v1006_v26 = vadd.f32 %v985_v34, %v958_v60  ;;  %v4837_v34 = vld [vmem:[#allocation26_spill] sm:$0xff] }
 0x2f9   : > { %1024 = vrot.lane.b32.xlu0 %v1006_v26, %s2768_s19  ;;  %v1151_v26 = vmul.f32 %v4837_v34, %v3251_v19 }
 0x2fa   : > { %v993_v52 = vpop.permute.xlu0 %992  ;;  %1954 = vrot.lane.b32.xlu1 %v1938_v12, %s2782_s22 }
 0x2fb   : > { %v1010_v50 = vadd.f32 %v993_v52, %v962_v43  ;;  %v4838_v43 = vld [vmem:[#allocation33_spill] sm:$0xff] }
 0x2fc   : > { %v987_v9 = vpop.permute.xlu1 %986  ;;  %v1327_v52 = vmul.f32 %v4838_v43, %v4830_v46 }
 0x2fd   : > { %v1007_v55 = vadd.f32 %v987_v9, %v959_v32  ;;  %1032 = vrot.lane.b32.xlu0 %v1010_v50, %s2768_s19  ;;  %v4839_v32 = vld [vmem:[#allocation30_spill] sm:$0xff] }
 0x2fe   : > { %v1177_v11 = vpop.permute.xlu0 %1176  ;;  %v1155_v9 = vmul.f32 %v4839_v32, %v3253_v20 }
 0x2ff   : > { %v1198_v39 = vadd.f32 %v1177_v11, %v1150_v22  ;;  %1026 = vrot.lane.b32.xlu1 %v1007_v55, %s2768_s19  ;;  %v4840_v22 = vld [vmem:[#allocation37_spill] sm:$0xff] }
 0x300   : > { %v995_v31 = vpop.permute.xlu1 %994  ;;  %v1331_v11 = vmul.f32 %v4840_v22, %v3232_v15 }
 0x301   : > { %v1011_v10 = vadd.f32 %v995_v31, %v963_v17  ;;  %1216 = vrot.lane.b32.xlu0 %v1198_v39, %s2780_s14  ;;  %v4841_v17 = vld [vmem:[#allocation34_spill] sm:$0xff] }
 0x302   : > { %v1185_v3 = vpop.permute.xlu0 %1184  ;;  %v1328_v31 = vmul.f32 %v4841_v17, %v3251_v19 }
 0x303   : > { %v1202_v60 = vadd.f32 %v1185_v3, %v1154_v35  ;;  %1034 = vrot.lane.b32.xlu1 %v1011_v10, %s2768_s19  ;;  %v4842_v35 = vld [vmem:[#allocation41_spill] sm:$0xff] }
 0x304   : > { %v1179_v12 = vpop.permute.xlu1 %1178  ;;  %v1545_v3 = vmul.f32 %v4842_v35, %v4830_v46  ;;  %v4848_v35 = vld [vmem:[#allocation54_spill] sm:$0xff] }
 0x305   : > { %v1199_v42 = vadd.f32 %v1179_v12, %v1151_v26  ;;  %1224 = vrot.lane.b32.xlu0 %v1202_v60, %s2780_s14  ;;  %v4843_v26 = vld [vmem:[#allocation38_spill] sm:$0xff] }
 0x306   : > { %v1354_v50 = vpop.permute.xlu0 %1353  ;;  %v1332_v12 = vmul.f32 %v4843_v26, %v3253_v20 }
 0x307   : > { %v1375_v0 = vadd.f32 %v1354_v50, %v1327_v52  ;;  %1218 = vrot.lane.b32.xlu1 %v1199_v42, %s2780_s14  ;;  %v4844_v52 = vld [vmem:[#allocation45_spill] sm:$0xff] }
 0x308   : > { %v1187_v55 = vpop.permute.xlu1 %1186  ;;  %v1549_v50 = vmul.f32 %v4844_v52, %v3232_v15 }
 0x309   : > { %v1203_v47 = vadd.f32 %v1187_v55, %v1155_v9  ;;  %1393 = vrot.lane.b32.xlu0 %v1375_v0, %s2782_s22  ;;  %v4845_v9 = vld [vmem:[#allocation42_spill] sm:$0xff] }
 0x30a   : > { %v1362_v39 = vpop.permute.xlu0 %1361  ;;  %v1546_v55 = vmul.f32 %v4845_v9, %v3251_v19  ;;  %v4851_v9 = vld [vmem:[#allocation63_spill] sm:$0xff] }
 0x30b   : > { %v1379_v54 = vadd.f32 %v1362_v39, %v1331_v11  ;;  %1226 = vrot.lane.b32.xlu1 %v1203_v47, %s2780_s14  ;;  %v4846_v11 = vld [vmem:[#allocation49_spill] sm:$0xff] }
 0x30c   : > { %v1356_v10 = vpop.permute.xlu1 %1355  ;;  %v1722_v39 = vmul.f32 %v4846_v11, %v4830_v46 }
 0x30d   : > { %v1376_v14 = vadd.f32 %v1356_v10, %v1328_v31  ;;  %1401 = vrot.lane.b32.xlu0 %v1379_v54, %s2782_s22  ;;  %v4847_v31 = vld [vmem:[#allocation46_spill] sm:$0xff] }
 0x30e   : > { %v1572_v60 = vpop.permute.xlu0 %1571  ;;  %v1550_v10 = vmul.f32 %v4847_v31, %v3253_v20 }
 0x30f   : > { %v1593_v34 = vadd.f32 %v1572_v60, %v1545_v3  ;;  %1395 = vrot.lane.b32.xlu1 %v1376_v14, %s2782_s22  ;;  %v1726_v3 = vmul.f32 %v4848_v35, %v3232_v15  ;;  %v1901_v35 = vsel %vm826_vm3, %v4133_v27, %v4123_v41  ;;  %v4857_v41 = vld [vmem:[#allocation67_spill] sm:$0xff] }
 0x310   : > { %v1364_v42 = vpop.permute.xlu1 %1363 }
 0x311   : > { %v1380_v43 = vadd.f32 %v1364_v42, %v1332_v12  ;;  %1611 = vrot.lane.b32.xlu0 %v1593_v34, %s2772_s20  ;;  %v4849_v12 = vld [vmem:[#allocation50_spill] sm:$0xff] }
 0x312   : > { %v1580_v0 = vpop.permute.xlu0 %1579  ;;  %v1723_v42 = vmul.f32 %v4849_v12, %v3251_v19  ;;  %v4856_v12 = vld [vmem:[#allocation58_spill] sm:$0xff] }
 0x313   : > { %v1597_v32 = vadd.f32 %v1580_v0, %v1549_v50  ;;  %1403 = vrot.lane.b32.xlu1 %v1380_v43, %s2782_s22  ;;  %v4850_v0 = vld [vmem:[#allocation53_spill] sm:$0xff] }
 0x314   : > { %v1574_v47 = vpop.permute.xlu1 %1573 }
 0x315   : > { %v1594_v22 = vadd.f32 %v1574_v47, %v1546_v55  ;;  %1619 = vrot.lane.b32.xlu0 %v1597_v32, %s2772_s20  ;;  %v1727_v32 = vmul.f32 %v4850_v0, %v3253_v20  ;;  %v4852_v55 = vld [vmem:[#allocation65_spill] sm:$0xff]  ;;  %v2740_v0 = vld [vmem:[%s4694_s3 + $0x20] sm:$0xff] }
 0x316   : > { %v1749_v54 = vpop.permute.xlu0 %1748  ;;  %v1899_v47 = vsel %vm826_vm3, %v4852_v55, %v4851_v9 }
 0x317   : > { %v1770_v17 = vadd.f32 %v1749_v54, %v1722_v39  ;;  %1613 = vrot.lane.b32.xlu1 %v1594_v22, %s2772_s20  ;;  %v2739_v39 = vld [vmem:[%s4695_s4 + $0x38] sm:$0xff]  ;;  %v4853_v54 = vld [vmem:[#allocation68_spill] sm:$0xff] }
 0x318   : > { %v1582_v14 = vpop.permute.xlu1 %1581 }
 0x319   : > { %v1598_v60 = vadd.f32 %v1582_v14, %v1550_v10  ;;  %1788 = vrot.lane.b32.xlu0 %v1770_v17, %s4796_s12  ;;  %v4854_v17 = vld [vmem:[#allocation69_spill] sm:$0xff]  ;;  %v1939_v14 = vmul.f32 %v1899_v47, %v3728_v63  ;;  %v1941_v63 = vmul.f32 %v1901_v35, %v4004_v40  ;;  %v4858_v40 = vld [vmem:[#allocation70_spill] sm:$0xff] }
 0x31a   : > { %v1757_v34 = vpop.permute.xlu0 %1756  ;;  %v1900_v31 = vsel %vm826_vm3, %v4854_v17, %v4853_v54  ;;  %v1904_v55 = vsel %vm826_vm3, %v4858_v40, %v4151_v30 }
 0x31b   : > { %v1774_v26 = vadd.f32 %v1757_v34, %v1726_v3  ;;  %1621 = vrot.lane.b32.xlu1 %v1598_v60, %s2772_s20  ;;  %v1940_v60 = vmul.f32 %v1900_v31, %v3760_v1  ;;  %v1903_v1 = vsel %vm826_vm3, %v4857_v41, %v4148_v13  ;;  %v2741_v13 = vld [vmem:[%s4694_s3 + $0x28] sm:$0xff]  ;;  %v1944_v17 = vmul.f32 %v1904_v55, %v3963_v61 }
 0x31c   : > { %v1751_v43 = vpop.permute.xlu1 %1750  ;;  %v2075_v31 = vsel %vm826_vm3, %v4161_v33, %v4203_v51  ;;  %v2076_v61 = vsel %vm826_vm3, %v4167_v21, %v4209_v23 }
 0x31d   : > { %v1771_v52 = vadd.f32 %v1751_v43, %v1723_v42  ;;  %1796 = vrot.lane.b32.xlu0 %v1774_v26, %s4796_s12  ;;  %v4855_v26 = vld [vmem:[#allocation56_spill] sm:$0xff]  ;;  %v2116_v51 = vmul.f32 %v2076_v61, %v3843_v6  ;;  %v2079_v6 = vsel %vm826_vm3, %v4183_v36, %v4227_v59 }
 0x31e   : > { %v4360_v50 = vpop.permute.xlu0 %2061  ;;  %v1902_v42 = vsel %vm826_vm3, %v4856_v12, %v4855_v26 }
 0x31f   : > { %1790 = vrot.lane.b32.xlu1 %v1771_v52, %s4796_s12 }
 0x320   : > { %v1759_v22 = vpop.permute.xlu1 %1758 }
 0x321   : > { %v1775_v11 = vadd.f32 %v1759_v22, %v1727_v32  ;;  %2097 = vrot.lane.b32.xlu0 %v2739_v39, %s2780_s14  ;;  %v1942_v32 = vmul.f32 %v2740_v0, %v1902_v42  ;;  %v1943_v22 = vmul.f32 %v2741_v13, %v1903_v1  ;;  %v1905_v39 = vsel %vm826_vm3, %v4140_v48, %v4155_v53 }
 0x322   : > { %v4375_v10 = vpop.permute.xlu0 %2065  ;;  %v1945_v35 = vmul.f32 %v1905_v39, %v4030_v25  ;;  %v2115_v53 = vmul.f32 %v2075_v31, %v3835_v56  ;;  %v2077_v25 = vsel %vm826_vm3, %v4173_v5, %v4215_v2  ;;  %v2078_v56 = vsel %vm826_vm3, %v4177_v18, %v4221_v38 }
 0x323   : > { %1798 = vrot.lane.b32.xlu1 %v1775_v11, %s4796_s12  ;;  %v2117_v23 = vmul.f32 %v2077_v25, %v4011_v7  ;;  %v2118_v2 = vmul.f32 %v2078_v56, %v4058_v24  ;;  %v2080_v7 = vsel %vm826_vm3, %v4189_v4, %v4360_v50  ;;  %v2119_v38 = vmul.f32 %v2079_v6, %v3861_v8 }
 0x324   : > { %v1907_v3 = vpop.permute.xlu1 %1906  ;;  %v2081_v24 = vsel %vm826_vm3, %v4193_v29, %v4303_v58  ;;  %v2120_v59 = vmul.f32 %v2080_v7, %v3869_v44  ;;  %v2082_v8 = vsel %vm826_vm3, %v4197_v16, %v4375_v10 }
 0x325   : > { %v4384_v34 = vmul.f32 %v1907_v3, %v4805_v45  ;;  %1956 = vrot.lane.b32.xlu0 %v1939_v14, %s2782_s22  ;;  %v2122_v44 = vmul.f32 %v2082_v8, %v4072_v28  ;;  %v4859_v28 = vld [vmem:[#allocation22_spill] sm:$0xff] }
 0x326   : > { %v1909_v43 = vpop.permute.xlu0 %1908 }
 0x327   : > { %v4392_v52 = vmul.f32 %v1909_v43, %v4807_v62  ;;  %1958 = vrot.lane.b32.xlu1 %v1940_v60, %s2782_s22 }
 0x328   : > { %v1911_v27 = vpop.permute.xlu1 %1910 }
 0x329   : > { %v4402_v9 = vmul.f32 %v1911_v27, %v4830_v46  ;;  %1960 = vrot.lane.b32.xlu0 %v1941_v63, %s2782_s22 }
 0x32a   : > { %v1913_v47 = vpop.permute.xlu0 %1912 }
 0x32b   : > { %v4412_v11 = vmul.f32 %v1913_v47, %v3251_v19  ;;  %1962 = vrot.lane.b32.xlu1 %v1942_v32, %s2782_s22 }
 0x32c   : > { %v1915_v54 = vpop.permute.xlu1 %1914 }
 0x32d   : > { %v4420_v30 = vmul.f32 %v1915_v54, %v4809_v37  ;;  %1964 = vrot.lane.b32.xlu0 %v1943_v22, %s2782_s22 }
 0x32e   : > { %v1917_v14 = vpop.permute.xlu0 %1916 }
 0x32f   : > { %v4428_v3 = vmul.f32 %v1917_v14, %v4804_v49  ;;  %1966 = vrot.lane.b32.xlu1 %v1944_v17, %s2782_s22 }
 0x330   : > { %v1919_v48 = vpop.permute.xlu1 %1918 }
 0x331   : > { %v4436_v60 = vmul.f32 %v1919_v48, %v3232_v15  ;;  %1968 = vrot.lane.b32.xlu0 %v1945_v35, %s2782_s22 }
 0x332   : > { %v1921_v33 = vpop.permute.xlu0 %1920 }
 0x333   : > { %v4444_v26 = vmul.f32 %v1921_v33, %v3253_v20  ;;  %2131 = vrot.lane.b32.xlu1 %v2115_v53, %s2780_s14 }
 0x334   : > { %v2084_v21 = vpop.permute.xlu1 %2083 }
 0x335   : > { %v4452_v12 = vmul.f32 %v2084_v21, %v4805_v45  ;;  %2133 = vrot.lane.b32.xlu0 %v2116_v51, %s2780_s14 }
 0x336   : > { %v2086_v5 = vpop.permute.xlu0 %2085 }
 0x337   : > { %v4460_v42 = vmul.f32 %v2086_v5, %v4807_v62  ;;  %2135 = vrot.lane.b32.xlu1 %v2117_v23, %s2780_s14 }
 0x338   : > { %v2088_v18 = vpop.permute.xlu1 %2087 }
 0x339   : > { %v4468_v45 = vmul.f32 %v2088_v18, %v4830_v46  ;;  %2137 = vrot.lane.b32.xlu0 %v2118_v2, %s2780_s14  ;;  %v2121_v46 = vmul.f32 %v2081_v24, %v4036_v57 }
 0x33a   : > { %v2090_v36 = vpop.permute.xlu0 %2089 }
 0x33b   : > { %v4476_v62 = vmul.f32 %v2090_v36, %v3251_v19  ;;  %2139 = vrot.lane.b32.xlu1 %v2119_v38, %s2780_s14 }
 0x33c   : > { %v2092_v4 = vpop.permute.xlu1 %2091 }
 0x33d   : > { %v4484_v50 = vmul.f32 %v2092_v4, %v4809_v37  ;;  %2141 = vrot.lane.b32.xlu0 %v2120_v59, %s2780_s14 }
 0x33e   : > { %v2094_v29 = vpop.permute.xlu0 %2093 }
 0x33f   : > { %v4489_v19 = vmul.f32 %v2094_v29, %v4804_v49  ;;  %2143 = vrot.lane.b32.xlu1 %v2121_v46, %s2780_s14 }
 0x340   : > { %v2096_v58 = vpop.permute.xlu1 %2095 }
 0x341   : > { %v4493_v16 = vmul.f32 %v2096_v58, %v3232_v15  ;;  %2145 = vrot.lane.b32.xlu0 %v2122_v44, %s2780_s14 }
 0x343   : > { %v1021_v57 = vpop.permute.xlu0 %1020  ;;  %1831 = vrot.lane.b32.xlu1 %v4859_v28, %s2772_s20 }
 0x344   : > { %1044 = vst.msk [vmem:[%s4500_s17] sm:$0xff] %vm859_vm2, %v1021_v57  ;;  %v1023_v15 = vpop.permute.xlu1 %1022 }
 0x345   : > { %1045 = vst.msk [vmem:[%s4500_s17 + $0x8] sm:$0xff] %vm859_vm2, %v1023_v15 }
 0x347   : > { %v1029_v49 = vpop.permute.xlu0 %1028 }
 0x348   : > { %1048 = vst.msk [vmem:[%s4500_s17 + $0x20] sm:$0xff] %vm859_vm2, %v1029_v49  ;;  %v1031_v37 = vpop.permute.xlu1 %1030 }
 0x349   : > { %1049 = vst.msk [vmem:[%s4500_s17 + $0x28] sm:$0xff] %vm859_vm2, %v1031_v37 }
 0x34b   : > { %v1213_v10 = vpop.permute.xlu0 %1212 }
 0x34c   : > { %2533 = vst.msk [vmem:[%s3597_s21 + $0x40] sm:$0xff] %vm859_vm2, %v1213_v10  ;;  %v1215_v43 = vpop.permute.xlu1 %1214 }
 0x34d   : > { %2534 = vst.msk [vmem:[%s3597_s21 + $0x48] sm:$0xff] %vm859_vm2, %v1215_v43 }
 0x34f   : > { %v1221_v63 = vpop.permute.xlu0 %1220 }
 0x350   : > { %2537 = vst.msk [vmem:[%s3597_s21 + $0x60] sm:$0xff] %vm859_vm2, %v1221_v63  ;;  %v1223_v41 = vpop.permute.xlu1 %1222 }
 0x351   : > { %2538 = vst.msk [vmem:[%s3597_s21 + $0x68] sm:$0xff] %vm859_vm2, %v1223_v41 }
 0x353   : > { %v1390_v1 = vpop.permute.xlu0 %1389 }
 0x354   : > { %2541 = vst.msk [vmem:[%s4500_s17 + $0x40] sm:$0xff] %vm859_vm2, %v1390_v1  ;;  %v1392_v27 = vpop.permute.xlu1 %1391 }
 0x355   : > { %2542 = vst.msk [vmem:[%s4500_s17 + $0x48] sm:$0xff] %vm859_vm2, %v1392_v27 }
 0x357   : > { %v1398_v0 = vpop.permute.xlu0 %1397 }
 0x358   : > { %2545 = vst.msk [vmem:[%s4500_s17 + $0x60] sm:$0xff] %vm859_vm2, %v1398_v0  ;;  %v1400_v32 = vpop.permute.xlu1 %1399 }
 0x359   : > { %2546 = vst.msk [vmem:[%s4500_s17 + $0x68] sm:$0xff] %vm859_vm2, %v1400_v32 }
 0x35b   : > { %v1608_v40 = vpop.permute.xlu0 %1607 }
 0x35c   : > { %2557 = vst.msk [vmem:[%s3597_s21 + $0x80] sm:$0xff] %vm859_vm2, %v1608_v40  ;;  %v1610_v55 = vpop.permute.xlu1 %1609 }
 0x35d   : > { %2558 = vst.msk [vmem:[%s3597_s21 + $0x88] sm:$0xff] %vm859_vm2, %v1610_v55 }
 0x35f   : > { %v1616_v47 = vpop.permute.xlu0 %1615 }
 0x360   : > { %2561 = vst.msk [vmem:[%s3597_s21 + $0xa0] sm:$0xff] %vm859_vm2, %v1616_v47  ;;  %v1618_v13 = vpop.permute.xlu1 %1617 }
 0x361   : > { %2562 = vst.msk [vmem:[%s3597_s21 + $0xa8] sm:$0xff] %vm859_vm2, %v1618_v13  ;;  %v4863_v13 = vld [vmem:[#allocation19_spill] sm:$0xff] }
 0x363   : > { %v1785_v22 = vpop.permute.xlu0 %1784 }
 0x364   : > { %2565 = vst.msk [vmem:[%s4500_s17 + $0x80] sm:$0xff] %vm859_vm2, %v1785_v22  ;;  %v1787_v39 = vpop.permute.xlu1 %1786  ;;  %v4864_v22 = vld [vmem:[#allocation9_spill] sm:$0xff] }
 0x365   : > { %2566 = vst.msk [vmem:[%s4500_s17 + $0x88] sm:$0xff] %vm859_vm2, %v1787_v39  ;;  %v4865_v39 = vld [vmem:[#allocation13_spill] sm:$0xff] }
 0x367   : > { %v1793_v54 = vpop.permute.xlu0 %1792 }
 0x368   : > { %2569 = vst.msk [vmem:[%s4500_s17 + $0xa0] sm:$0xff] %vm859_vm2, %v1793_v54  ;;  %v1795_v17 = vpop.permute.xlu1 %1794  ;;  %v4866_v54 = vld [vmem:[#allocation18_spill] sm:$0xff] }
 0x369   : > { %2570 = vst.msk [vmem:[%s4500_s17 + $0xa8] sm:$0xff] %vm859_vm2, %v1795_v17 }
 0x36b   : > { %v1025_v31 = vpop.permute.xlu0 %1024 }
 0x36c   : > { %1046 = vst.msk [vmem:[%s4500_s17 + $0x10] sm:$0xff] %vm859_vm2, %v1025_v31  ;;  %v1955_v14 = vpop.permute.xlu1 %1954 }
 0x36d   : > { %v1978_v35 = vadd.f32 %v1955_v14, %v4384_v34 }
 0x36f   : > { %v1033_v61 = vpop.permute.xlu0 %1032  ;;  %1994 = vrot.lane.b32.xlu0 %v1978_v35, %s4795_s11 }
 0x370   : > { %1050 = vst.msk [vmem:[%s4500_s17 + $0x30] sm:$0xff] %vm859_vm2, %v1033_v61 }
 0x371   : > { %v1027_v48 = vpop.permute.xlu1 %1026 }
 0x372   : > { %1047 = vst.msk [vmem:[%s4500_s17 + $0x18] sm:$0xff] %vm859_vm2, %v1027_v48 }
 0x373   : > { %v1217_v53 = vpop.permute.xlu0 %1216 }
 0x374   : > { %2535 = vst.msk [vmem:[%s3597_s21 + $0x50] sm:$0xff] %vm859_vm2, %v1217_v53 }
 0x375   : > { %v1035_v25 = vpop.permute.xlu1 %1034 }
 0x376   : > { %1051 = vst.msk [vmem:[%s4500_s17 + $0x38] sm:$0xff] %vm859_vm2, %v1035_v25 }
 0x377   : > { %v1225_v34 = vpop.permute.xlu0 %1224 }
 0x378   : > { %2539 = vst.msk [vmem:[%s3597_s21 + $0x70] sm:$0xff] %vm859_vm2, %v1225_v34 }
 0x379   : > { %v1219_v33 = vpop.permute.xlu1 %1218 }
 0x37a   : > { %2536 = vst.msk [vmem:[%s3597_s21 + $0x58] sm:$0xff] %vm859_vm2, %v1219_v33 }
 0x37b   : > { %v1394_v51 = vpop.permute.xlu0 %1393 }
 0x37c   : > { %2543 = vst.msk [vmem:[%s4500_s17 + $0x50] sm:$0xff] %vm859_vm2, %v1394_v51 }
 0x37d   : > { %v1227_v56 = vpop.permute.xlu1 %1226 }
 0x37e   : > { %2540 = vst.msk [vmem:[%s3597_s21 + $0x78] sm:$0xff] %vm859_vm2, %v1227_v56 }
 0x37f   : > { %v1402_v21 = vpop.permute.xlu0 %1401 }
 0x380   : > { %2547 = vst.msk [vmem:[%s4500_s17 + $0x70] sm:$0xff] %vm859_vm2, %v1402_v21 }
 0x381   : > { %v1396_v23 = vpop.permute.xlu1 %1395 }
 0x382   : > { %2544 = vst.msk [vmem:[%s4500_s17 + $0x58] sm:$0xff] %vm859_vm2, %v1396_v23 }
 0x383   : > { %v1612_v6 = vpop.permute.xlu0 %1611 }
 0x384   : > { %2559 = vst.msk [vmem:[%s3597_s21 + $0x90] sm:$0xff] %vm859_vm2, %v1612_v6 }
 0x385   : > { %v1404_v5 = vpop.permute.xlu1 %1403 }
 0x386   : > { %2548 = vst.msk [vmem:[%s4500_s17 + $0x78] sm:$0xff] %vm859_vm2, %v1404_v5 }
 0x387   : > { %v1620_v2 = vpop.permute.xlu0 %1619 }
 0x388   : > { %2563 = vst.msk [vmem:[%s3597_s21 + $0xb0] sm:$0xff] %vm859_vm2, %v1620_v2 }
 0x389   : > { %v1614_v7 = vpop.permute.xlu1 %1613 }
 0x38a   : > { %2560 = vst.msk [vmem:[%s3597_s21 + $0x98] sm:$0xff] %vm859_vm2, %v1614_v7 }
 0x38b   : > { %v1789_v18 = vpop.permute.xlu0 %1788 }
 0x38c   : > { %2567 = vst.msk [vmem:[%s4500_s17 + $0x90] sm:$0xff] %vm859_vm2, %v1789_v18 }
 0x38d   : > { %v1622_v38 = vpop.permute.xlu1 %1621 }
 0x38e   : > { %2564 = vst.msk [vmem:[%s3597_s21 + $0xb8] sm:$0xff] %vm859_vm2, %v1622_v38 }
 0x38f   : > { %v1797_v24 = vpop.permute.xlu0 %1796 }
 0x390   : > { %2571 = vst.msk [vmem:[%s4500_s17 + $0xb0] sm:$0xff] %vm859_vm2, %v1797_v24 }
 0x391   : > { %v1791_v36 = vpop.permute.xlu1 %1790 }
 0x392   : > { %2568 = vst.msk [vmem:[%s4500_s17 + $0x98] sm:$0xff] %vm859_vm2, %v1791_v36 }
 0x393   : > { %v2098_v59 = vpop.permute.xlu0 %2097 }
 0x395   : > { %v1799_v8 = vpop.permute.xlu1 %1798 }
 0x396   : > { %2572 = vst.msk [vmem:[%s4500_s17 + $0xb8] sm:$0xff] %vm859_vm2, %v1799_v8 }
 0x397   : > { %v1957_v4 = vpop.permute.xlu0 %1956 }
 0x398   : > { %v1979_v46 = vadd.f32 %v1957_v4, %v4392_v52 }
 0x399   : > { %v1959_v29 = vpop.permute.xlu1 %1958 }
 0x39a   : > { %v1980_v44 = vadd.f32 %v1959_v29, %v4402_v9  ;;  %1996 = vrot.lane.b32.xlu1 %v1979_v46, %s4795_s11 }
 0x39b   : > { %v1961_v58 = vpop.permute.xlu0 %1960 }
 0x39c   : > { %v1981_v57 = vadd.f32 %v1961_v58, %v4412_v11  ;;  %1998 = vrot.lane.b32.xlu0 %v1980_v44, %s4795_s11 }
 0x39d   : > { %v1963_v15 = vpop.permute.xlu1 %1962 }
 0x39e   : > { %v1982_v49 = vadd.f32 %v1963_v15, %v4420_v30  ;;  %2000 = vrot.lane.b32.xlu1 %v1981_v57, %s4795_s11 }
 0x39f   : > { %v1965_v37 = vpop.permute.xlu0 %1964 }
 0x3a0   : > { %v1983_v10 = vadd.f32 %v1965_v37, %v4428_v3  ;;  %2002 = vrot.lane.b32.xlu0 %v1982_v49, %s4795_s11 }
 0x3a1   : > { %v1967_v52 = vpop.permute.xlu1 %1966 }
 0x3a2   : > { %v1984_v9 = vadd.f32 %v1967_v52, %v4436_v60  ;;  %2004 = vrot.lane.b32.xlu1 %v1983_v10, %s4795_s11 }
 0x3a3   : > { %v1969_v43 = vpop.permute.xlu0 %1968 }
 0x3a4   : > { %v1985_v11 = vadd.f32 %v1969_v43, %v4444_v26  ;;  %2006 = vrot.lane.b32.xlu0 %v1984_v9, %s4795_s11 }
 0x3a5   : > { %v2132_v63 = vpop.permute.xlu1 %2131 }
 0x3a6   : > { %v2155_v30 = vadd.f32 %v2132_v63, %v4452_v12  ;;  %2008 = vrot.lane.b32.xlu1 %v1985_v11, %s4795_s11 }
 0x3a7   : > { %v2134_v41 = vpop.permute.xlu0 %2133 }
 0x3a8   : > { %v2156_v3 = vadd.f32 %v2134_v41, %v4460_v42  ;;  %2171 = vrot.lane.b32.xlu0 %v2155_v30, %s2769_s9 }
 0x3a9   : > { %v2136_v1 = vpop.permute.xlu1 %2135 }
 0x3aa   : > { %v2157_v60 = vadd.f32 %v2136_v1, %v4468_v45  ;;  %2173 = vrot.lane.b32.xlu1 %v2156_v3, %s2769_s9  ;;  %v2114_v45 = vmul.f32 %v2098_v59, %v3253_v20  ;;  %v4861_v20 = vld [vmem:[#allocation12_spill] sm:$0xff] }
 0x3ab   : > { %v2138_v27 = vpop.permute.xlu0 %2137 }
 0x3ac   : > { %v2158_v26 = vadd.f32 %v2138_v27, %v4476_v62  ;;  %2175 = vrot.lane.b32.xlu0 %v2157_v60, %s2769_s9 }
 0x3ad   : > { %v2140_v0 = vpop.permute.xlu1 %2139 }
 0x3ae   : > { %v2159_v12 = vadd.f32 %v2140_v0, %v4484_v50  ;;  %2177 = vrot.lane.b32.xlu1 %v2158_v26, %s2769_s9 }
 0x3af   : > { %v2142_v32 = vpop.permute.xlu0 %2141 }
 0x3b0   : > { %v2160_v42 = vadd.f32 %v2142_v32, %v4489_v19  ;;  %2179 = vrot.lane.b32.xlu0 %v2159_v12, %s2769_s9  ;;  %v4860_v19 = vld [vmem:[#allocation8_spill] sm:$0xff] }
 0x3b1   : > { %v2144_v40 = vpop.permute.xlu1 %2143 }
 0x3b2   : > { %v2161_v55 = vadd.f32 %v2144_v40, %v4493_v16  ;;  %2181 = vrot.lane.b32.xlu1 %v2160_v42, %s2769_s9  ;;  %v4862_v16 = vld [vmem:[#allocation17_spill] sm:$0xff] }
 0x3b3   : > { %v2146_v62 = vpop.permute.xlu0 %2145 }
 0x3b4   : > { %v2162_v47 = vadd.f32 %v2146_v62, %v2114_v45  ;;  %2183 = vrot.lane.b32.xlu0 %v2161_v55, %s2769_s9 }
 0x3b5   : > { %v1832_v50 = vpop.permute.xlu1 %1831 }
 0x3b6   : > { %2580 = vst.msk [vmem:[%s3185_s23 + $0xb8] sm:$0xff] %vm859_vm2, %v1832_v50  ;;  %2185 = vrot.lane.b32.xlu1 %v2162_v47, %s2769_s9 }
 0x3b8   : > { %2204 = vrot.lane.b32.xlu0 %v4860_v19, %s4795_s11 }
 0x3ba   : > { %2206 = vrot.lane.b32.xlu1 %v4861_v20, %s4795_s11 }
 0x3bc   : > { %2208 = vrot.lane.b32.xlu0 %v4862_v16, %s4795_s11 }
 0x3be   : > { %2210 = vrot.lane.b32.xlu1 %v4863_v13, %s4795_s11 }
 0x3c0   : > { %2212 = vrot.lane.b32.xlu0 %v4864_v22, %s4795_s11 }
 0x3c2   : > { %2214 = vrot.lane.b32.xlu1 %v4865_v39, %s4795_s11 }
 0x3c4   : > { %2216 = vrot.lane.b32.xlu0 %v4866_v54, %s4795_s11 }
 0x3c6   : > { %2218 = vrot.lane.b32.xlu1 %v4859_v28, %s4795_s11 }
 0x3e1   : > { %v1995_v17 = vpop.permute.xlu0 %1994 }
 0x3e2   : > { %2581 = vst.msk [vmem:[%s3597_s21 + $0xc0] sm:$0xff] %vm859_vm2, %v1995_v17 }
 0x40c   : > { %v1997_v31 = vpop.permute.xlu1 %1996 }
 0x40d   : > { %2582 = vst.msk [vmem:[%s3597_s21 + $0xc8] sm:$0xff] %vm859_vm2, %v1997_v31 }
 0x40e   : > { %v1999_v14 = vpop.permute.xlu0 %1998 }
 0x40f   : > { %2583 = vst.msk [vmem:[%s3597_s21 + $0xd0] sm:$0xff] %vm859_vm2, %v1999_v14 }
 0x410   : > { %v2001_v35 = vpop.permute.xlu1 %2000 }
 0x411   : > { %2584 = vst.msk [vmem:[%s3597_s21 + $0xd8] sm:$0xff] %vm859_vm2, %v2001_v35 }
 0x412   : > { %v2003_v61 = vpop.permute.xlu0 %2002 }
 0x413   : > { %2585 = vst.msk [vmem:[%s3597_s21 + $0xe0] sm:$0xff] %vm859_vm2, %v2003_v61 }
 0x414   : > { %v2005_v28 = vpop.permute.xlu1 %2004 }
 0x415   : > { %2586 = vst.msk [vmem:[%s3597_s21 + $0xe8] sm:$0xff] %vm859_vm2, %v2005_v28 }
 0x416   : > { %v2007_v48 = vpop.permute.xlu0 %2006 }
 0x417   : > { %2587 = vst.msk [vmem:[%s3597_s21 + $0xf0] sm:$0xff] %vm859_vm2, %v2007_v48 }
 0x418   : > { %v2009_v53 = vpop.permute.xlu1 %2008 }
 0x419   : > { %2588 = vst.msk [vmem:[%s3597_s21 + $0xf8] sm:$0xff] %vm859_vm2, %v2009_v53 }
 0x41a   : > { %v2172_v25 = vpop.permute.xlu0 %2171 }
 0x41b   : > { %2589 = vst.msk [vmem:[%s4500_s17 + $0xc0] sm:$0xff] %vm859_vm2, %v2172_v25 }
 0x41c   : > { %v2174_v34 = vpop.permute.xlu1 %2173 }
 0x41d   : > { %2590 = vst.msk [vmem:[%s4500_s17 + $0xc8] sm:$0xff] %vm859_vm2, %v2174_v34 }
 0x41e   : > { %v2176_v33 = vpop.permute.xlu0 %2175 }
 0x41f   : > { %2591 = vst.msk [vmem:[%s4500_s17 + $0xd0] sm:$0xff] %vm859_vm2, %v2176_v33 }
 0x420   : > { %v2178_v51 = vpop.permute.xlu1 %2177 }
 0x421   : > { %2592 = vst.msk [vmem:[%s4500_s17 + $0xd8] sm:$0xff] %vm859_vm2, %v2178_v51 }
 0x422   : > { %v2180_v56 = vpop.permute.xlu0 %2179 }
 0x423   : > { %2593 = vst.msk [vmem:[%s4500_s17 + $0xe0] sm:$0xff] %vm859_vm2, %v2180_v56 }
 0x424   : > { %v2182_v21 = vpop.permute.xlu1 %2181 }
 0x425   : > { %2594 = vst.msk [vmem:[%s4500_s17 + $0xe8] sm:$0xff] %vm859_vm2, %v2182_v21 }
 0x426   : > { %v2184_v23 = vpop.permute.xlu0 %2183 }
 0x427   : > { %2595 = vst.msk [vmem:[%s4500_s17 + $0xf0] sm:$0xff] %vm859_vm2, %v2184_v23 }
 0x428   : > { %v2186_v6 = vpop.permute.xlu1 %2185 }
 0x429   : > { %2596 = vst.msk [vmem:[%s4500_s17 + $0xf8] sm:$0xff] %vm859_vm2, %v2186_v6 }
 0x42a   : > { %v2205_v5 = vpop.permute.xlu0 %2204 }
 0x42b   : > { %2597 = vst.msk [vmem:[%s3185_s23 + $0xc0] sm:$0xff] %vm859_vm2, %v2205_v5 }
 0x42c   : > { %v2207_v2 = vpop.permute.xlu1 %2206 }
 0x42d   : > { %2598 = vst.msk [vmem:[%s3185_s23 + $0xc8] sm:$0xff] %vm859_vm2, %v2207_v2 }
 0x42e   : > { %v2209_v7 = vpop.permute.xlu0 %2208 }
 0x42f   : > { %2599 = vst.msk [vmem:[%s3185_s23 + $0xd0] sm:$0xff] %vm859_vm2, %v2209_v7 }
 0x430   : > { %v2211_v18 = vpop.permute.xlu1 %2210 }
 0x431   : > { %2600 = vst.msk [vmem:[%s3185_s23 + $0xd8] sm:$0xff] %vm859_vm2, %v2211_v18 }
 0x432   : > { %v2213_v38 = vpop.permute.xlu0 %2212 }
 0x433   : > { %2601 = vst.msk [vmem:[%s3185_s23 + $0xe0] sm:$0xff] %vm859_vm2, %v2213_v38 }
 0x434   : > { %v2215_v24 = vpop.permute.xlu1 %2214 }
 0x435   : > { %2602 = vst.msk [vmem:[%s3185_s23 + $0xe8] sm:$0xff] %vm859_vm2, %v2215_v24 }
 0x436   : > { %v2217_v36 = vpop.permute.xlu0 %2216 }
 0x437   : > { %2603 = vst.msk [vmem:[%s3185_s23 + $0xf0] sm:$0xff] %vm859_vm2, %v2217_v36 }
 0x438   : > { %v2219_v59 = vpop.permute.xlu1 %2218 }
 0x439   : > { %2604 = vst.msk [vmem:[%s3185_s23 + $0xf8] sm:$0xff] %vm859_vm2, %v2219_v59 }
 0x43a PF: > { %s19_s29 = sadd.s32 1, %s2764_s29   ;;  %s4867_s27 = smov %s2760_s28 }
 0x43b   : > { %p16_p5 = scmp.ge.s32.totalorder %s19_s29, 4   ;;  %s4868_s28 = smov %s4870_s30 }
 0x43d   :  { %18 = sbr.rel (!%p16_p5) target bundleno = 2 (0x2), region = 119 }

</bundles_post_ra>
